<compile_context>
chip_gen: v6e
topology: v6e:2x2x1
jax: 0.10.0
libtpu: 0.0.40
codegen_flags: <defaults>
</compile_context>

<pallas_src>
import jax
import jax.numpy as jnp
from jax.experimental import pallas as pl
from jax.experimental.pallas import tpu as pltpu


# ----------------------------------------------------------------------------
# Kernel A: sub-pixel transposed convolution (all 4 phases in one MXU matmul)
# ----------------------------------------------------------------------------
def _make_deconv_phase_kernel(c_in, wp, p):
    """x buffer: (1, c_in, (Hp+4)*Wp); output: (1, 4*c_out, Hp*Wp) per batch item."""
    off = 2 * wp  # halo offset into the flat buffer

    def kernel(x_ref, w_ref, b_ref, o_ref, patch_sc):
        # Build one 3x3-tap im2col slab: rows are (tap, ci), lanes are padded-grid pixels.
        for kh in range(3):
            for kw in range(3):
                t = kh * 3 + kw
                start = off + (kh - 1) * wp + (kw - 1)
                patch_sc[pl.ds(t * c_in, c_in), :] = (
                    x_ref[0, :, pl.ds(start, p)].astype(jnp.bfloat16))
        # One bf16 MXU matmul for all 4 sub-pixel phases, f32 accumulation.
        y = jnp.dot(w_ref[...], patch_sc[...],
                    preferred_element_type=jnp.float32)          # (4*c_out, P)
        y = y + b_ref[...]                                       # deconv bias
        o_ref[...] = y.reshape(1, y.shape[0], p)                 # lane-dense store (P lanes)

    return kernel


# ----------------------------------------------------------------------------
# Kernel B: fused [concat -> conv3x3 -> ReLU -> conv3x3 -> ReLU]
# ----------------------------------------------------------------------------
def _make_up_conv_kernel(co, wp, p):
    """up/skip buffers: (1, co, (Hp+4)*Wp); output: (1, co, Hp*Wp) per batch item."""
    off = 2 * wp
    k1 = 9 * co

    def kernel(up_ref, skip_ref, mask_ref, w1_ref, b1_ref, w2_ref, b2_ref,
               o_ref, patch_sc, h1_sc):
        # conv1 im2col: rows [0, 9co) from `up`, rows [9co, 18co) from `skip`
        # (this *is* the channel concat, fused by splitting conv1's weights along Cin).
        for kh in range(3):
            for kw in range(3):
                t = kh * 3 + kw
                start = off + (kh - 1) * wp + (kw - 1)
                patch_sc[pl.ds(t * co, co), :] = (
                    up_ref[0, :, pl.ds(start, p)].astype(jnp.bfloat16))
                patch_sc[pl.ds(k1 + t * co, co), :] = (
                    skip_ref[0, :, pl.ds(start, p)].astype(jnp.bfloat16))

        mask = mask_ref[...]                                     # (1, P): zeros on pad ring

        # conv1: single K = 2*9*co bf16 matmul, f32 epilogue.
        h1 = jnp.dot(w1_ref[...], patch_sc[...],
                     preferred_element_type=jnp.float32)         # (co, P)
        h1 = jnp.maximum(h1 + b1_ref[...], 0.0) * mask

        # Stage the padded conv1 activation in VMEM (ring + halo kept zero) for conv2's taps.
        h1_sc[...] = jnp.zeros_like(h1_sc)
        h1_sc[:, pl.ds(off, p)] = h1

        # conv2 im2col (reuses the first 9*co rows of the patch scratch).
        for kh in range(3):
            for kw in range(3):
                t = kh * 3 + kw
                start = off + (kh - 1) * wp + (kw - 1)
                patch_sc[pl.ds(t * co, co), :] = (
                    h1_sc[:, pl.ds(start, p)].astype(jnp.bfloat16))

        y = jnp.dot(w2_ref[...], patch_sc[pl.ds(0, k1), :],
                    preferred_element_type=jnp.float32)          # (co, P)
        y = jnp.maximum(y + b2_ref[...], 0.0) * mask
        o_ref[...] = y.reshape(1, co, p)                         # lane-dense store

    return kernel


# ----------------------------------------------------------------------------
# Wrapper-side layout / weight preparation (cheap XLA glue on tiny tensors)
# ----------------------------------------------------------------------------
def _cf_flat(x):
    """(N, C, H, W) -> channels-first flat buffer (N, C, (H+6)*(W+2)):
    1-pixel zero ring, rows flattened into lanes, plus 2 zero halo rows on each side."""
    n, c, h, w = x.shape
    wp = w + 2
    xp = jnp.pad(x, ((0, 0), (0, 0), (1, 1), (1, 1)))
    xf = xp.reshape(n, c, (h + 2) * wp)
    return jnp.pad(xf, ((0, 0), (0, 0), (2 * wp, 2 * wp)))


def _deconv_phase_weights(wt):
    """ConvTranspose2d weight (Cin, Cout, 4, 4) -> (4*Cout, 9*Cin) bf16 effective weight:
    phase p = 2r+s of the stride-2 output equals a 3x3 conv of the 1-padded input."""
    cin, cout, _, _ = wt.shape
    w = jnp.zeros((2, 2, cout, 3, 3, cin), jnp.float32)
    for r in range(2):
        for s in range(2):
            for kh in range(r, r + 2):          # im2col tap rows used by phase r
                for kw in range(s, s + 2):      # im2col tap cols used by phase s
                    w = w.at[r, s, :, kh, kw, :].set(
                        jnp.transpose(wt[:, :, 3 - 2 * kh + r, 3 - 2 * kw + s]))
    return w.reshape(4 * cout, 9 * cin).astype(jnp.bfloat16)


def _conv_matmul_weights(w):
    """Conv2d weight (Cout, Cin, 3, 3) -> (Cout, 9*Cin) bf16, tap-major / channel-minor
    (matches the im2col row order built inside the kernels)."""
    cout, cin, _, _ = w.shape
    return jnp.transpose(w, (2, 3, 1, 0)).reshape(9 * cin, cout).T.astype(jnp.bfloat16)


# ----------------------------------------------------------------------------
# unetUp forward (Pallas path)
# ----------------------------------------------------------------------------
def unet_up_forward(params, x1, skip):
    n, c1, h, w = x1.shape
    co = params["up_w"].shape[1]
    assert c1 == 2 * co

    # ---- stage 1: ConvTranspose2d(4, stride=2, pad=1) via sub-pixel decomposition ----
    hp1, wp1 = h + 2, w + 2
    p1 = hp1 * wp1
    lb1 = (hp1 + 4) * wp1
    x1_cf = _cf_flat(x1)
    w_eff = _deconv_phase_weights(params["up_w"])                      # (4co, 9c1) bf16
    b_eff = jnp.tile(params["up_b"], 4).reshape(4 * co, 1).astype(jnp.float32)

    phases = pl.pallas_call(
        _make_deconv_phase_kernel(c1, wp1, p1),
        out_shape=jax.ShapeDtypeStruct((n, 4 * co, p1), jnp.float32),
        grid=(n,),
        in_specs=[
            pl.BlockSpec((1, c1, lb1), lambda i: (i, 0, 0)),
            pl.BlockSpec((4 * co, 9 * c1), lambda i: (0, 0)),
            pl.BlockSpec((4 * co, 1), lambda i: (0, 0)),
        ],
        out_specs=pl.BlockSpec((1, 4 * co, p1), lambda i: (i, 0, 0)),
        scratch_shapes=[pltpu.VMEM((9 * c1, p1), jnp.bfloat16)],
        compiler_params=pltpu.CompilerParams(dimension_semantics=("parallel",)),
    )(x1_cf, w_eff, b_eff)

    # Interleave the 4 phases into the 2x-upsampled image (tiny XLA shuffle, ~16 KiB).
    ph = phases.reshape(n, 2, 2, co, hp1, wp1)[:, :, :, :, 1:h + 1, 1:w + 1]
    up = jnp.transpose(ph, (0, 3, 4, 1, 5, 2)).reshape(n, co, 2 * h, 2 * w)

    # PyTorch-style center crop of the skip connection if spatial dims differ.
    if skip.shape[2] != up.shape[2] or skip.shape[3] != up.shape[3]:
        d2 = (skip.shape[2] - up.shape[2]) // 2
        d3 = (skip.shape[3] - up.shape[3]) // 2
        skip = skip[:, :, d2:d2 + up.shape[2], d3:d3 + up.shape[3]]

    # ---- stage 2: fused concat + conv3x3 + ReLU + conv3x3 + ReLU ----
    hu, wu = up.shape[2], up.shape[3]
    hp2, wp2 = hu + 2, wu + 2
    p2 = hp2 * wp2
    lb2 = (hp2 + 4) * wp2
    up_cf = _cf_flat(up)
    skip_cf = _cf_flat(skip.astype(jnp.float32))
    mask = jnp.pad(jnp.ones((hu, wu), jnp.float32), 1).reshape(1, p2)

    w1u = _conv_matmul_weights(params["c1_w"][:, :co])    # `up` half of the concat
    w1s = _conv_matmul_weights(params["c1_w"][:, co:])    # `skip` half
    w1 = jnp.concatenate([w1u, w1s], axis=1)              # (co, 2*9*co)
    w2 = _conv_matmul_weights(params["c2_w"])             # (co, 9*co)
    b1 = params["c1_b"].reshape(co, 1).astype(jnp.float32)
    b2 = params["c2_b"].reshape(co, 1).astype(jnp.float32)

    out_flat = pl.pallas_call(
        _make_up_conv_kernel(co, wp2, p2),
        out_shape=jax.ShapeDtypeStruct((n, co, p2), jnp.float32),
        grid=(n,),
        in_specs=[
            pl.BlockSpec((1, co, lb2), lambda i: (i, 0, 0)),
            pl.BlockSpec((1, co, lb2), lambda i: (i, 0, 0)),
            pl.BlockSpec((1, p2), lambda i: (0, 0)),
            pl.BlockSpec((co, 18 * co), lambda i: (0, 0)),
            pl.BlockSpec((co, 1), lambda i: (0, 0)),
            pl.BlockSpec((co, 9 * co), lambda i: (0, 0)),
            pl.BlockSpec((co, 1), lambda i: (0, 0)),
        ],
        out_specs=pl.BlockSpec((1, co, p2), lambda i: (i, 0, 0)),
        scratch_shapes=[
            pltpu.VMEM((18 * co, p2), jnp.bfloat16),   # im2col slab
            pltpu.VMEM((co, lb2), jnp.float32),        # padded conv1 activation
        ],
        compiler_params=pltpu.CompilerParams(dimension_semantics=("parallel",)),
    )(up_cf, skip_cf, mask, w1, b1, w2, b2)

    return out_flat.reshape(n, co, hp2, wp2)[:, :, 1:-1, 1:-1]


# ----------------------------------------------------------------------------
# Pure-JAX reference (f32, HIGHEST precision) for validation
# ----------------------------------------------------------------------------
def unet_up_reference(params, x1, skip):
    hp = jax.lax.Precision.HIGHEST
    co = params["up_w"].shape[1]
    dn = ("NCHW", "OIHW", "NCHW")
    # ConvTranspose2d(k=4, s=2, p=1) == lhs-dilated conv with channel-swapped, flipped kernel.
    wdc = jnp.transpose(params["up_w"], (1, 0, 2, 3))[:, :, ::-1, ::-1]
    up = jax.lax.conv_general_dilated(
        x1, wdc, window_strides=(1, 1), padding=[(2, 2), (2, 2)],
        lhs_dilation=(2, 2), dimension_numbers=dn, precision=hp)
    up = up + params["up_b"].reshape(1, co, 1, 1)
    if skip.shape[2] != up.shape[2] or skip.shape[3] != up.shape[3]:
        d2 = (skip.shape[2] - up.shape[2]) // 2
        d3 = (skip.shape[3] - up.shape[3]) // 2
        skip = skip[:, :, d2:d2 + up.shape[2], d3:d3 + up.shape[3]]
    cat = jnp.concatenate([up, skip], axis=1)
    h = jax.lax.conv_general_dilated(cat, params["c1_w"], (1, 1), [(1, 1), (1, 1)],
                                     dimension_numbers=dn, precision=hp)
    h = jnp.maximum(h + params["c1_b"].reshape(1, co, 1, 1), 0.0)
    y = jax.lax.conv_general_dilated(h, params["c2_w"], (1, 1), [(1, 1), (1, 1)],
                                     dimension_numbers=dn, precision=hp)
    return jnp.maximum(y + params["c2_b"].reshape(1, co, 1, 1), 0.0)


if __name__ == "__main__":
    key = jax.random.PRNGKey(0)
    ks = jax.random.split(key, 8)

    # unetUp(out_size=4): inputs1 has 2*out_size channels at half resolution,
    # inputs2 (skip) has out_size channels at full resolution.
    n, out_size, h, w = 2, 4, 16, 16
    c1 = 2 * out_size

    params = {
        "up_w": jax.random.normal(ks[0], (c1, out_size, 4, 4), jnp.float32)
                / jnp.sqrt(16.0 * c1),
        "up_b": 0.05 * jax.random.normal(ks[1], (out_size,), jnp.float32),
        "c1_w": jax.random.normal(ks[2], (out_size, 2 * out_size, 3, 3), jnp.float32)
                / jnp.sqrt(9.0 * 2 * out_size),
        "c1_b": 0.05 * jax.random.normal(ks[3], (out_size,), jnp.float32),
        "c2_w": jax.random.normal(ks[4], (out_size, out_size, 3, 3), jnp.float32)
                / jnp.sqrt(9.0 * out_size),
        "c2_b": 0.05 * jax.random.normal(ks[5], (out_size,), jnp.float32),
    }
    inputs1 = jax.random.normal(ks[6], (n, c1, h, w), jnp.float32)          # (2, 8, 16, 16)
    inputs2 = jax.random.normal(ks[7], (n, out_size, 2 * h, 2 * w), jnp.float32)  # (2, 4, 32, 32)

    fwd = jax.jit(unet_up_forward)
    out = jax.block_until_ready(fwd(params, inputs1, inputs2))

    assert out.shape == (n, out_size, 2 * h, 2 * w), out.shape
    assert bool(jnp.all(jnp.isfinite(out)))

    # Validate against the f32 reference (kernel uses bf16 MXU operands -> loose tolerance).
    ref = unet_up_reference(params, inputs1, inputs2)
    err = float(jnp.max(jnp.abs(out - ref)))
    scale = float(jnp.max(jnp.abs(ref))) + 1.0
    assert err <= 5e-2 * scale, (err, scale)

    print("KERNEL_OK")
</pallas_src>

<mosaic_0001>
module attributes {stable_mosaic.version = 11 : i64} {
  func.func @kernel(%arg0: i32, %arg1: memref<1x8x396xf32, #tpu.memory_space<vmem>>, %arg2: memref<16x72xbf16, #tpu.memory_space<vmem>>, %arg3: memref<16x1xf32, #tpu.memory_space<vmem>>, %arg4: memref<1x16x324xf32, #tpu.memory_space<vmem>>, %arg5: memref<72x324xbf16, #tpu.memory_space<vmem>>) attributes {dimension_semantics = [#tpu.dimension_semantics<parallel>], iteration_bounds = array<i64: 2>, scalar_prefetch = 0 : i64, scratch_operands = 1 : i64, tpu.core_type = #tpu.core_type<tc>, window_params = [{transform_indices = @transform_0, window_bounds = array<i64: 1, 8, 396>}, {pipeline_mode = #tpu.pipeline_mode<synchronous>, transform_indices = @transform_1, window_bounds = array<i64: 16, 72>}, {pipeline_mode = #tpu.pipeline_mode<synchronous>, transform_indices = @transform_2, window_bounds = array<i64: 16, 1>}, {transform_indices = @transform_3, window_bounds = array<i64: 1, 16, 324>}]} {
    %c0 = arith.constant 0 : index
    %c0_0 = arith.constant 0 : index
    %c17 = arith.constant 17 : index
    %0 = vector.load %arg1[%c0, %c0_0, %c17] : memref<1x8x396xf32, #tpu.memory_space<vmem>>, vector<1x8x324xf32>
    %1 = vector.shape_cast %0 : vector<1x8x324xf32> to vector<8x324xf32>
    %2 = arith.truncf %1 : vector<8x324xf32> to vector<8x324xbf16>
    %c0_1 = arith.constant 0 : index
    %c0_2 = arith.constant 0 : index
    %3 = vector.load %arg5[%c0_1, %c0_2] : memref<72x324xbf16, #tpu.memory_space<vmem>>, vector<8x324xbf16>
    tpu.vector_store %arg5[%c0_1, %c0_2], %2 {strides = array<i32>} : memref<72x324xbf16, #tpu.memory_space<vmem>>, vector<8x324xbf16>,
    %c0_3 = arith.constant 0 : index
    %c0_4 = arith.constant 0 : index
    %c18 = arith.constant 18 : index
    %4 = vector.load %arg1[%c0_3, %c0_4, %c18] : memref<1x8x396xf32, #tpu.memory_space<vmem>>, vector<1x8x324xf32>
    %5 = vector.shape_cast %4 : vector<1x8x324xf32> to vector<8x324xf32>
    %6 = arith.truncf %5 : vector<8x324xf32> to vector<8x324xbf16>
    %c8 = arith.constant 8 : index
    %c0_5 = arith.constant 0 : index
    %7 = vector.load %arg5[%c8, %c0_5] : memref<72x324xbf16, #tpu.memory_space<vmem>>, vector<8x324xbf16>
    tpu.vector_store %arg5[%c8, %c0_5], %6 {strides = array<i32>} : memref<72x324xbf16, #tpu.memory_space<vmem>>, vector<8x324xbf16>,
    %c0_6 = arith.constant 0 : index
    %c0_7 = arith.constant 0 : index
    %c19 = arith.constant 19 : index
    %8 = vector.load %arg1[%c0_6, %c0_7, %c19] : memref<1x8x396xf32, #tpu.memory_space<vmem>>, vector<1x8x324xf32>
    %9 = vector.shape_cast %8 : vector<1x8x324xf32> to vector<8x324xf32>
    %10 = arith.truncf %9 : vector<8x324xf32> to vector<8x324xbf16>
    %c16 = arith.constant 16 : index
    %c0_8 = arith.constant 0 : index
    %11 = vector.load %arg5[%c16, %c0_8] : memref<72x324xbf16, #tpu.memory_space<vmem>>, vector<8x324xbf16>
    tpu.vector_store %arg5[%c16, %c0_8], %10 {strides = array<i32>} : memref<72x324xbf16, #tpu.memory_space<vmem>>, vector<8x324xbf16>,
    %c0_9 = arith.constant 0 : index
    %c0_10 = arith.constant 0 : index
    %c35 = arith.constant 35 : index
    %12 = vector.load %arg1[%c0_9, %c0_10, %c35] : memref<1x8x396xf32, #tpu.memory_space<vmem>>, vector<1x8x324xf32>
    %13 = vector.shape_cast %12 : vector<1x8x324xf32> to vector<8x324xf32>
    %14 = arith.truncf %13 : vector<8x324xf32> to vector<8x324xbf16>
    %c24 = arith.constant 24 : index
    %c0_11 = arith.constant 0 : index
    %15 = vector.load %arg5[%c24, %c0_11] : memref<72x324xbf16, #tpu.memory_space<vmem>>, vector<8x324xbf16>
    tpu.vector_store %arg5[%c24, %c0_11], %14 {strides = array<i32>} : memref<72x324xbf16, #tpu.memory_space<vmem>>, vector<8x324xbf16>,
    %c0_12 = arith.constant 0 : index
    %c0_13 = arith.constant 0 : index
    %c36 = arith.constant 36 : index
    %16 = vector.load %arg1[%c0_12, %c0_13, %c36] : memref<1x8x396xf32, #tpu.memory_space<vmem>>, vector<1x8x324xf32>
    %17 = vector.shape_cast %16 : vector<1x8x324xf32> to vector<8x324xf32>
    %18 = arith.truncf %17 : vector<8x324xf32> to vector<8x324xbf16>
    %c32 = arith.constant 32 : index
    %c0_14 = arith.constant 0 : index
    %19 = vector.load %arg5[%c32, %c0_14] : memref<72x324xbf16, #tpu.memory_space<vmem>>, vector<8x324xbf16>
    tpu.vector_store %arg5[%c32, %c0_14], %18 {strides = array<i32>} : memref<72x324xbf16, #tpu.memory_space<vmem>>, vector<8x324xbf16>,
    %c0_15 = arith.constant 0 : index
    %c0_16 = arith.constant 0 : index
    %c37 = arith.constant 37 : index
    %20 = vector.load %arg1[%c0_15, %c0_16, %c37] : memref<1x8x396xf32, #tpu.memory_space<vmem>>, vector<1x8x324xf32>
    %21 = vector.shape_cast %20 : vector<1x8x324xf32> to vector<8x324xf32>
    %22 = arith.truncf %21 : vector<8x324xf32> to vector<8x324xbf16>
    %c40 = arith.constant 40 : index
    %c0_17 = arith.constant 0 : index
    %23 = vector.load %arg5[%c40, %c0_17] : memref<72x324xbf16, #tpu.memory_space<vmem>>, vector<8x324xbf16>
    tpu.vector_store %arg5[%c40, %c0_17], %22 {strides = array<i32>} : memref<72x324xbf16, #tpu.memory_space<vmem>>, vector<8x324xbf16>,
    %c0_18 = arith.constant 0 : index
    %c0_19 = arith.constant 0 : index
    %c53 = arith.constant 53 : index
    %24 = vector.load %arg1[%c0_18, %c0_19, %c53] : memref<1x8x396xf32, #tpu.memory_space<vmem>>, vector<1x8x324xf32>
    %25 = vector.shape_cast %24 : vector<1x8x324xf32> to vector<8x324xf32>
    %26 = arith.truncf %25 : vector<8x324xf32> to vector<8x324xbf16>
    %c48 = arith.constant 48 : index
    %c0_20 = arith.constant 0 : index
    %27 = vector.load %arg5[%c48, %c0_20] : memref<72x324xbf16, #tpu.memory_space<vmem>>, vector<8x324xbf16>
    tpu.vector_store %arg5[%c48, %c0_20], %26 {strides = array<i32>} : memref<72x324xbf16, #tpu.memory_space<vmem>>, vector<8x324xbf16>,
    %c0_21 = arith.constant 0 : index
    %c0_22 = arith.constant 0 : index
    %c54 = arith.constant 54 : index
    %28 = vector.load %arg1[%c0_21, %c0_22, %c54] : memref<1x8x396xf32, #tpu.memory_space<vmem>>, vector<1x8x324xf32>
    %29 = vector.shape_cast %28 : vector<1x8x324xf32> to vector<8x324xf32>
    %30 = arith.truncf %29 : vector<8x324xf32> to vector<8x324xbf16>
    %c56 = arith.constant 56 : index
    %c0_23 = arith.constant 0 : index
    %31 = vector.load %arg5[%c56, %c0_23] : memref<72x324xbf16, #tpu.memory_space<vmem>>, vector<8x324xbf16>
    tpu.vector_store %arg5[%c56, %c0_23], %30 {strides = array<i32>} : memref<72x324xbf16, #tpu.memory_space<vmem>>, vector<8x324xbf16>,
    %c0_24 = arith.constant 0 : index
    %c0_25 = arith.constant 0 : index
    %c55 = arith.constant 55 : index
    %32 = vector.load %arg1[%c0_24, %c0_25, %c55] : memref<1x8x396xf32, #tpu.memory_space<vmem>>, vector<1x8x324xf32>
    %33 = vector.shape_cast %32 : vector<1x8x324xf32> to vector<8x324xf32>
    %34 = arith.truncf %33 : vector<8x324xf32> to vector<8x324xbf16>
    %c64 = arith.constant 64 : index
    %c0_26 = arith.constant 0 : index
    %35 = vector.load %arg5[%c64, %c0_26] : memref<72x324xbf16, #tpu.memory_space<vmem>>, vector<8x324xbf16>
    tpu.vector_store %arg5[%c64, %c0_26], %34 {strides = array<i32>} : memref<72x324xbf16, #tpu.memory_space<vmem>>, vector<8x324xbf16>,
    %c0_27 = arith.constant 0 : index
    %c0_28 = arith.constant 0 : index
    %36 = vector.load %arg2[%c0_27, %c0_28] : memref<16x72xbf16, #tpu.memory_space<vmem>>, vector<16x72xbf16>
    %c0_29 = arith.constant 0 : index
    %c0_30 = arith.constant 0 : index
    %37 = vector.load %arg5[%c0_29, %c0_30] : memref<72x324xbf16, #tpu.memory_space<vmem>>, vector<72x324xbf16>
    %cst = arith.constant dense<0.000000e+00> : vector<16x324xf32>
    %38 = tpu.matmul %36, %37, %cst {dimension_numbers = #tpu.dot_dimension_numbers<[1], [0], [0], [1], [0, 0, 1, 1], [], []>} : vector<16x72xbf16>, vector<72x324xbf16>, vector<16x324xf32> -> vector<16x324xf32>
    %c0_31 = arith.constant 0 : index
    %c0_32 = arith.constant 0 : index
    %39 = vector.load %arg3[%c0_31, %c0_32] : memref<16x1xf32, #tpu.memory_space<vmem>>, vector<16x1xf32>
    %40 = vector.broadcast %39 : vector<16x1xf32> to vector<16x324xf32>
    %41 = arith.addf %38, %40 : vector<16x324xf32>
    %42 = vector.shape_cast %41 : vector<16x324xf32> to vector<1x16x324xf32>
    %c0_33 = arith.constant 0 : index
    %c0_34 = arith.constant 0 : index
    %c0_35 = arith.constant 0 : index
    %43 = vector.load %arg4[%c0_33, %c0_34, %c0_35] : memref<1x16x324xf32, #tpu.memory_space<vmem>>, vector<1x16x324xf32>
    tpu.vector_store %arg4[%c0_33, %c0_34, %c0_35], %42 {strides = array<i32>} : memref<1x16x324xf32, #tpu.memory_space<vmem>>, vector<1x16x324xf32>,
    return
  }
  func.func @transform_0(%arg0: i32) -> (i32, i32, i32) {
    %c0_i32 = arith.constant 0 : i32
    %c0_i32_0 = arith.constant 0 : i32
    %c0_i32_1 = arith.constant 0 : i32
    return %arg0, %c0_i32, %c0_i32_0 : i32, i32, i32
  }
  func.func @transform_1(%arg0: i32) -> (i32, i32) {
    %c0_i32 = arith.constant 0 : i32
    %c0_i32_0 = arith.constant 0 : i32
    %c0_i32_1 = arith.constant 0 : i32
    return %c0_i32, %c0_i32_0 : i32, i32
  }
  func.func @transform_2(%arg0: i32) -> (i32, i32) {
    %c0_i32 = arith.constant 0 : i32
    %c0_i32_0 = arith.constant 0 : i32
    %c0_i32_1 = arith.constant 0 : i32
    return %c0_i32, %c0_i32_0 : i32, i32
  }
  func.func @transform_3(%arg0: i32) -> (i32, i32, i32) {
    %c0_i32 = arith.constant 0 : i32
    %c0_i32_0 = arith.constant 0 : i32
    %c0_i32_1 = arith.constant 0 : i32
    return %arg0, %c0_i32, %c0_i32_0 : i32, i32, i32
  }
}

module attributes {stable_mosaic.version = 11 : i64} {
  func.func @kernel(%arg0: i32, %arg1: memref<1x4x1292xf32, #tpu.memory_space<vmem>>, %arg2: memref<1x4x1292xf32, #tpu.memory_space<vmem>>, %arg3: memref<1x1156xf32, #tpu.memory_space<vmem>>, %arg4: memref<4x72xbf16, #tpu.memory_space<vmem>>, %arg5: memref<4x1xf32, #tpu.memory_space<vmem>>, %arg6: memref<4x36xbf16, #tpu.memory_space<vmem>>, %arg7: memref<4x1xf32, #tpu.memory_space<vmem>>, %arg8: memref<1x4x1156xf32, #tpu.memory_space<vmem>>, %arg9: memref<72x1156xbf16, #tpu.memory_space<vmem>>, %arg10: memref<4x1292xf32, #tpu.memory_space<vmem>>) attributes {dimension_semantics = [#tpu.dimension_semantics<parallel>], iteration_bounds = array<i64: 2>, scalar_prefetch = 0 : i64, scratch_operands = 2 : i64, tpu.core_type = #tpu.core_type<tc>, window_params = [{transform_indices = @transform_0, window_bounds = array<i64: 1, 4, 1292>}, {transform_indices = @transform_1, window_bounds = array<i64: 1, 4, 1292>}, {pipeline_mode = #tpu.pipeline_mode<synchronous>, transform_indices = @transform_2, window_bounds = array<i64: 1, 1156>}, {pipeline_mode = #tpu.pipeline_mode<synchronous>, transform_indices = @transform_3, window_bounds = array<i64: 4, 72>}, {pipeline_mode = #tpu.pipeline_mode<synchronous>, transform_indices = @transform_4, window_bounds = array<i64: 4, 1>}, {pipeline_mode = #tpu.pipeline_mode<synchronous>, transform_indices = @transform_5, window_bounds = array<i64: 4, 36>}, {pipeline_mode = #tpu.pipeline_mode<synchronous>, transform_indices = @transform_6, window_bounds = array<i64: 4, 1>}, {transform_indices = @transform_7, window_bounds = array<i64: 1, 4, 1156>}]} {
    %c0 = arith.constant 0 : index
    %c0_0 = arith.constant 0 : index
    %c33 = arith.constant 33 : index
    %0 = vector.load %arg1[%c0, %c0_0, %c33] : memref<1x4x1292xf32, #tpu.memory_space<vmem>>, vector<1x4x1156xf32>
    %1 = vector.shape_cast %0 : vector<1x4x1156xf32> to vector<4x1156xf32>
    %2 = arith.truncf %1 : vector<4x1156xf32> to vector<4x1156xbf16>
    %c0_1 = arith.constant 0 : index
    %c0_2 = arith.constant 0 : index
    %3 = vector.load %arg9[%c0_1, %c0_2] : memref<72x1156xbf16, #tpu.memory_space<vmem>>, vector<4x1156xbf16>
    tpu.vector_store %arg9[%c0_1, %c0_2], %2 {strides = array<i32>} : memref<72x1156xbf16, #tpu.memory_space<vmem>>, vector<4x1156xbf16>,
    %c0_3 = arith.constant 0 : index
    %c0_4 = arith.constant 0 : index
    %c33_5 = arith.constant 33 : index
    %4 = vector.load %arg2[%c0_3, %c0_4, %c33_5] : memref<1x4x1292xf32, #tpu.memory_space<vmem>>, vector<1x4x1156xf32>
    %5 = vector.shape_cast %4 : vector<1x4x1156xf32> to vector<4x1156xf32>
    %6 = arith.truncf %5 : vector<4x1156xf32> to vector<4x1156xbf16>
    %c36 = arith.constant 36 : index
    %c0_6 = arith.constant 0 : index
    %7 = vector.load %arg9[%c36, %c0_6] : memref<72x1156xbf16, #tpu.memory_space<vmem>>, vector<4x1156xbf16>
    tpu.vector_store %arg9[%c36, %c0_6], %6 {strides = array<i32>} : memref<72x1156xbf16, #tpu.memory_space<vmem>>, vector<4x1156xbf16>,
    %c0_7 = arith.constant 0 : index
    %c0_8 = arith.constant 0 : index
    %c34 = arith.constant 34 : index
    %8 = vector.load %arg1[%c0_7, %c0_8, %c34] : memref<1x4x1292xf32, #tpu.memory_space<vmem>>, vector<1x4x1156xf32>
    %9 = vector.shape_cast %8 : vector<1x4x1156xf32> to vector<4x1156xf32>
    %10 = arith.truncf %9 : vector<4x1156xf32> to vector<4x1156xbf16>
    %c4 = arith.constant 4 : index
    %c0_9 = arith.constant 0 : index
    %11 = vector.load %arg9[%c4, %c0_9] : memref<72x1156xbf16, #tpu.memory_space<vmem>>, vector<4x1156xbf16>
    tpu.vector_store %arg9[%c4, %c0_9], %10 {strides = array<i32>} : memref<72x1156xbf16, #tpu.memory_space<vmem>>, vector<4x1156xbf16>,
    %c0_10 = arith.constant 0 : index
    %c0_11 = arith.constant 0 : index
    %c34_12 = arith.constant 34 : index
    %12 = vector.load %arg2[%c0_10, %c0_11, %c34_12] : memref<1x4x1292xf32, #tpu.memory_space<vmem>>, vector<1x4x1156xf32>
    %13 = vector.shape_cast %12 : vector<1x4x1156xf32> to vector<4x1156xf32>
    %14 = arith.truncf %13 : vector<4x1156xf32> to vector<4x1156xbf16>
    %c40 = arith.constant 40 : index
    %c0_13 = arith.constant 0 : index
    %15 = vector.load %arg9[%c40, %c0_13] : memref<72x1156xbf16, #tpu.memory_space<vmem>>, vector<4x1156xbf16>
    tpu.vector_store %arg9[%c40, %c0_13], %14 {strides = array<i32>} : memref<72x1156xbf16, #tpu.memory_space<vmem>>, vector<4x1156xbf16>,
    %c0_14 = arith.constant 0 : index
    %c0_15 = arith.constant 0 : index
    %c35 = arith.constant 35 : index
    %16 = vector.load %arg1[%c0_14, %c0_15, %c35] : memref<1x4x1292xf32, #tpu.memory_space<vmem>>, vector<1x4x1156xf32>
    %17 = vector.shape_cast %16 : vector<1x4x1156xf32> to vector<4x1156xf32>
    %18 = arith.truncf %17 : vector<4x1156xf32> to vector<4x1156xbf16>
    %c8 = arith.constant 8 : index
    %c0_16 = arith.constant 0 : index
    %19 = vector.load %arg9[%c8, %c0_16] : memref<72x1156xbf16, #tpu.memory_space<vmem>>, vector<4x1156xbf16>
    tpu.vector_store %arg9[%c8, %c0_16], %18 {strides = array<i32>} : memref<72x1156xbf16, #tpu.memory_space<vmem>>, vector<4x1156xbf16>,
    %c0_17 = arith.constant 0 : index
    %c0_18 = arith.constant 0 : index
    %c35_19 = arith.constant 35 : index
    %20 = vector.load %arg2[%c0_17, %c0_18, %c35_19] : memref<1x4x1292xf32, #tpu.memory_space<vmem>>, vector<1x4x1156xf32>
    %21 = vector.shape_cast %20 : vector<1x4x1156xf32> to vector<4x1156xf32>
    %22 = arith.truncf %21 : vector<4x1156xf32> to vector<4x1156xbf16>
    %c44 = arith.constant 44 : index
    %c0_20 = arith.constant 0 : index
    %23 = vector.load %arg9[%c44, %c0_20] : memref<72x1156xbf16, #tpu.memory_space<vmem>>, vector<4x1156xbf16>
    tpu.vector_store %arg9[%c44, %c0_20], %22 {strides = array<i32>} : memref<72x1156xbf16, #tpu.memory_space<vmem>>, vector<4x1156xbf16>,
    %c0_21 = arith.constant 0 : index
    %c0_22 = arith.constant 0 : index
    %c67 = arith.constant 67 : index
    %24 = vector.load %arg1[%c0_21, %c0_22, %c67] : memref<1x4x1292xf32, #tpu.memory_space<vmem>>, vector<1x4x1156xf32>
    %25 = vector.shape_cast %24 : vector<1x4x1156xf32> to vector<4x1156xf32>
    %26 = arith.truncf %25 : vector<4x1156xf32> to vector<4x1156xbf16>
    %c12 = arith.constant 12 : index
    %c0_23 = arith.constant 0 : index
    %27 = vector.load %arg9[%c12, %c0_23] : memref<72x1156xbf16, #tpu.memory_space<vmem>>, vector<4x1156xbf16>
    tpu.vector_store %arg9[%c12, %c0_23], %26 {strides = array<i32>} : memref<72x1156xbf16, #tpu.memory_space<vmem>>, vector<4x1156xbf16>,
    %c0_24 = arith.constant 0 : index
    %c0_25 = arith.constant 0 : index
    %c67_26 = arith.constant 67 : index
    %28 = vector.load %arg2[%c0_24, %c0_25, %c67_26] : memref<1x4x1292xf32, #tpu.memory_space<vmem>>, vector<1x4x1156xf32>
    %29 = vector.shape_cast %28 : vector<1x4x1156xf32> to vector<4x1156xf32>
    %30 = arith.truncf %29 : vector<4x1156xf32> to vector<4x1156xbf16>
    %c48 = arith.constant 48 : index
    %c0_27 = arith.constant 0 : index
    %31 = vector.load %arg9[%c48, %c0_27] : memref<72x1156xbf16, #tpu.memory_space<vmem>>, vector<4x1156xbf16>
    tpu.vector_store %arg9[%c48, %c0_27], %30 {strides = array<i32>} : memref<72x1156xbf16, #tpu.memory_space<vmem>>, vector<4x1156xbf16>,
    %c0_28 = arith.constant 0 : index
    %c0_29 = arith.constant 0 : index
    %c68 = arith.constant 68 : index
    %32 = vector.load %arg1[%c0_28, %c0_29, %c68] : memref<1x4x1292xf32, #tpu.memory_space<vmem>>, vector<1x4x1156xf32>
    %33 = vector.shape_cast %32 : vector<1x4x1156xf32> to vector<4x1156xf32>
    %34 = arith.truncf %33 : vector<4x1156xf32> to vector<4x1156xbf16>
    %c16 = arith.constant 16 : index
    %c0_30 = arith.constant 0 : index
    %35 = vector.load %arg9[%c16, %c0_30] : memref<72x1156xbf16, #tpu.memory_space<vmem>>, vector<4x1156xbf16>
    tpu.vector_store %arg9[%c16, %c0_30], %34 {strides = array<i32>} : memref<72x1156xbf16, #tpu.memory_space<vmem>>, vector<4x1156xbf16>,
    %c0_31 = arith.constant 0 : index
    %c0_32 = arith.constant 0 : index
    %c68_33 = arith.constant 68 : index
    %36 = vector.load %arg2[%c0_31, %c0_32, %c68_33] : memref<1x4x1292xf32, #tpu.memory_space<vmem>>, vector<1x4x1156xf32>
    %37 = vector.shape_cast %36 : vector<1x4x1156xf32> to vector<4x1156xf32>
    %38 = arith.truncf %37 : vector<4x1156xf32> to vector<4x1156xbf16>
    %c52 = arith.constant 52 : index
    %c0_34 = arith.constant 0 : index
    %39 = vector.load %arg9[%c52, %c0_34] : memref<72x1156xbf16, #tpu.memory_space<vmem>>, vector<4x1156xbf16>
    tpu.vector_store %arg9[%c52, %c0_34], %38 {strides = array<i32>} : memref<72x1156xbf16, #tpu.memory_space<vmem>>, vector<4x1156xbf16>,
    %c0_35 = arith.constant 0 : index
    %c0_36 = arith.constant 0 : index
    %c69 = arith.constant 69 : index
    %40 = vector.load %arg1[%c0_35, %c0_36, %c69] : memref<1x4x1292xf32, #tpu.memory_space<vmem>>, vector<1x4x1156xf32>
    %41 = vector.shape_cast %40 : vector<1x4x1156xf32> to vector<4x1156xf32>
    %42 = arith.truncf %41 : vector<4x1156xf32> to vector<4x1156xbf16>
    %c20 = arith.constant 20 : index
    %c0_37 = arith.constant 0 : index
    %43 = vector.load %arg9[%c20, %c0_37] : memref<72x1156xbf16, #tpu.memory_space<vmem>>, vector<4x1156xbf16>
    tpu.vector_store %arg9[%c20, %c0_37], %42 {strides = array<i32>} : memref<72x1156xbf16, #tpu.memory_space<vmem>>, vector<4x1156xbf16>,
    %c0_38 = arith.constant 0 : index
    %c0_39 = arith.constant 0 : index
    %c69_40 = arith.constant 69 : index
    %44 = vector.load %arg2[%c0_38, %c0_39, %c69_40] : memref<1x4x1292xf32, #tpu.memory_space<vmem>>, vector<1x4x1156xf32>
    %45 = vector.shape_cast %44 : vector<1x4x1156xf32> to vector<4x1156xf32>
    %46 = arith.truncf %45 : vector<4x1156xf32> to vector<4x1156xbf16>
    %c56 = arith.constant 56 : index
    %c0_41 = arith.constant 0 : index
    %47 = vector.load %arg9[%c56, %c0_41] : memref<72x1156xbf16, #tpu.memory_space<vmem>>, vector<4x1156xbf16>
    tpu.vector_store %arg9[%c56, %c0_41], %46 {strides = array<i32>} : memref<72x1156xbf16, #tpu.memory_space<vmem>>, vector<4x1156xbf16>,
    %c0_42 = arith.constant 0 : index
    %c0_43 = arith.constant 0 : index
    %c101 = arith.constant 101 : index
    %48 = vector.load %arg1[%c0_42, %c0_43, %c101] : memref<1x4x1292xf32, #tpu.memory_space<vmem>>, vector<1x4x1156xf32>
    %49 = vector.shape_cast %48 : vector<1x4x1156xf32> to vector<4x1156xf32>
    %50 = arith.truncf %49 : vector<4x1156xf32> to vector<4x1156xbf16>
    %c24 = arith.constant 24 : index
    %c0_44 = arith.constant 0 : index
    %51 = vector.load %arg9[%c24, %c0_44] : memref<72x1156xbf16, #tpu.memory_space<vmem>>, vector<4x1156xbf16>
    tpu.vector_store %arg9[%c24, %c0_44], %50 {strides = array<i32>} : memref<72x1156xbf16, #tpu.memory_space<vmem>>, vector<4x1156xbf16>,
    %c0_45 = arith.constant 0 : index
    %c0_46 = arith.constant 0 : index
    %c101_47 = arith.constant 101 : index
    %52 = vector.load %arg2[%c0_45, %c0_46, %c101_47] : memref<1x4x1292xf32, #tpu.memory_space<vmem>>, vector<1x4x1156xf32>
    %53 = vector.shape_cast %52 : vector<1x4x1156xf32> to vector<4x1156xf32>
    %54 = arith.truncf %53 : vector<4x1156xf32> to vector<4x1156xbf16>
    %c60 = arith.constant 60 : index
    %c0_48 = arith.constant 0 : index
    %55 = vector.load %arg9[%c60, %c0_48] : memref<72x1156xbf16, #tpu.memory_space<vmem>>, vector<4x1156xbf16>
    tpu.vector_store %arg9[%c60, %c0_48], %54 {strides = array<i32>} : memref<72x1156xbf16, #tpu.memory_space<vmem>>, vector<4x1156xbf16>,
    %c0_49 = arith.constant 0 : index
    %c0_50 = arith.constant 0 : index
    %c102 = arith.constant 102 : index
    %56 = vector.load %arg1[%c0_49, %c0_50, %c102] : memref<1x4x1292xf32, #tpu.memory_space<vmem>>, vector<1x4x1156xf32>
    %57 = vector.shape_cast %56 : vector<1x4x1156xf32> to vector<4x1156xf32>
    %58 = arith.truncf %57 : vector<4x1156xf32> to vector<4x1156xbf16>
    %c28 = arith.constant 28 : index
    %c0_51 = arith.constant 0 : index
    %59 = vector.load %arg9[%c28, %c0_51] : memref<72x1156xbf16, #tpu.memory_space<vmem>>, vector<4x1156xbf16>
    tpu.vector_store %arg9[%c28, %c0_51], %58 {strides = array<i32>} : memref<72x1156xbf16, #tpu.memory_space<vmem>>, vector<4x1156xbf16>,
    %c0_52 = arith.constant 0 : index
    %c0_53 = arith.constant 0 : index
    %c102_54 = arith.constant 102 : index
    %60 = vector.load %arg2[%c0_52, %c0_53, %c102_54] : memref<1x4x1292xf32, #tpu.memory_space<vmem>>, vector<1x4x1156xf32>
    %61 = vector.shape_cast %60 : vector<1x4x1156xf32> to vector<4x1156xf32>
    %62 = arith.truncf %61 : vector<4x1156xf32> to vector<4x1156xbf16>
    %c64 = arith.constant 64 : index
    %c0_55 = arith.constant 0 : index
    %63 = vector.load %arg9[%c64, %c0_55] : memref<72x1156xbf16, #tpu.memory_space<vmem>>, vector<4x1156xbf16>
    tpu.vector_store %arg9[%c64, %c0_55], %62 {strides = array<i32>} : memref<72x1156xbf16, #tpu.memory_space<vmem>>, vector<4x1156xbf16>,
    %c0_56 = arith.constant 0 : index
    %c0_57 = arith.constant 0 : index
    %c103 = arith.constant 103 : index
    %64 = vector.load %arg1[%c0_56, %c0_57, %c103] : memref<1x4x1292xf32, #tpu.memory_space<vmem>>, vector<1x4x1156xf32>
    %65 = vector.shape_cast %64 : vector<1x4x1156xf32> to vector<4x1156xf32>
    %66 = arith.truncf %65 : vector<4x1156xf32> to vector<4x1156xbf16>
    %c32 = arith.constant 32 : index
    %c0_58 = arith.constant 0 : index
    %67 = vector.load %arg9[%c32, %c0_58] : memref<72x1156xbf16, #tpu.memory_space<vmem>>, vector<4x1156xbf16>
    tpu.vector_store %arg9[%c32, %c0_58], %66 {strides = array<i32>} : memref<72x1156xbf16, #tpu.memory_space<vmem>>, vector<4x1156xbf16>,
    %c0_59 = arith.constant 0 : index
    %c0_60 = arith.constant 0 : index
    %c103_61 = arith.constant 103 : index
    %68 = vector.load %arg2[%c0_59, %c0_60, %c103_61] : memref<1x4x1292xf32, #tpu.memory_space<vmem>>, vector<1x4x1156xf32>
    %69 = vector.shape_cast %68 : vector<1x4x1156xf32> to vector<4x1156xf32>
    %70 = arith.truncf %69 : vector<4x1156xf32> to vector<4x1156xbf16>
    %c68_62 = arith.constant 68 : index
    %c0_63 = arith.constant 0 : index
    %71 = vector.load %arg9[%c68_62, %c0_63] : memref<72x1156xbf16, #tpu.memory_space<vmem>>, vector<4x1156xbf16>
    tpu.vector_store %arg9[%c68_62, %c0_63], %70 {strides = array<i32>} : memref<72x1156xbf16, #tpu.memory_space<vmem>>, vector<4x1156xbf16>,
    %c0_64 = arith.constant 0 : index
    %c0_65 = arith.constant 0 : index
    %72 = vector.load %arg3[%c0_64, %c0_65] : memref<1x1156xf32, #tpu.memory_space<vmem>>, vector<1x1156xf32>
    %c0_66 = arith.constant 0 : index
    %c0_67 = arith.constant 0 : index
    %73 = vector.load %arg4[%c0_66, %c0_67] : memref<4x72xbf16, #tpu.memory_space<vmem>>, vector<4x72xbf16>
    %c0_68 = arith.constant 0 : index
    %c0_69 = arith.constant 0 : index
    %74 = vector.load %arg9[%c0_68, %c0_69] : memref<72x1156xbf16, #tpu.memory_space<vmem>>, vector<72x1156xbf16>
    %cst = arith.constant dense<0.000000e+00> : vector<4x1156xf32>
    %75 = tpu.matmul %73, %74, %cst {dimension_numbers = #tpu.dot_dimension_numbers<[1], [0], [0], [1], [0, 0, 1, 1], [], []>} : vector<4x72xbf16>, vector<72x1156xbf16>, vector<4x1156xf32> -> vector<4x1156xf32>
    %c0_70 = arith.constant 0 : index
    %c0_71 = arith.constant 0 : index
    %76 = vector.load %arg5[%c0_70, %c0_71] : memref<4x1xf32, #tpu.memory_space<vmem>>, vector<4x1xf32>
    %77 = vector.broadcast %76 : vector<4x1xf32> to vector<4x1156xf32>
    %78 = arith.addf %75, %77 : vector<4x1156xf32>
    %cst_72 = arith.constant 0.000000e+00 : f32
    %79 = vector.broadcast %cst_72 : f32 to vector<4x1156xf32>
    %80 = arith.maximumf %78, %79 : vector<4x1156xf32>
    %81 = vector.broadcast %72 : vector<1x1156xf32> to vector<4x1156xf32>
    %82 = arith.mulf %80, %81 : vector<4x1156xf32>
    %cst_73 = arith.constant 0.000000e+00 : f32
    %83 = vector.broadcast %cst_73 : f32 to vector<4x1292xf32>
    %c0_74 = arith.constant 0 : index
    %c0_75 = arith.constant 0 : index
    %84 = vector.load %arg10[%c0_74, %c0_75] : memref<4x1292xf32, #tpu.memory_space<vmem>>, vector<4x1292xf32>
    tpu.vector_store %arg10[%c0_74, %c0_75], %83 {strides = array<i32>} : memref<4x1292xf32, #tpu.memory_space<vmem>>, vector<4x1292xf32>,
    %c0_76 = arith.constant 0 : index
    %c68_77 = arith.constant 68 : index
    %85 = vector.load %arg10[%c0_76, %c68_77] : memref<4x1292xf32, #tpu.memory_space<vmem>>, vector<4x1156xf32>
    tpu.vector_store %arg10[%c0_76, %c68_77], %82 {strides = array<i32>} : memref<4x1292xf32, #tpu.memory_space<vmem>>, vector<4x1156xf32>,
    %c0_78 = arith.constant 0 : index
    %c33_79 = arith.constant 33 : index
    %86 = vector.load %arg10[%c0_78, %c33_79] : memref<4x1292xf32, #tpu.memory_space<vmem>>, vector<4x1156xf32>
    %87 = arith.truncf %86 : vector<4x1156xf32> to vector<4x1156xbf16>
    %c0_80 = arith.constant 0 : index
    %c0_81 = arith.constant 0 : index
    %88 = vector.load %arg9[%c0_80, %c0_81] : memref<72x1156xbf16, #tpu.memory_space<vmem>>, vector<4x1156xbf16>
    tpu.vector_store %arg9[%c0_80, %c0_81], %87 {strides = array<i32>} : memref<72x1156xbf16, #tpu.memory_space<vmem>>, vector<4x1156xbf16>,
    %c0_82 = arith.constant 0 : index
    %c34_83 = arith.constant 34 : index
    %89 = vector.load %arg10[%c0_82, %c34_83] : memref<4x1292xf32, #tpu.memory_space<vmem>>, vector<4x1156xf32>
    %90 = arith.truncf %89 : vector<4x1156xf32> to vector<4x1156xbf16>
    %c4_84 = arith.constant 4 : index
    %c0_85 = arith.constant 0 : index
    %91 = vector.load %arg9[%c4_84, %c0_85] : memref<72x1156xbf16, #tpu.memory_space<vmem>>, vector<4x1156xbf16>
    tpu.vector_store %arg9[%c4_84, %c0_85], %90 {strides = array<i32>} : memref<72x1156xbf16, #tpu.memory_space<vmem>>, vector<4x1156xbf16>,
    %c0_86 = arith.constant 0 : index
    %c35_87 = arith.constant 35 : index
    %92 = vector.load %arg10[%c0_86, %c35_87] : memref<4x1292xf32, #tpu.memory_space<vmem>>, vector<4x1156xf32>
    %93 = arith.truncf %92 : vector<4x1156xf32> to vector<4x1156xbf16>
    %c8_88 = arith.constant 8 : index
    %c0_89 = arith.constant 0 : index
    %94 = vector.load %arg9[%c8_88, %c0_89] : memref<72x1156xbf16, #tpu.memory_space<vmem>>, vector<4x1156xbf16>
    tpu.vector_store %arg9[%c8_88, %c0_89], %93 {strides = array<i32>} : memref<72x1156xbf16, #tpu.memory_space<vmem>>, vector<4x1156xbf16>,
    %c0_90 = arith.constant 0 : index
    %c67_91 = arith.constant 67 : index
    %95 = vector.load %arg10[%c0_90, %c67_91] : memref<4x1292xf32, #tpu.memory_space<vmem>>, vector<4x1156xf32>
    %96 = arith.truncf %95 : vector<4x1156xf32> to vector<4x1156xbf16>
    %c12_92 = arith.constant 12 : index
    %c0_93 = arith.constant 0 : index
    %97 = vector.load %arg9[%c12_92, %c0_93] : memref<72x1156xbf16, #tpu.memory_space<vmem>>, vector<4x1156xbf16>
    tpu.vector_store %arg9[%c12_92, %c0_93], %96 {strides = array<i32>} : memref<72x1156xbf16, #tpu.memory_space<vmem>>, vector<4x1156xbf16>,
    %c0_94 = arith.constant 0 : index
    %c68_95 = arith.constant 68 : index
    %98 = vector.load %arg10[%c0_94, %c68_95] : memref<4x1292xf32, #tpu.memory_space<vmem>>, vector<4x1156xf32>
    %99 = arith.truncf %98 : vector<4x1156xf32> to vector<4x1156xbf16>
    %c16_96 = arith.constant 16 : index
    %c0_97 = arith.constant 0 : index
    %100 = vector.load %arg9[%c16_96, %c0_97] : memref<72x1156xbf16, #tpu.memory_space<vmem>>, vector<4x1156xbf16>
    tpu.vector_store %arg9[%c16_96, %c0_97], %99 {strides = array<i32>} : memref<72x1156xbf16, #tpu.memory_space<vmem>>, vector<4x1156xbf16>,
    %c0_98 = arith.constant 0 : index
    %c69_99 = arith.constant 69 : index
    %101 = vector.load %arg10[%c0_98, %c69_99] : memref<4x1292xf32, #tpu.memory_space<vmem>>, vector<4x1156xf32>
    %102 = arith.truncf %101 : vector<4x1156xf32> to vector<4x1156xbf16>
    %c20_100 = arith.constant 20 : index
    %c0_101 = arith.constant 0 : index
    %103 = vector.load %arg9[%c20_100, %c0_101] : memref<72x1156xbf16, #tpu.memory_space<vmem>>, vector<4x1156xbf16>
    tpu.vector_store %arg9[%c20_100, %c0_101], %102 {strides = array<i32>} : memref<72x1156xbf16, #tpu.memory_space<vmem>>, vector<4x1156xbf16>,
    %c0_102 = arith.constant 0 : index
    %c101_103 = arith.constant 101 : index
    %104 = vector.load %arg10[%c0_102, %c101_103] : memref<4x1292xf32, #tpu.memory_space<vmem>>, vector<4x1156xf32>
    %105 = arith.truncf %104 : vector<4x1156xf32> to vector<4x1156xbf16>
    %c24_104 = arith.constant 24 : index
    %c0_105 = arith.constant 0 : index
    %106 = vector.load %arg9[%c24_104, %c0_105] : memref<72x1156xbf16, #tpu.memory_space<vmem>>, vector<4x1156xbf16>
    tpu.vector_store %arg9[%c24_104, %c0_105], %105 {strides = array<i32>} : memref<72x1156xbf16, #tpu.memory_space<vmem>>, vector<4x1156xbf16>,
    %c0_106 = arith.constant 0 : index
    %c102_107 = arith.constant 102 : index
    %107 = vector.load %arg10[%c0_106, %c102_107] : memref<4x1292xf32, #tpu.memory_space<vmem>>, vector<4x1156xf32>
    %108 = arith.truncf %107 : vector<4x1156xf32> to vector<4x1156xbf16>
    %c28_108 = arith.constant 28 : index
    %c0_109 = arith.constant 0 : index
    %109 = vector.load %arg9[%c28_108, %c0_109] : memref<72x1156xbf16, #tpu.memory_space<vmem>>, vector<4x1156xbf16>
    tpu.vector_store %arg9[%c28_108, %c0_109], %108 {strides = array<i32>} : memref<72x1156xbf16, #tpu.memory_space<vmem>>, vector<4x1156xbf16>,
    %c0_110 = arith.constant 0 : index
    %c103_111 = arith.constant 103 : index
    %110 = vector.load %arg10[%c0_110, %c103_111] : memref<4x1292xf32, #tpu.memory_space<vmem>>, vector<4x1156xf32>
    %111 = arith.truncf %110 : vector<4x1156xf32> to vector<4x1156xbf16>
    %c32_112 = arith.constant 32 : index
    %c0_113 = arith.constant 0 : index
    %112 = vector.load %arg9[%c32_112, %c0_113] : memref<72x1156xbf16, #tpu.memory_space<vmem>>, vector<4x1156xbf16>
    tpu.vector_store %arg9[%c32_112, %c0_113], %111 {strides = array<i32>} : memref<72x1156xbf16, #tpu.memory_space<vmem>>, vector<4x1156xbf16>,
    %c0_114 = arith.constant 0 : index
    %c0_115 = arith.constant 0 : index
    %113 = vector.load %arg6[%c0_114, %c0_115] : memref<4x36xbf16, #tpu.memory_space<vmem>>, vector<4x36xbf16>
    %c0_116 = arith.constant 0 : index
    %c0_117 = arith.constant 0 : index
    %114 = vector.load %arg9[%c0_116, %c0_117] : memref<72x1156xbf16, #tpu.memory_space<vmem>>, vector<36x1156xbf16>
    %cst_118 = arith.constant dense<0.000000e+00> : vector<4x1156xf32>
    %115 = tpu.matmul %113, %114, %cst_118 {dimension_numbers = #tpu.dot_dimension_numbers<[1], [0], [0], [1], [0, 0, 1, 1], [], []>} : vector<4x36xbf16>, vector<36x1156xbf16>, vector<4x1156xf32> -> vector<4x1156xf32>
    %c0_119 = arith.constant 0 : index
    %c0_120 = arith.constant 0 : index
    %116 = vector.load %arg7[%c0_119, %c0_120] : memref<4x1xf32, #tpu.memory_space<vmem>>, vector<4x1xf32>
    %117 = vector.broadcast %116 : vector<4x1xf32> to vector<4x1156xf32>
    %118 = arith.addf %115, %117 : vector<4x1156xf32>
    %cst_121 = arith.constant 0.000000e+00 : f32
    %119 = vector.broadcast %cst_121 : f32 to vector<4x1156xf32>
    %120 = arith.maximumf %118, %119 : vector<4x1156xf32>
    %121 = vector.broadcast %72 : vector<1x1156xf32> to vector<4x1156xf32>
    %122 = arith.mulf %120, %121 : vector<4x1156xf32>
    %123 = vector.shape_cast %122 : vector<4x1156xf32> to vector<1x4x1156xf32>
    %c0_122 = arith.constant 0 : index
    %c0_123 = arith.constant 0 : index
    %c0_124 = arith.constant 0 : index
    %124 = vector.load %arg8[%c0_122, %c0_123, %c0_124] : memref<1x4x1156xf32, #tpu.memory_space<vmem>>, vector<1x4x1156xf32>
    tpu.vector_store %arg8[%c0_122, %c0_123, %c0_124], %123 {strides = array<i32>} : memref<1x4x1156xf32, #tpu.memory_space<vmem>>, vector<1x4x1156xf32>,
    return
  }
  func.func @transform_0(%arg0: i32) -> (i32, i32, i32) {
    %c0_i32 = arith.constant 0 : i32
    %c0_i32_0 = arith.constant 0 : i32
    %c0_i32_1 = arith.constant 0 : i32
    return %arg0, %c0_i32, %c0_i32_0 : i32, i32, i32
  }
  func.func @transform_1(%arg0: i32) -> (i32, i32, i32) {
    %c0_i32 = arith.constant 0 : i32
    %c0_i32_0 = arith.constant 0 : i32
    %c0_i32_1 = arith.constant 0 : i32
    return %arg0, %c0_i32, %c0_i32_0 : i32, i32, i32
  }
  func.func @transform_2(%arg0: i32) -> (i32, i32) {
    %c0_i32 = arith.constant 0 : i32
    %c0_i32_0 = arith.constant 0 : i32
    %c0_i32_1 = arith.constant 0 : i32
    return %c0_i32, %c0_i32_0 : i32, i32
  }
  func.func @transform_3(%arg0: i32) -> (i32, i32) {
    %c0_i32 = arith.constant 0 : i32
    %c0_i32_0 = arith.constant 0 : i32
    %c0_i32_1 = arith.constant 0 : i32
    return %c0_i32, %c0_i32_0 : i32, i32
  }
  func.func @transform_4(%arg0: i32) -> (i32, i32) {
    %c0_i32 = arith.constant 0 : i32
    %c0_i32_0 = arith.constant 0 : i32
    %c0_i32_1 = arith.constant 0 : i32
    return %c0_i32, %c0_i32_0 : i32, i32
  }
  func.func @transform_5(%arg0: i32) -> (i32, i32) {
    %c0_i32 = arith.constant 0 : i32
    %c0_i32_0 = arith.constant 0 : i32
    %c0_i32_1 = arith.constant 0 : i32
    return %c0_i32, %c0_i32_0 : i32, i32
  }
  func.func @transform_6(%arg0: i32) -> (i32, i32) {
    %c0_i32 = arith.constant 0 : i32
    %c0_i32_0 = arith.constant 0 : i32
    %c0_i32_1 = arith.constant 0 : i32
    return %c0_i32, %c0_i32_0 : i32, i32
  }
  func.func @transform_7(%arg0: i32) -> (i32, i32, i32) {
    %c0_i32 = arith.constant 0 : i32
    %c0_i32_0 = arith.constant 0 : i32
    %c0_i32_1 = arith.constant 0 : i32
    return %arg0, %c0_i32, %c0_i32_0 : i32, i32, i32
  }
}

</mosaic_0001>

<bundles_post_ra>
// kernel: tile.8
= control target key start
LH: loop header
LB: loop body
LE: loop exit
PB: predicated region body
PF: predicated region fallthrough
CT: control target
= control target key end

     0   :  { %s22_s0 = inlined_call_operand.vmem [shape: f32[4], index: 0, kind: input, shape index: {}]   ;;  %s23_s1 = inlined_call_operand.vmem [shape: f32[4,4], index: 1, kind: output, shape index: {}]  }
   0x1   :  { %v4_v0 = vld [vmem:[%s22_s0] ss:$0 sm:$0xff] }
   0x2   :  { %5 = vst [vmem:[%s23_s1] sm:$0xf] %v4_v0 }

// kernel: tile.0
= control target key start
LH: loop header
LB: loop body
LE: loop exit
PB: predicated region body
PF: predicated region fallthrough
CT: control target
= control target key end

     0   :  { %s35_s8 = smov 125   ;;  %vm8_vm0 = vcmask 7168   ;;  %s36_s11 = smov 126   ;;  %s62_s0 = inlined_call_operand.vmem [shape: f32[4,4], index: 0, kind: input, shape index: {}]   ;;  %s63_s1 = inlined_call_operand.vmem [shape: f32[16,1], index: 1, kind: output, shape index: {}]  }
   0x1   :  { %v5_v0 = vld [vmem:[%s62_s0] sm:$0xf]  ;;  %s34_s0 = smov 127  }
   0x2   :  { %6 = vst [vmem:[#allocation0] sm:$0xf] %v5_v0 }
   0x9   :  { %v10_v1 = vld [vmem:[#allocation0] sm:$0xf]  }
   0xa   :  { %v22_v2 = vld [vmem:[#allocation0] sm:$0xf]   ;;  %11 = vrot.lane.b32.xlu0 %v10_v1, %s34_s0 }
   0xb   :  { %23 = vrot.lane.b32.xlu1 %v22_v2, %s35_s8  ;;  %v7_v3 = vld [vmem:[#allocation0] sm:$0xf]  }
   0xc   :  { %v16_v4 = vld [vmem:[#allocation0] sm:$0xf]   ;;  %9 = vst.msk [vmem:[%s63_s1] ss:$4 sm:$0xf] %vm8_vm0, %v7_v3  }
   0xe   :  { %17 = vrot.lane.b32.xlu0 %v16_v4, %s36_s11 }
  0x7c   :  { %v12_v5 = vpop.permute.xlu0 %11  }
  0x7d   :  { %v24_v6 = vpop.permute.xlu1 %23   ;;  %28 = vst.msk [vmem:[%s63_s1 + $0x1] ss:$4 sm:$0xf] %vm8_vm0, %v12_v5  }
  0x7e   :  { %30 = vst.msk [vmem:[%s63_s1 + $0x3] ss:$4 sm:$0xf] %vm8_vm0, %v24_v6  }
  0x80   :  { %v18_v7 = vpop.permute.xlu0 %17  }
  0x81   :  { %29 = vst.msk [vmem:[%s63_s1 + $0x2] ss:$4 sm:$0xf] %vm8_vm0, %v18_v7  }

// kernel: unet_up_forward.2
= control target key start
LH: loop header
LB: loop body
LE: loop exit
PB: predicated region body
PF: predicated region fallthrough
CT: control target
= control target key end

     0   :  { %s841_s12 = smov 0   ;;  %s901_s0 = inlined_call_operand.vmem [shape: f32[2,8,396], index: 0, kind: input, shape index: {}]   ;;  %s902_s1 = inlined_call_operand.vmem [shape: bf16[16,72], index: 1, kind: input, shape index: {}]   ;;  %s903_s2 = inlined_call_operand.vmem [shape: f32[16,1], index: 2, kind: input, shape index: {}]   ;;  %s904_s3 = inlined_call_operand.vmem [shape: f32[2,16,324], index: 3, kind: output, shape index: {}]  }
   0x1 LB: > { %s686_s13 = sadd.s32 4294967295, %s807_s12   ;;  %p690_p0 = scmp.ge.s32.totalorder %s807_s12, 1  ;;  %s807_s12 = sphi %s841_s12, %s13_s12  }
   0x2   : > { %p137_p1 = scmp.lt.s32.totalorder %s807_s12, 3 }
   0x4   : > { %p138_p2 = pnand %p690_p0, %p137_p1 }
   0x5   : > { %p161_p3 = scmp.lt.s32.totalorder (!%p138_p2), %s686_s13, 1  ;;  %s809_s18 = smov (!%p138_p2), 73  }
   0x6   : > { %141 = sbr.rel (%p138_p2) target bundleno = 376 (0x178), region = 32  ;;  %s810_s19 = smov (!%p138_p2), 75  }
   0x7   : > { %s812_s20 = smov (!%p138_p2), 74   ;;  %s813_s21 = smov (!%p138_p2), 92  }
   0x8   : > { %s814_s22 = smov (!%p138_p2), 91   ;;  %s815_s23 = smov (!%p138_p2), 109  }
   0x9   : > { %s816_s24 = smov (!%p138_p2), 93   ;;  %s817_s25 = smov (!%p138_p2), 111  }
   0xa   : > { %s820_s26 = smov (!%p138_p2), 110  }
   0xb   : > { %s906_s13 = smov (!%p161_p3, %s686_s13), 1  ;;  %v811_v5 = vmov 0.0   ;;  %vm818_vm0 = vmmov 0   ;;  %v819_v6 = vmov 0   ;;  %v437_v7 = vld [vmem:[%s903_s2] sm:$0xff]  ;;  %v438_v8 = vld [vmem:[%s903_s2 + $0x8] sm:$0xff] }
   0xc   : > { %s733_s14 = sshll.u32 %s906_s13, 5  ;;  %758 = vmatprep.subr.bf16.mxu1 %v811_v5  ;;  %768 = vmatprep.mubr.msk.bf16.mxu1 %vm818_vm0, %v811_v5  ;;  %vm199_vm1 = vcmask 551936   ;;  %vm192_vm2 = vcmask 1043456   ;;  %vm411_vm3 = vcmask 596992   ;;  %vm357_vm4 = vcmask 613376   ;;  %s772_s6 = smul.u32 48, %s906_s13 }
   0xd   : > { %s165_s17 = scalar_lea.vmem %s901_s0, %s733_s14  ;;  %572 = vmatprep.mubr.bf16.mxu0 %v819_v6  ;;  %793 = vset.pattern.permute.xlu0 %v819_v6  ;;  %vm384_vm5 = vcmask 605184   ;;  %vm303_vm6 = vcmask 752640   ;;  %vm330_vm7 = vcmask 744448   ;;  %vm249_vm8 = vcmask 891904  }
   0xe   : > { %v390_v0 = vld [vmem:[%s165_s17] sm:$0xff]  ;;  %v391_v1 = vld [vmem:[%s165_s17 + $0x8] sm:$0xff]  ;;  %v392_v2 = vld [vmem:[%s165_s17 + $0x10] sm:$0xff]  ;;  %794 = vset.pattern.permute.xlu1 %v819_v6  ;;  %vm276_vm9 = vcmask 760832   ;;  %vm194_vm10 = vcmask 908288   ;;  %vm222_vm11 = vcmask 900096   ;;  %s170_s9 = scalar_lea.vmem %s904_s3, %s772_s6 }
   0xf   : > { %v750_v3 = vpack.c.bf16 %v391_v1, %v390_v0  ;;  %v751_v4 = vpack.c.bf16 %v392_v2, %v392_v2  ;;  %vm526_vm12 = vcmask 588800   ;;  %vm626_vm13 = vcmask 556032  }
  0x11   : > { %404 = vrot.lane.b32.xlu0 %v750_v3, %s809_s18  ;;  %350 = vrot.lane.b32.xlu1 %v750_v3, %s810_s19 }
  0x15   : > { %406 = vrot.lane.b32.xlu0 %v751_v4, %s809_s18  ;;  %352 = vrot.lane.b32.xlu1 %v751_v4, %s810_s19 }
  0x19   : > { %377 = vrot.lane.b32.xlu0 %v750_v3, %s812_s20  ;;  %379 = vrot.lane.b32.xlu1 %v751_v4, %s812_s20 }
  0x1d   : > { %298 = vrot.lane.b32.xlu1 %v751_v4, %s813_s21  ;;  %296 = vrot.lane.b32.xlu0 %v750_v3, %s813_s21 }
  0x21   : > { %325 = vrot.lane.b32.xlu1 %v751_v4, %s814_s22  ;;  %323 = vrot.lane.b32.xlu0 %v750_v3, %s814_s22 }
  0x25   : > { %244 = vrot.lane.b32.xlu1 %v751_v4, %s815_s23  ;;  %242 = vrot.lane.b32.xlu0 %v750_v3, %s815_s23 }
  0x29   : > { %271 = vrot.lane.b32.xlu1 %v751_v4, %s816_s24  ;;  %269 = vrot.lane.b32.xlu0 %v750_v3, %s816_s24 }
  0x2d   : > { %188 = vrot.lane.b32.xlu1 %v751_v4, %s817_s25  ;;  %186 = vrot.lane.b32.xlu0 %v750_v3, %s817_s25 }
  0x31   : > { %217 = vrot.lane.b32.xlu1 %v751_v4, %s820_s26  ;;  %215 = vrot.lane.b32.xlu0 %v750_v3, %s820_s26 }
  0x35   : > { %441 = vperm.xlu0 %793, %v437_v7   ;;  %446 = vperm.xlu1 %794, %v438_v8  }
  0x83   : > { %v405_v9 = vpop.permute.xlu0 %404  ;;  %v351_v10 = vpop.permute.xlu1 %350 }
  0x84   : > { %v408_v13 = vrot.slane %v405_v9, 4  ;;  %v354_v14 = vrot.slane %v351_v10, 4 }
  0x87   : > { %v407_v11 = vpop.permute.xlu0 %406  ;;  %v353_v12 = vpop.permute.xlu1 %352 }
  0x88   : > { %v409_v15 = vrot.slane %v407_v11, 4  ;;  %416 = vst.msk [vmem:[#allocation2 + $0x68] sm:$0xf] %vm199_vm1, %v407_v11  ;;  %v355_v16 = vrot.slane %v353_v12, 4  ;;  %362 = vst.msk [vmem:[#allocation2 + $0x50] sm:$0xf] %vm199_vm1, %v353_v12 }
  0x8a   : > { %v410_v17 = vsel %vm192_vm2, %v408_v13, %v409_v15  ;;  %v356_v18 = vsel %vm192_vm2, %v354_v14, %v355_v16  ;;  %v800_v16 = vld [vmem:[%s902_s1] sm:$0xff]  }
  0x8b   : > { %v412_v19 = vsel %vm411_vm3, %v405_v9, %v410_v17  ;;  %v358_v20 = vsel %vm357_vm4, %v351_v10, %v356_v18  ;;  %v378_v21 = vpop.permute.xlu0 %377  ;;  %v380_v22 = vpop.permute.xlu1 %379 }
  0x8c   : > { %v381_v23 = vrot.slane %v378_v21, 4  ;;  %v382_v24 = vrot.slane %v380_v22, 4  ;;  %389 = vst.msk [vmem:[#allocation2 + $0x5c] sm:$0xf] %vm199_vm1, %v380_v22  ;;  %v726_v25 = vcombine.high %v412_v19, %v412_v19  ;;  %v725_v26 = vcombine.low %v412_v19, %v412_v19 }
  0x8e   : > { %v383_v27 = vsel %vm192_vm2, %v381_v23, %v382_v24  ;;  %728 = vmatprep.subr.msk.bf16.mxu0 %vm192_vm2, %v726_v25  ;;  %v532_v28 = vsel %vm192_vm2, %v725_v26, 0 }
  0x8f   : > { %v385_v29 = vsel %vm384_vm5, %v378_v21, %v383_v27  ;;  %v299_v30 = vpop.permute.xlu1 %298  ;;  %v297_v31 = vpop.permute.xlu0 %296  ;;  %v795_v32 = vld [vmem:[#allocation2 + $0x68] ss:$0 sps:$4 sm:$0xff]   ;;  %547 = vmatpush1.bf16.msra.mxu0 %v532_v28 }
  0x90   : > { %v301_v33 = vrot.slane %v299_v30, 4  ;;  %308 = vst.msk [vmem:[#allocation2 + $0x38] sm:$0xf] %vm199_vm1, %v299_v30  ;;  %v300_v34 = vrot.slane %v297_v31, 4  ;;  %v723_v35 = vcombine.high %v358_v20, %v385_v29  ;;  %v722_v36 = vcombine.low %v358_v20, %v385_v29 }
  0x91   : > { %v538_v37 = vsel %vm192_vm2, %v795_v32, 0 }
  0x92   : > { %v302_v38 = vsel %vm192_vm2, %v300_v34, %v301_v33  ;;  %759 = vmatpush3.bf16.msra.mxu1 %v538_v37  ;;  %548 = vmatprep.subr.bf16.mxu0 %v723_v35 }
  0x93   : > { %v304_v39 = vsel %vm303_vm6, %v297_v31, %v302_v38  ;;  %v326_v40 = vpop.permute.xlu1 %325  ;;  %v324_v41 = vpop.permute.xlu0 %323  ;;  %760 = vmatprep.subr.bf16.mxu1 %v811_v5  ;;  %v796_v42 = vld [vmem:[#allocation2 + $0x50] ss:$12 sps:$4 sm:$0xff]   ;;  %549 = vmatpush1.bf16.msra.mxu0 %v722_v36 }
  0x94   : > { %v328_v43 = vrot.slane %v326_v40, 4  ;;  %335 = vst.msk [vmem:[#allocation2 + $0x44] sm:$0xf] %vm199_vm1, %v326_v40  ;;  %v327_v44 = vrot.slane %v324_v41, 4 }
  0x96   : > { %v329_v45 = vsel %vm192_vm2, %v327_v44, %v328_v43  ;;  %761 = vmatpush3.bf16.msra.mxu1 %v796_v42 }
  0x97   : > { %v331_v46 = vsel %vm330_vm7, %v324_v41, %v329_v45  ;;  %v245_v47 = vpop.permute.xlu1 %244  ;;  %v243_v48 = vpop.permute.xlu0 %242  ;;  %762 = vmatprep.subr.bf16.mxu1 %v811_v5 }
  0x98   : > { %v247_v49 = vrot.slane %v245_v47, 4  ;;  %254 = vst.msk [vmem:[#allocation2 + $0x20] sm:$0xf] %vm199_vm1, %v245_v47  ;;  %v246_v50 = vrot.slane %v243_v48, 4  ;;  %v720_v51 = vcombine.high %v304_v39, %v331_v46  ;;  %v719_v52 = vcombine.low %v304_v39, %v331_v46 }
  0x9a   : > { %v248_v53 = vsel %vm192_vm2, %v246_v50, %v247_v49  ;;  %550 = vmatprep.subr.bf16.mxu0 %v720_v51 }
  0x9b   : > { %v250_v54 = vsel %vm249_vm8, %v243_v48, %v248_v53  ;;  %v272_v55 = vpop.permute.xlu1 %271  ;;  %v270_v56 = vpop.permute.xlu0 %269  ;;  %v797_v57 = vld [vmem:[#allocation2 + $0x38] ss:$12 sps:$4 sm:$0xff]   ;;  %551 = vmatpush1.bf16.msra.mxu0 %v719_v52 }
  0x9c   : > { %v274_v58 = vrot.slane %v272_v55, 4  ;;  %281 = vst.msk [vmem:[#allocation2 + $0x2c] sm:$0xf] %vm199_vm1, %v272_v55  ;;  %v273_v59 = vrot.slane %v270_v56, 4  ;;  %763 = vmatpush3.bf16.msra.mxu1 %v797_v57 }
  0x9d   : > { %764 = vmatprep.subr.bf16.mxu1 %v811_v5 }
  0x9e   : > { %v275_v60 = vsel %vm192_vm2, %v273_v59, %v274_v58 }
  0x9f   : > { %v277_v61 = vsel %vm276_vm9, %v270_v56, %v275_v60  ;;  %v189_v62 = vpop.permute.xlu1 %188  ;;  %v187_v63 = vpop.permute.xlu0 %186 }
  0xa0   : > { %v191_v0 = vrot.slane %v189_v62, 4  ;;  %200 = vst.msk [vmem:[#allocation2 + $0x8] sm:$0xf] %vm199_vm1, %v189_v62  ;;  %v190_v1 = vrot.slane %v187_v63, 4  ;;  %v717_v2 = vcombine.high %v250_v54, %v277_v61  ;;  %v716_v3 = vcombine.low %v250_v54, %v277_v61 }
  0xa2   : > { %v193_v4 = vsel %vm192_vm2, %v190_v1, %v191_v0  ;;  %552 = vmatprep.subr.bf16.mxu0 %v717_v2 }
  0xa3   : > { %v195_v6 = vsel %vm194_vm10, %v187_v63, %v193_v4  ;;  %v218_v7 = vpop.permute.xlu1 %217  ;;  %v216_v8 = vpop.permute.xlu0 %215  ;;  %v798_v9 = vld [vmem:[#allocation2 + $0x20] ss:$12 sps:$4 sm:$0xff]   ;;  %553 = vmatpush1.bf16.msra.mxu0 %v716_v3 }
  0xa4   : > { %v220_v10 = vrot.slane %v218_v7, 4  ;;  %227 = vst.msk [vmem:[#allocation2 + $0x14] sm:$0xf] %vm199_vm1, %v218_v7  ;;  %v219_v11 = vrot.slane %v216_v8, 4  ;;  %765 = vmatpush3.bf16.msra.mxu1 %v798_v9 }
  0xa5   : > { %766 = vmatprep.subr.bf16.mxu1 %v811_v5 }
  0xa6   : > { %v221_v12 = vsel %vm192_vm2, %v219_v11, %v220_v10 }
  0xa7   : > { %v223_v13 = vsel %vm222_vm11, %v216_v8, %v221_v12 }
  0xa8   : > { %v714_v14 = vcombine.high %v195_v6, %v223_v13  ;;  %v713_v15 = vcombine.low %v195_v6, %v223_v13 }
  0xaa   : > { %554 = vmatprep.subr.bf16.mxu0 %v714_v14 }
  0xab   : > { %v799_v17 = vld [vmem:[#allocation2 + $0x8] ss:$12 sps:$4 sm:$0xff]   ;;  %555 = vmatpush1.bf16.msra.mxu0 %v713_v15 }
  0xac   : > { %767 = vmatpush3.bf16.msra.mxu1 %v799_v17 }
  0xae   : > { %729 = vmatmul.mubr.msk.bf16.vlgmr.msra.gmra.mxu0 %vm526_vm12, %v800_v16 }
  0xaf   : > { %769 = vmatmul.mubr.msk.bf16.vlgmr.msra.gmra.mxu1 %vm526_vm12, %v800_v16 }
  0xb0   : > { %v442_v18 = vpop.permute.xlu0 %441  ;;  %v447_v20 = vpop.permute.xlu1 %446 }
 0x16e   : > { %v574_v19 = vpop.f32.mrf.mxu0 }
 0x16f   : > { %v575_v5 = vadd.f32 %v574_v19, %v442_v18  ;;  %v617_v21 = vpop.f32.mrf.mxu1 }
 0x170   : > { %v576_v22 = vpop.f32.mrf.mxu0  ;;  %v618_v23 = vadd.f32 %v617_v21, %v442_v18 }
 0x171   : > { %624 = vst [vmem:[%s170_s9] sm:$0xff] %v575_v5  ;;  %v577_v24 = vadd.f32 %v576_v22, %v442_v18  ;;  %v770_v25 = vpop.f32.mrf.mxu1 }
 0x172   : > { %v578_v26 = vpop.f32.mrf.mxu0  ;;  %627 = vst.msk [vmem:[%s170_s9 + $0x10] sm:$0xff] %vm626_vm13, %v618_v23 }
 0x173   : > { %625 = vst [vmem:[%s170_s9 + $0x8] sm:$0xff] %v577_v24  ;;  %v579_v27 = vadd.f32 %v578_v26, %v447_v20  ;;  %v620_v28 = vpop.f32.mrf.mxu1 }
 0x174   : > { %v580_v29 = vpop.f32.mrf.mxu0  ;;  %v621_v30 = vadd.f32 %v620_v28, %v447_v20 }
 0x175   : > { %628 = vst [vmem:[%s170_s9 + $0x18] sm:$0xff] %v579_v27  ;;  %v581_v31 = vadd.f32 %v580_v29, %v447_v20  ;;  %v771_v32 = vpop.f32.mrf.mxu1 }
 0x176   : > { %630 = vst.msk [vmem:[%s170_s9 + $0x28] sm:$0xff] %vm626_vm13, %v621_v30 }
 0x177   : > { %629 = vst [vmem:[%s170_s9 + $0x20] sm:$0xff] %v581_v31 }
 0x178 PF: > { %s13_s12 = sadd.s32 1, %s807_s12  }
 0x179   : > { %p10_p4 = scmp.ge.s32.totalorder %s13_s12, 4  }
 0x17b   :  { %12 = sbr.rel (!%p10_p4) target bundleno = 1 (0x1), region = 62 }

// kernel: unet_up_forward.3
= control target key start
LH: loop header
LB: loop body
LE: loop exit
PB: predicated region body
PF: predicated region fallthrough
CT: control target
= control target key end

     0   :  { %s4528_s24 = smov 0   ;;  %s5750_s0 = inlined_call_operand.vmem [shape: f32[2,4,1292], index: 0, kind: input, shape index: {}]   ;;  %s5751_s1 = inlined_call_operand.vmem [shape: f32[2,4,1292], index: 1, kind: input, shape index: {}]   ;;  %s5752_s2 = inlined_call_operand.vmem [shape: f32[1,1156], index: 2, kind: input, shape index: {}]   ;;  %s5753_s3 = inlined_call_operand.vmem [shape: bf16[4,72], index: 3, kind: input, shape index: {}]   ;;  %s5754_s4 = inlined_call_operand.vmem [shape: f32[4,1], index: 4, kind: input, shape index: {}]   ;;  %s5755_s5 = inlined_call_operand.vmem [shape: bf16[4,36], index: 5, kind: input, shape index: {}]   ;;  %s5756_s6 = inlined_call_operand.vmem [shape: f32[4,1], index: 6, kind: input, shape index: {}]   ;;  %s5757_s7 = inlined_call_operand.vmem [shape: f32[2,4,1156], index: 7, kind: output, shape index: {}]  }
   0x1 LB: > { %s3947_s25 = sadd.s32 4294967295, %s4474_s24   ;;  %p3951_p0 = scmp.ge.s32.totalorder %s4474_s24, 1  ;;  %s4474_s24 = sphi %s4528_s24, %s17_s24  }
   0x2   : > { %p247_p1 = scmp.lt.s32.totalorder %s4474_s24, 3 }
   0x4   : > { %p248_p2 = pnand %p3951_p0, %p247_p1 }
   0x5   : > { %p284_p3 = scmp.lt.s32.totalorder (!%p248_p2), %s3947_s25, 1  ;;  %s4476_s30 = smov (!%p248_p2), 26  }
   0x6   : > { %251 = sbr.rel (%p248_p2) target bundleno = 1037 (0x40d), region = 48  ;;  %s4477_s8 = smov (!%p248_p2), 61  }
   0x7   : > { %s4478_s9 = smov (!%p248_p2), 25   ;;  %s4479_s10 = smov (!%p248_p2), 60  }
   0x8   : > { %s4480_s11 = smov (!%p248_p2), 59   ;;  %s4481_s12 = smov (!%p248_p2), 27  }
   0x9   : > { %s4482_s16 = smov (!%p248_p2), 95   ;;  %s4483_s17 = smov (!%p248_p2), 94  }
   0xa   : > { %s4484_s18 = smov (!%p248_p2), 93   ;;  %s4487_s27 = smov (!%p248_p2), 68  }
   0xb   : > { %s5769_s25 = smov (!%p284_p3, %s3947_s25), 1  ;;  %v4485_v28 = vmov 0   ;;  %vm370_vm0 = vcmask 1043456   ;;  %vm1671_vm1 = vcmask 211968   ;;  %vm1850_vm2 = vcmask 203776  }
   0xc   : > { %s4327_s26 = smul.u32 44, %s5769_s25  ;;  %2309 = vmatprep.mubr.bf16.mxu0 %v4485_v28  ;;  %2350 = vmatprep.mubr.bf16.mxu1 %v4485_v28  ;;  %vm5758_vm3 = vcmask 498688   ;;  %vm1114_vm4 = vcmask 490496   ;;  %vm1303_vm5 = vcmask 482304   ;;  %vm1482_vm6 = vcmask 220160  }
   0xd   : > { %4349 = vset.pattern.permute.xlu0 %v4485_v28  ;;  %vm372_vm7 = vcmask 777216   ;;  %vm567_vm8 = vcmask 769024   ;;  %vm746_vm9 = vcmask 760832   ;;  %vm2242_vm10 = vcmask 588800  }
   0xe   : > { %s4542_s29 = scalar_lea.vmem %s5751_s1, %s4327_s26  ;;  %s4561_s15 = scalar_lea.vmem %s5750_s0, %s4327_s26  ;;  %vm390_vm11 = vcmask 1041408   ;;  %vm391_vm12 = vcmask 29700   ;;  %vm487_vm14 = vcmask 1043458   ;;  %vm488_vm15 = vcmask 31750  }
   0xf   : > { %v1690_v0 = vld [vmem:[%s4542_s29] sm:$0xff]  ;;  %v955_v1 = vld [vmem:[%s4542_s29 + $0x8] sm:$0xff]  ;;  %v1692_v8 = vld [vmem:[%s4542_s29 + $0x10] sm:$0xff] }
  0x10   : > { %v1700_v2 = vcombine.high %v1690_v0, %v1690_v0  ;;  %v965_v3 = vcombine.high %v955_v1, %v955_v1  ;;  %v1779_v9 = vld [vmem:[%s4561_s15] sm:$0xff]  ;;  %v1702_v10 = vcombine.high %v1692_v8, %v1692_v8  ;;  %v1780_v12 = vld [vmem:[%s4561_s15 + $0x8] sm:$0xff]  ;;  %v1781_v20 = vld [vmem:[%s4561_s15 + $0x10] sm:$0xff] }
  0x11   : > { %v1789_v11 = vcombine.high %v1779_v9, %v1779_v9  ;;  %v1790_v15 = vcombine.high %v1780_v12, %v1780_v12  ;;  %v1791_v21 = vcombine.high %v1781_v20, %v1781_v20  ;;  %v1872_v23 = vld [vmem:[%s4542_s29 + $0x18] sm:$0xff]  ;;  %v1694_v29 = vld [vmem:[%s4542_s29 + $0x20] sm:$0xff]  ;;  %vm5086_vm13 = vmor %vm391_vm12, %vm390_vm11 }
  0x12   : > { %v4267_v4 = vpack.c.bf16 %v1700_v2, %v1690_v0  ;;  %v4228_v5 = vpack.c.bf16 %v965_v3, %v955_v1  ;;  %v4269_v13 = vpack.c.bf16 %v1702_v10, %v1692_v8  ;;  %v1882_v25 = vcombine.high %v1872_v23, %v1872_v23  ;;  %v1782_v33 = vld [vmem:[%s4561_s15 + $0x18] sm:$0xff]  ;;  %vm5112_vm12 = vmor %vm488_vm15, %vm487_vm14 }
  0x13   : > { %v4272_v14 = vpack.c.bf16 %v1789_v11, %v1779_v9  ;;  %v4273_v16 = vpack.c.bf16 %v1790_v15, %v1780_v12  ;;  %v4274_v22 = vpack.c.bf16 %v1791_v21, %v1781_v20  ;;  %v1704_v32 = vcombine.high %v1694_v29, %v1694_v29 }
  0x14   : > { %1745 = vrot.lane.b32.xlu0 %v4267_v4, %s4476_s30  ;;  %1011 = vrot.lane.b32.xlu1 %v4228_v5, %s4477_s8  ;;  %v1924_v6 = vrot.slane %v4267_v4, 6  ;;  %v1925_v7 = vrot.slane %v4228_v5, 6  ;;  %v1926_v17 = vrot.slane %v4269_v13, 6  ;;  %v4280_v26 = vpack.c.bf16 %v1882_v25, %v1872_v23 }
  0x15   : > { %v1282_v18 = vrot.slane %v4272_v14, 6  ;;  %v1283_v19 = vrot.slane %v4273_v16, 6  ;;  %v1284_v24 = vrot.slane %v4274_v22, 6  ;;  %v4628_v38 = vpack.c.bf16 %v1704_v32, %v1694_v29 }
  0x16   : > { %v1927_v27 = vrot.slane %v4280_v26, 6  ;;  %v1792_v39 = vcombine.high %v1782_v33, %v1782_v33  ;;  %vm2607_vm14 = vcmask 1047556   ;;  %vm2591_vm15 = vcmask 556032  }
  0x17   : > { %v4642_v48 = vrot.slane %v4628_v38, 6 }
  0x18   : > { %1747 = vrot.lane.b32.xlu0 %v4228_v5, %s4476_s30  ;;  %1929 = vrot.lane.b32.xlu1 %v1924_v6, %s4478_s9  ;;  %v4644_v49 = vpack.c.bf16 %v1792_v39, %v1782_v33 }
  0x1a   : > { %v4673_v0 = vrot.slane %v4644_v49, 6 }
  0x1c   : > { %1931 = vrot.lane.b32.xlu1 %v1925_v7, %s4478_s9  ;;  %1009 = vrot.lane.b32.xlu0 %v4267_v4, %s4477_s8 }
  0x20   : > { %1195 = vrot.lane.b32.xlu1 %v1925_v7, %s4479_s10  ;;  %1193 = vrot.lane.b32.xlu0 %v1924_v6, %s4479_s10 }
  0x24   : > { %1379 = vrot.lane.b32.xlu1 %v4228_v5, %s4480_s11  ;;  %1377 = vrot.lane.b32.xlu0 %v4267_v4, %s4480_s11 }
  0x28   : > { %1563 = vrot.lane.b32.xlu1 %v1925_v7, %s4481_s12  ;;  %1561 = vrot.lane.b32.xlu0 %v1924_v6, %s4481_s12 }
  0x2c   : > { %456 = vrot.lane.b32.xlu1 %v1925_v7, %s4482_s16  ;;  %454 = vrot.lane.b32.xlu0 %v1924_v6, %s4482_s16 }
  0x30   : > { %643 = vrot.lane.b32.xlu1 %v4228_v5, %s4483_s17  ;;  %641 = vrot.lane.b32.xlu0 %v4267_v4, %s4483_s17 }
  0x34   : > { %827 = vrot.lane.b32.xlu1 %v1925_v7, %s4484_s18  ;;  %825 = vrot.lane.b32.xlu0 %v1924_v6, %s4484_s18 }
  0x38   : > { %1749 = vrot.lane.b32.xlu0 %v4269_v13, %s4476_s30  ;;  %1834 = vrot.lane.b32.xlu1 %v4272_v14, %s4478_s9 }
  0x3c   : > { %1836 = vrot.lane.b32.xlu0 %v4273_v16, %s4478_s9  ;;  %1933 = vrot.lane.b32.xlu1 %v1926_v17, %s4478_s9 }
  0x40   : > { %1013 = vrot.lane.b32.xlu0 %v4269_v13, %s4477_s8  ;;  %1098 = vrot.lane.b32.xlu1 %v4272_v14, %s4479_s10 }
  0x44   : > { %1100 = vrot.lane.b32.xlu0 %v4273_v16, %s4479_s10  ;;  %1197 = vrot.lane.b32.xlu1 %v1926_v17, %s4479_s10 }
  0x48   : > { %1287 = vrot.lane.b32.xlu0 %v1282_v18, %s4480_s11  ;;  %1289 = vrot.lane.b32.xlu1 %v1283_v19, %s4480_s11 }
  0x4c   : > { %1381 = vrot.lane.b32.xlu0 %v4269_v13, %s4480_s11  ;;  %1466 = vrot.lane.b32.xlu1 %v4272_v14, %s4481_s12 }
  0x50   : > { %1468 = vrot.lane.b32.xlu0 %v4273_v16, %s4481_s12  ;;  %1565 = vrot.lane.b32.xlu1 %v1926_v17, %s4481_s12 }
  0x54   : > { %1655 = vrot.lane.b32.xlu0 %v1282_v18, %s4476_s30  ;;  %1657 = vrot.lane.b32.xlu1 %v1283_v19, %s4476_s30 }
  0x58   : > { %357 = vrot.lane.b32.xlu1 %v4273_v16, %s4482_s16  ;;  %355 = vrot.lane.b32.xlu0 %v4272_v14, %s4482_s16 }
  0x5c   : > { %551 = vrot.lane.b32.xlu1 %v1282_v18, %s4483_s17  ;;  %458 = vrot.lane.b32.xlu0 %v1926_v17, %s4482_s16 }
  0x60   : > { %645 = vrot.lane.b32.xlu1 %v4269_v13, %s4483_s17  ;;  %553 = vrot.lane.b32.xlu0 %v1283_v19, %s4483_s17 }
  0x64   : > { %732 = vrot.lane.b32.xlu1 %v4273_v16, %s4484_s18  ;;  %730 = vrot.lane.b32.xlu0 %v4272_v14, %s4484_s18 }
  0x68   : > { %919 = vrot.lane.b32.xlu1 %v1282_v18, %s4477_s8  ;;  %829 = vrot.lane.b32.xlu0 %v1926_v17, %s4484_s18 }
  0x6c   : > { %1838 = vrot.lane.b32.xlu1 %v4274_v22, %s4478_s9  ;;  %921 = vrot.lane.b32.xlu0 %v1283_v19, %s4477_s8 }
  0x70   : > { %1291 = vrot.lane.b32.xlu1 %v1284_v24, %s4480_s11  ;;  %1102 = vrot.lane.b32.xlu0 %v4274_v22, %s4479_s10 }
  0x74   : > { %1659 = vrot.lane.b32.xlu1 %v1284_v24, %s4476_s30  ;;  %1470 = vrot.lane.b32.xlu0 %v4274_v22, %s4481_s12 }
  0x78   : > { %1935 = vrot.lane.b32.xlu1 %v1927_v27, %s4478_s9  ;;  %1751 = vrot.lane.b32.xlu0 %v4280_v26, %s4476_s30 }
  0x7c   : > { %555 = vrot.lane.b32.xlu1 %v1284_v24, %s4483_s17  ;;  %359 = vrot.lane.b32.xlu0 %v4274_v22, %s4482_s16 }
  0x80   : > { %923 = vrot.lane.b32.xlu1 %v1284_v24, %s4477_s8  ;;  %734 = vrot.lane.b32.xlu0 %v4274_v22, %s4484_s18 }
  0x84   : > { %1199 = vrot.lane.b32.xlu1 %v1927_v27, %s4479_s10  ;;  %1015 = vrot.lane.b32.xlu0 %v4280_v26, %s4477_s8 }
  0x86   : > { %v1746_v30 = vpop.permute.xlu0 %1745  ;;  %v4618_v31 = vpop.permute.xlu1 %1011 }
  0x87   : > { %v1755_v36 = vrot.slane %v1746_v30, 4  ;;  %v1020_v44 = vrot.slane %v4618_v31, 4 }
  0x88   : > { %1567 = vrot.lane.b32.xlu1 %v1927_v27, %s4481_s12  ;;  %1383 = vrot.lane.b32.xlu0 %v4280_v26, %s4480_s11 }
  0x8a   : > { %v4623_v34 = vpop.permute.xlu0 %1747  ;;  %v1930_v35 = vpop.permute.xlu1 %1929 }
  0x8b   : > { %v1756_v37 = vrot.slane %v4623_v34, 4  ;;  %v1939_v45 = vrot.slane %v1930_v35, 4 }
  0x8c   : > { %647 = vrot.lane.b32.xlu1 %v4280_v26, %s4483_s17  ;;  %460 = vrot.lane.b32.xlu0 %v1927_v27, %s4482_s16 }
  0x8d   : > { %v1760_v40 = vsel %vm370_vm0, %v1755_v36, %v1756_v37 }
  0x8e   : > { %v1761_v41 = vsel %vm1671_vm1, %v1746_v30, %v1760_v40  ;;  %v4634_v42 = vpop.permute.xlu1 %1931  ;;  %v1010_v43 = vpop.permute.xlu0 %1009 }
  0x8f   : > { %1774 = vst [vmem:[#allocation2 + $0x140] sm:$0x33] %v1761_v41  ;;  %v1940_v46 = vrot.slane %v4634_v42, 4  ;;  %v1019_v47 = vrot.slane %v1010_v43, 4 }
  0x90   : > { %1753 = vrot.lane.b32.xlu1 %v4628_v38, %s4476_s30  ;;  %831 = vrot.lane.b32.xlu0 %v1927_v27, %s4484_s18 }
  0x91   : > { %v1944_v50 = vsel %vm370_vm0, %v1939_v45, %v1940_v46  ;;  %v1024_v51 = vsel %vm370_vm0, %v1019_v47, %v1020_v44 }
  0x92   : > { %v1945_v52 = vsel %vm1850_vm2, %v1930_v35, %v1944_v50  ;;  %v1025_v53 = vsel %vm5758_vm3, %v1010_v43, %v1024_v51  ;;  %v4654_v54 = vpop.permute.xlu1 %1195  ;;  %v1194_v55 = vpop.permute.xlu0 %1193  ;;  %v1783_v35 = vld [vmem:[%s4561_s15 + $0x20] sm:$0xff] }
  0x93   : > { %1958 = vst [vmem:[#allocation2 + $0x140] sm:$0xcc] %v1945_v52  ;;  %1038 = vst [vmem:[#allocation2 + $0xf0] sm:$0x33] %v1025_v53  ;;  %v1204_v56 = vrot.slane %v4654_v54, 4  ;;  %v1203_v57 = vrot.slane %v1194_v55, 4  ;;  %v1793_v43 = vcombine.high %v1783_v35, %v1783_v35 }
  0x94   : > { %1937 = vrot.lane.b32.xlu1 %v4642_v48, %s4478_s9  ;;  %1840 = vrot.lane.b32.xlu0 %v4644_v49, %s4478_s9 }
  0x95   : > { %v1208_v58 = vsel %vm370_vm0, %v1203_v57, %v1204_v56 }
  0x96   : > { %v1209_v59 = vsel %vm1114_vm4, %v1194_v55, %v1208_v58  ;;  %v4665_v60 = vpop.permute.xlu1 %1379  ;;  %v1378_v61 = vpop.permute.xlu0 %1377 }
  0x97   : > { %1222 = vst [vmem:[#allocation2 + $0xf0] sm:$0xcc] %v1209_v59  ;;  %v1388_v62 = vrot.slane %v4665_v60, 4  ;;  %v1387_v63 = vrot.slane %v1378_v61, 4 }
  0x98   : > { %1104 = vrot.lane.b32.xlu1 %v4644_v49, %s4479_s10  ;;  %1017 = vrot.lane.b32.xlu0 %v4628_v38, %s4477_s8 }
  0x99   : > { %v1392_v1 = vsel %vm370_vm0, %v1387_v63, %v1388_v62 }
  0x9a   : > { %v1393_v2 = vsel %vm1303_vm5, %v1378_v61, %v1392_v1  ;;  %v4679_v3 = vpop.permute.xlu1 %1563  ;;  %v1562_v4 = vpop.permute.xlu0 %1561  ;;  %v2006_v5 = vld [vmem:[#allocation2 + $0x140] sm:$0xff] }
  0x9b   : > { %1406 = vst [vmem:[#allocation2 + $0x118] sm:$0x33] %v1393_v2  ;;  %v1572_v6 = vrot.slane %v4679_v3, 4  ;;  %v1571_v7 = vrot.slane %v1562_v4, 4  ;;  %v4086_v8 = vcombine.high %v2006_v5, %v2006_v5  ;;  %v4085_v9 = vcombine.low %v2006_v5, %v2006_v5 }
  0x9c   : > { %1293 = vrot.lane.b32.xlu1 %v4673_v0, %s4480_s11  ;;  %1201 = vrot.lane.b32.xlu0 %v4642_v48, %s4479_s10 }
  0x9d   : > { %v1576_v10 = vsel %vm370_vm0, %v1571_v7, %v1572_v6  ;;  %4095 = vmatprep.subr.msk.bf16.mxu0 %vm370_vm0, %v4086_v8  ;;  %v2248_v11 = vsel %vm370_vm0, %v4085_v9, 0 }
  0x9e   : > { %v1577_v12 = vsel %vm1482_vm6, %v1562_v4, %v1576_v10  ;;  %2284 = vmatpush1.bf16.msra.mxu0 %v2248_v11  ;;  %v4692_v13 = vpop.permute.xlu1 %456  ;;  %v455_v14 = vpop.permute.xlu0 %454 }
  0x9f   : > { %1590 = vst [vmem:[#allocation2 + $0x118] sm:$0xcc] %v1577_v12  ;;  %v465_v15 = vrot.slane %v4692_v13, 4  ;;  %v464_v16 = vrot.slane %v455_v14, 4 }
  0xa0   : > { %1472 = vrot.lane.b32.xlu1 %v4644_v49, %s4481_s12  ;;  %1385 = vrot.lane.b32.xlu0 %v4628_v38, %s4480_s11 }
  0xa1   : > { %v469_v17 = vsel %vm370_vm0, %v464_v16, %v465_v15 }
  0xa2   : > { %v470_v18 = vsel %vm372_vm7, %v455_v14, %v469_v17  ;;  %v4703_v19 = vpop.permute.xlu1 %643  ;;  %v642_v20 = vpop.permute.xlu0 %641 }
  0xa3   : > { %483 = vst [vmem:[#allocation2 + $0xa0] sm:$0xcc] %v470_v18  ;;  %v652_v21 = vrot.slane %v4703_v19, 4  ;;  %v651_v22 = vrot.slane %v642_v20, 4 }
  0xa4   : > { %1661 = vrot.lane.b32.xlu1 %v4673_v0, %s4476_s30  ;;  %1569 = vrot.lane.b32.xlu0 %v4642_v48, %s4481_s12 }
  0xa5   : > { %v656_v23 = vsel %vm370_vm0, %v651_v22, %v652_v21 }
  0xa6   : > { %v657_v24 = vsel %vm567_vm8, %v642_v20, %v656_v23  ;;  %v4714_v25 = vpop.permute.xlu1 %827  ;;  %v826_v26 = vpop.permute.xlu0 %825  ;;  %v4361_v27 = vld [vmem:[#allocation2 + $0xf4] ss:$40 sps:$4 sm:$0xff]   ;;  %v4363_v29 = vld [vmem:[#allocation2 + $0xf0] ss:$40 sps:$4 sm:$0xff]  }
  0xa7   : > { %670 = vst [vmem:[#allocation2 + $0xc8] sm:$0x33] %v657_v24  ;;  %v836_v30 = vrot.slane %v4714_v25, 4  ;;  %v835_v32 = vrot.slane %v826_v26, 4  ;;  %2285 = vmatprep.subr.bf16.mxu0 %v4361_v27 }
  0xa8   : > { %462 = vrot.lane.b32.xlu1 %v4642_v48, %s4482_s16  ;;  %361 = vrot.lane.b32.xlu0 %v4644_v49, %s4482_s16 }
  0xa9   : > { %v840_v33 = vsel %vm370_vm0, %v835_v32, %v836_v30  ;;  %2286 = vmatpush1.bf16.msra.mxu0 %v4363_v29 }
  0xaa   : > { %v841_v36 = vsel %vm746_vm9, %v826_v26, %v840_v33  ;;  %v4726_v39 = vpop.permute.xlu0 %1749  ;;  %v1835_v40 = vpop.permute.xlu1 %1834 }
  0xab   : > { %854 = vst [vmem:[#allocation2 + $0xc8] sm:$0xcc] %v841_v36  ;;  %v1757_v41 = vrot.slane %v4726_v39, 4  ;;  %v1844_v52 = vrot.slane %v1835_v40, 4 }
  0xac   : > { %649 = vrot.lane.b32.xlu1 %v4628_v38, %s4483_s17  ;;  %557 = vrot.lane.b32.xlu0 %v4673_v0, %s4483_s17 }
  0xad   : > { %v1762_v45 = vsel %vm370_vm0, %v1756_v37, %v1757_v41  ;;  %v4276_v37 = vpack.c.bf16 %v1793_v43, %v1783_v35 }
  0xae   : > { %v1763_v47 = vsel %vm1671_vm1, %v4623_v34, %v1762_v45  ;;  %v4740_v50 = vpop.permute.xlu0 %1836  ;;  %v4742_v51 = vpop.permute.xlu1 %1933 }
  0xaf   : > { %1775 = vst [vmem:[#allocation2 + $0x148] sm:$0x33] %v1763_v47  ;;  %v1845_v38 = vrot.slane %v4740_v50, 4  ;;  %v1941_v53 = vrot.slane %v4742_v51, 4  ;;  %v1286_v61 = vrot.slane %v4276_v37, 6 }
  0xb0   : > { %833 = vrot.lane.b32.xlu1 %v4642_v48, %s4484_s18  ;;  %736 = vrot.lane.b32.xlu0 %v4644_v49, %s4484_s18 }
  0xb1   : > { %v1849_v34 = vsel %vm370_vm0, %v1844_v52, %v1845_v38  ;;  %v1946_v55 = vsel %vm370_vm0, %v1940_v46, %v1941_v53 }
  0xb2   : > { %v1851_v57 = vsel %vm1850_vm2, %v1835_v40, %v1849_v34  ;;  %v1947_v58 = vsel %vm1850_vm2, %v4634_v42, %v1946_v55  ;;  %v4761_v48 = vpop.permute.xlu0 %1013  ;;  %v1099_v59 = vpop.permute.xlu1 %1098  ;;  %v2011_v40 = vld [vmem:[%s5754_s4] sm:$0xf] }
  0xb3   : > { %1864 = vst [vmem:[#allocation2 + $0xa0] sm:$0x33] %v1851_v57  ;;  %1959 = vst [vmem:[#allocation2 + $0x148] sm:$0xcc] %v1947_v58  ;;  %v1021_v49 = vrot.slane %v4761_v48, 4  ;;  %v1108_v2 = vrot.slane %v1099_v59, 4 }
  0xb4   : > { %1842 = vrot.lane.b32.xlu1 %v4276_v37, %s4478_s9  ;;  %925 = vrot.lane.b32.xlu0 %v4673_v0, %s4477_s8 }
  0xb5   : > { %v1026_v46 = vsel %vm370_vm0, %v1020_v44, %v1021_v49 }
  0xb6   : > { %v1027_v42 = vsel %vm5758_vm3, %v4618_v31, %v1026_v46  ;;  %v4774_v63 = vpop.permute.xlu0 %1100  ;;  %v4776_v1 = vpop.permute.xlu1 %1197 }
  0xb7   : > { %1039 = vst [vmem:[#allocation2 + $0xf8] sm:$0x33] %v1027_v42  ;;  %v1109_v4 = vrot.slane %v4774_v63, 4  ;;  %v1205_v0 = vrot.slane %v4776_v1, 4 }
  0xb8   : > { %1295 = vrot.lane.b32.xlu1 %v1286_v61, %s4480_s11  ;;  %1106 = vrot.lane.b32.xlu0 %v4276_v37, %s4479_s10 }
  0xb9   : > { %v1113_v44 = vsel %vm370_vm0, %v1108_v2, %v1109_v4  ;;  %v1210_v31 = vsel %vm370_vm0, %v1204_v56, %v1205_v0 }
  0xba   : > { %v1115_v5 = vsel %vm1114_vm4, %v1099_v59, %v1113_v44  ;;  %v1211_v7 = vsel %vm1114_vm4, %v4654_v54, %v1210_v31  ;;  %v1288_v8 = vpop.permute.xlu0 %1287  ;;  %v4793_v9 = vpop.permute.xlu1 %1289  ;;  %v4365_v10 = vld [vmem:[#allocation2 + $0xa4] ss:$40 sps:$4 sm:$0xff]   ;;  %v4368_v17 = vld [vmem:[#allocation2 + $0xa0] ss:$40 sps:$4 sm:$0xff]  }
  0xbb   : > { %v2007_v11 = vld [vmem:[#allocation2 + $0x148] sm:$0xff]  ;;  %1128 = vst [vmem:[#allocation2 + $0x50] sm:$0x33] %v1115_v5  ;;  %1223 = vst [vmem:[#allocation2 + $0xf8] sm:$0xcc] %v1211_v7  ;;  %v1297_v12 = vrot.slane %v1288_v8, 4  ;;  %2287 = vmatprep.subr.bf16.mxu0 %v4365_v10 }
  0xbc   : > { %v1298_v14 = vrot.slane %v4793_v9, 4  ;;  %v4088_v16 = vcombine.high %v2007_v11, %v2007_v11  ;;  %v4087_v18 = vcombine.low %v2007_v11, %v2007_v11  ;;  %1663 = vrot.lane.b32.xlu1 %v1286_v61, %s4476_s30  ;;  %1474 = vrot.lane.b32.xlu0 %v4276_v37, %s4481_s12 }
  0xbd   : > { %2288 = vmatpush1.bf16.msra.mxu0 %v4368_v17 }
  0xbe   : > { %v1302_v54 = vsel %vm370_vm0, %v1297_v12, %v1298_v14  ;;  %4097 = vmatprep.subr.msk.bf16.mxu1 %vm370_vm0, %v4088_v16  ;;  %v2254_v56 = vsel %vm370_vm0, %v4087_v18, 0  ;;  %v4804_v22 = vpop.permute.xlu0 %1381  ;;  %v1467_v23 = vpop.permute.xlu1 %1466 }
  0xbf   : > { %v1304_v20 = vsel %vm1303_vm5, %v1288_v8, %v1302_v54  ;;  %2325 = vmatpush1.bf16.msra.mxu1 %v2254_v56  ;;  %v1389_v24 = vrot.slane %v4804_v22, 4  ;;  %v1476_v33 = vrot.slane %v1467_v23, 4 }
  0xc0   : > { %1317 = vst [vmem:[#allocation2 + $0x50] sm:$0xcc] %v1304_v20  ;;  %559 = vrot.lane.b32.xlu1 %v1286_v61, %s4483_s17  ;;  %363 = vrot.lane.b32.xlu0 %v4276_v37, %s4482_s16 }
  0xc1   : > { %v1394_v26 = vsel %vm370_vm0, %v1388_v62, %v1389_v24 }
  0xc2   : > { %v1395_v27 = vsel %vm1303_vm5, %v4665_v60, %v1394_v26  ;;  %v4816_v29 = vpop.permute.xlu0 %1468  ;;  %v4818_v32 = vpop.permute.xlu1 %1565 }
  0xc3   : > { %1407 = vst [vmem:[#allocation2 + $0x120] sm:$0x33] %v1395_v27  ;;  %v1477_v35 = vrot.slane %v4816_v29, 4  ;;  %v1573_v36 = vrot.slane %v4818_v32, 4 }
  0xc4   : > { %927 = vrot.lane.b32.xlu1 %v1286_v61, %s4477_s8  ;;  %738 = vrot.lane.b32.xlu0 %v4276_v37, %s4484_s18 }
  0xc5   : > { %v1481_v62 = vsel %vm370_vm0, %v1476_v33, %v1477_v35  ;;  %v1578_v60 = vsel %vm370_vm0, %v1572_v6, %v1573_v36 }
  0xc6   : > { %v1483_v43 = vsel %vm1482_vm6, %v1467_v23, %v1481_v62  ;;  %v1579_v45 = vsel %vm1482_vm6, %v4679_v3, %v1578_v60  ;;  %v1656_v47 = vpop.permute.xlu0 %1655  ;;  %v4838_v52 = vpop.permute.xlu1 %1657 }
  0xc7   : > { %1496 = vst [vmem:[#allocation2 + $0x78] sm:$0x33] %v1483_v43  ;;  %1591 = vst [vmem:[#allocation2 + $0x120] sm:$0xcc] %v1579_v45  ;;  %v1665_v37 = vrot.slane %v1656_v47, 4  ;;  %v1666_v34 = vrot.slane %v4838_v52, 4 }
  0xc8   : > { %2014 = vperm.xlu0 %4349, %v2011_v40  }
  0xc9   : > { %v1670_v6 = vsel %vm370_vm0, %v1665_v37, %v1666_v34 }
  0xca   : > { %v1672_v55 = vsel %vm1671_vm1, %v1656_v47, %v1670_v6  ;;  %v4845_v57 = vpop.permute.xlu1 %357  ;;  %v356_v58 = vpop.permute.xlu0 %355 }
  0xcb   : > { %1685 = vst [vmem:[#allocation2 + $0x78] sm:$0xcc] %v1672_v55  ;;  %v366_v3 = vrot.slane %v4845_v57, 4  ;;  %v365_v59 = vrot.slane %v356_v58, 4 }
  0xcd   : > { %v371_v61 = vsel %vm370_vm0, %v365_v59, %v366_v3 }
  0xce   : > { %v373_v46 = vsel %vm372_vm7, %v356_v58, %v371_v61  ;;  %v552_v42 = vpop.permute.xlu1 %551  ;;  %v4852_v2 = vpop.permute.xlu0 %458  ;;  %v4370_v44 = vld [vmem:[#allocation2 + $0xfc] ss:$40 sps:$4 sm:$0xff]   ;;  %v4372_v31 = vld [vmem:[#allocation2 + $0xf8] ss:$40 sps:$4 sm:$0xff]  }
  0xcf   : > { %386 = vst [vmem:[#allocation2] sm:$0x33] %v373_v46  ;;  %v466_v5 = vrot.slane %v4852_v2, 4  ;;  %2326 = vmatprep.subr.bf16.mxu1 %v4370_v44  ;;  %v561_v17 = vrot.slane %v552_v42, 4 }
  0xd0   : > { %2327 = vmatpush1.bf16.msra.mxu1 %v4372_v31 }
  0xd1   : > { %v471_v7 = vsel %vm370_vm0, %v465_v15, %v466_v5 }
  0xd2   : > { %v472_v8 = vsel %vm372_vm7, %v4692_v13, %v471_v7  ;;  %v4862_v10 = vpop.permute.xlu1 %645  ;;  %v4864_v11 = vpop.permute.xlu0 %553  ;;  %v4373_v12 = vld [vmem:[#allocation2 + $0x54] ss:$40 sps:$4 sm:$0xff]   ;;  %v4375_v16 = vld [vmem:[#allocation2 + $0x50] ss:$40 sps:$4 sm:$0xff]  }
  0xd3   : > { %484 = vst [vmem:[#allocation2 + $0xa8] sm:$0xcc] %v472_v8  ;;  %v653_v18 = vrot.slane %v4862_v10, 4  ;;  %v562_v54 = vrot.slane %v4864_v11, 4  ;;  %2289 = vmatprep.subr.bf16.mxu0 %v4373_v12 }
  0xd4   : > { %2290 = vmatpush1.bf16.msra.mxu0 %v4375_v16 }
  0xd5   : > { %v658_v15 = vsel %vm370_vm0, %v652_v21, %v653_v18  ;;  %v566_v13 = vsel %vm370_vm0, %v561_v17, %v562_v54 }
  0xd6   : > { %v659_v56 = vsel %vm567_vm8, %v4703_v19, %v658_v15  ;;  %v568_v20 = vsel %vm567_vm8, %v552_v42, %v566_v13  ;;  %v4879_v23 = vpop.permute.xlu1 %732  ;;  %v731_v26 = vpop.permute.xlu0 %730 }
  0xd7   : > { %671 = vst [vmem:[#allocation2 + $0xd0] sm:$0x33] %v659_v56  ;;  %581 = vst [vmem:[#allocation2] sm:$0xcc] %v568_v20  ;;  %v741_v27 = vrot.slane %v4879_v23, 4  ;;  %v740_v33 = vrot.slane %v731_v26, 4 }
  0xd9   : > { %v745_v21 = vsel %vm370_vm0, %v740_v33, %v741_v27 }
  0xda   : > { %v747_v62 = vsel %vm746_vm9, %v731_v26, %v745_v21  ;;  %v920_v60 = vpop.permute.xlu1 %919  ;;  %v4886_v40 = vpop.permute.xlu0 %829 }
  0xdb   : > { %760 = vst [vmem:[#allocation2 + $0x28] sm:$0x33] %v747_v62  ;;  %v837_v19 = vrot.slane %v4886_v40, 4  ;;  %v929_v6 = vrot.slane %v920_v60, 4  ;;  %v4972_v62 = vld [vmem:[%s5753_s3] sm:$0x3] }
  0xdd   : > { %v842_v43 = vsel %vm370_vm0, %v836_v30, %v837_v19 }
  0xde   : > { %v843_v45 = vsel %vm746_vm9, %v4714_v25, %v842_v43  ;;  %v4896_v47 = vpop.permute.xlu1 %1838  ;;  %v4898_v37 = vpop.permute.xlu0 %921 }
  0xdf   : > { %855 = vst [vmem:[#allocation2 + $0xd0] sm:$0xcc] %v843_v45  ;;  %v1846_v55 = vrot.slane %v4896_v47, 4  ;;  %v930_v58 = vrot.slane %v4898_v37, 4 }
  0xe1   : > { %v1852_v59 = vsel %vm370_vm0, %v1845_v38, %v1846_v55  ;;  %v934_v25 = vsel %vm370_vm0, %v929_v6, %v930_v58 }
  0xe2   : > { %v1853_v30 = vsel %vm1850_vm2, %v4740_v50, %v1852_v59  ;;  %v936_v61 = vsel %vm5758_vm3, %v920_v60, %v934_v25  ;;  %v4913_v46 = vpop.permute.xlu1 %1291  ;;  %v4915_v42 = vpop.permute.xlu0 %1102 }
  0xe3   : > { %1865 = vst [vmem:[#allocation2 + $0xa8] sm:$0x33] %v1853_v30  ;;  %949 = vst [vmem:[#allocation2 + $0x28] sm:$0xcc] %v936_v61  ;;  %v1299_v44 = vrot.slane %v4913_v46, 4  ;;  %v1110_v31 = vrot.slane %v4915_v42, 4 }
  0xe5   : > { %v1305_v38 = vsel %vm370_vm0, %v1298_v14, %v1299_v44  ;;  %v1116_v50 = vsel %vm370_vm0, %v1109_v4, %v1110_v31 }
  0xe6   : > { %v1306_v7 = vsel %vm1303_vm5, %v4793_v9, %v1305_v38  ;;  %v1117_v8 = vsel %vm1114_vm4, %v4774_v63, %v1116_v50  ;;  %v4933_v12 = vpop.permute.xlu1 %1659  ;;  %v4935_v16 = vpop.permute.xlu0 %1470 }
  0xe7   : > { %1318 = vst [vmem:[#allocation2 + $0x58] sm:$0xcc] %v1306_v7  ;;  %1129 = vst [vmem:[#allocation2 + $0x58] sm:$0x33] %v1117_v8  ;;  %v1667_v14 = vrot.slane %v4933_v12, 4  ;;  %v1478_v17 = vrot.slane %v4935_v16, 4 }
  0xe9   : > { %v1673_v4 = vsel %vm370_vm0, %v1666_v34, %v1667_v14  ;;  %v1484_v63 = vsel %vm370_vm0, %v1477_v35, %v1478_v17 }
  0xea   : > { %v1674_v9 = vsel %vm1671_vm1, %v4838_v52, %v1673_v4  ;;  %v1485_v15 = vsel %vm1482_vm6, %v4816_v29, %v1484_v63  ;;  %v4953_v13 = vpop.permute.xlu1 %1935  ;;  %v4955_v56 = vpop.permute.xlu0 %1751  ;;  %v4376_v20 = vld [vmem:[#allocation2 + $0x4] ss:$40 sps:$4 sm:$0xff]   ;;  %v4380_v21 = vld [vmem:[#allocation2] ss:$40 sps:$4 sm:$0xff]  }
  0xeb   : > { %1686 = vst [vmem:[#allocation2 + $0x80] sm:$0xcc] %v1674_v9  ;;  %1497 = vst [vmem:[#allocation2 + $0x80] sm:$0x33] %v1485_v15  ;;  %v1942_v34 = vrot.slane %v4953_v13, 4  ;;  %v1758_v26 = vrot.slane %v4955_v56, 4  ;;  %2291 = vmatprep.subr.bf16.mxu0 %v4376_v20 }
  0xec   : > { %v4378_v33 = vld [vmem:[#allocation2 + $0xac] ss:$40 sps:$4 sm:$0xff]   ;;  %v4381_v35 = vld [vmem:[#allocation2 + $0xa8] ss:$40 sps:$4 sm:$0xff]   ;;  %2292 = vmatpush1.bf16.msra.mxu0 %v4380_v21 }
  0xed   : > { %v1948_v29 = vsel %vm370_vm0, %v1941_v53, %v1942_v34  ;;  %v1764_v52 = vsel %vm370_vm0, %v1757_v41, %v1758_v26  ;;  %2328 = vmatprep.subr.bf16.mxu1 %v4378_v33 }
  0xee   : > { %v1949_v60 = vsel %vm1850_vm2, %v4742_v51, %v1948_v29  ;;  %v1765_v53 = vsel %vm1671_vm1, %v4726_v39, %v1764_v52  ;;  %v4978_v43 = vpop.permute.xlu1 %555  ;;  %2329 = vmatpush1.bf16.msra.mxu1 %v4381_v35  ;;  %v4980_v45 = vpop.permute.xlu0 %359 }
  0xef   : > { %1960 = vst [vmem:[#allocation2 + $0x150] sm:$0xcc] %v1949_v60  ;;  %1776 = vst [vmem:[#allocation2 + $0x150] sm:$0x33] %v1765_v53  ;;  %v563_v41 = vrot.slane %v4978_v43, 4  ;;  %v367_v6 = vrot.slane %v4980_v45, 4  ;;  %4096 = vmatmul.mubr.msk.bf16.vlgmr.msra.gmra.mxu0 %vm2242_vm10, %v4972_v62 }
  0xf0   : > { %2391 = vmatprep.mubr.bf16.mxu0 %v4485_v28 }
  0xf1   : > { %v569_v39 = vsel %vm370_vm0, %v562_v54, %v563_v41  ;;  %v374_v51 = vsel %vm370_vm0, %v366_v3, %v367_v6 }
  0xf2   : > { %v570_v59 = vsel %vm567_vm8, %v4864_v11, %v569_v39  ;;  %v375_v25 = vsel %vm372_vm7, %v4845_v57, %v374_v51  ;;  %v5001_v30 = vpop.permute.xlu1 %923  ;;  %v5003_v61 = vpop.permute.xlu0 %734  ;;  %v4382_v38 = vld [vmem:[#allocation2 + $0x5c] ss:$40 sps:$4 sm:$0xff]   ;;  %v4384_v54 = vld [vmem:[#allocation2 + $0x58] ss:$40 sps:$4 sm:$0xff]  }
  0xf3   : > { %582 = vst [vmem:[#allocation2 + $0x8] sm:$0xcc] %v570_v59  ;;  %387 = vst [vmem:[#allocation2 + $0x8] sm:$0x33] %v375_v25  ;;  %v931_v50 = vrot.slane %v5001_v30, 4  ;;  %v742_v3 = vrot.slane %v5003_v61, 4  ;;  %2330 = vmatprep.subr.bf16.mxu1 %v4382_v38 }
  0xf4   : > { %2331 = vmatpush1.bf16.msra.mxu1 %v4384_v54 }
  0xf5   : > { %v937_v11 = vsel %vm370_vm0, %v930_v58, %v931_v50  ;;  %v748_v57 = vsel %vm370_vm0, %v741_v27, %v742_v3 }
  0xf6   : > { %v938_v7 = vsel %vm5758_vm3, %v4898_v37, %v937_v11  ;;  %v749_v8 = vsel %vm746_vm9, %v4879_v23, %v748_v57  ;;  %v5021_v4 = vpop.permute.xlu1 %1199  ;;  %v5023_v63 = vpop.permute.xlu0 %1015  ;;  %v2008_v9 = vld [vmem:[#allocation2 + $0x150] sm:$0xff] }
  0xf7   : > { %950 = vst [vmem:[#allocation2 + $0x30] sm:$0xcc] %v938_v7  ;;  %761 = vst [vmem:[#allocation2 + $0x30] sm:$0x33] %v749_v8  ;;  %v1206_v58 = vrot.slane %v5021_v4, 4  ;;  %v1022_v15 = vrot.slane %v5023_v63, 4  ;;  %v4090_v20 = vcombine.high %v2008_v9, %v2008_v9  ;;  %v4089_v27 = vcombine.low %v2008_v9, %v2008_v9 }
  0xf9   : > { %v1212_v37 = vsel %vm370_vm0, %v1205_v0, %v1206_v58  ;;  %v1028_v23 = vsel %vm370_vm0, %v1021_v49, %v1022_v15  ;;  %4099 = vmatprep.subr.msk.bf16.mxu0 %vm370_vm0, %v4090_v20  ;;  %v2260_v33 = vsel %vm370_vm0, %v4089_v27, 0 }
  0xfa   : > { %v1213_v21 = vsel %vm1114_vm4, %v4776_v1, %v1212_v37  ;;  %v1029_v35 = vsel %vm5758_vm3, %v4761_v48, %v1028_v23  ;;  %v5043_v29 = vpop.permute.xlu1 %1567  ;;  %2366 = vmatpush1.bf16.msra.mxu0 %v2260_v33  ;;  %v5045_v0 = vpop.permute.xlu0 %1383  ;;  %v1967_v59 = vld [vmem:[#allocation2 + $0x8] sm:$0xff] }
  0xfb   : > { %1224 = vst [vmem:[#allocation2 + $0x100] sm:$0xcc] %v1213_v21  ;;  %1040 = vst [vmem:[#allocation2 + $0x100] sm:$0x33] %v1029_v35  ;;  %v1574_v52 = vrot.slane %v5043_v29, 4  ;;  %v1390_v49 = vrot.slane %v5045_v0, 4 }
  0xfd   : > { %v1580_v1 = vsel %vm370_vm0, %v1573_v36, %v1574_v52  ;;  %v1396_v48 = vsel %vm370_vm0, %v1389_v24, %v1390_v49 }
  0xfe   : > { %v1581_v60 = vsel %vm1482_vm6, %v4818_v32, %v1580_v1  ;;  %v1397_v53 = vsel %vm1303_vm5, %v4804_v22, %v1396_v48  ;;  %v5063_v39 = vpop.permute.xlu1 %647  ;;  %v5065_v51 = vpop.permute.xlu0 %460  ;;  %v1972_v25 = vld [vmem:[#allocation2 + $0x30] sm:$0xff] }
  0xff   : > { %v4387_v38 = vld [vmem:[#allocation2 + $0xc] ss:$40 sps:$4 sm:$0xff]   ;;  %1592 = vst [vmem:[#allocation2 + $0x128] sm:$0xcc] %v1581_v60  ;;  %1408 = vst [vmem:[#allocation2 + $0x128] sm:$0x33] %v1397_v53  ;;  %v4047_v24 = vcombine.low %v1967_v59, %v1972_v25 }
 0x100   : > { %v654_v36 = vrot.slane %v5063_v39, 4  ;;  %v467_v54 = vrot.slane %v5065_v51, 4  ;;  %2332 = vmatprep.subr.bf16.mxu1 %v4387_v38 }
 0x101   : > { %2333 = vmatpush1.bf16.msra.mxu1 %v4047_v24 }
 0x102   : > { %v660_v22 = vsel %vm370_vm0, %v653_v18, %v654_v36  ;;  %v473_v32 = vsel %vm370_vm0, %v466_v5, %v467_v54  ;;  %v1754_v7 = vpop.permute.xlu1 %1753  ;;  %v5083_v8 = vpop.permute.xlu0 %831 }
 0x103   : > { %v661_v11 = vsel %vm567_vm8, %v4862_v10, %v660_v22  ;;  %v474_v57 = vsel %vm372_vm7, %v4852_v2, %v473_v32  ;;  %v1759_v9 = vrot.slane %v1754_v7, 4  ;;  %v838_v5 = vrot.slane %v5083_v8, 4 }
 0x104   : > { %672 = vst [vmem:[#allocation2 + $0xd8] sm:$0x33] %v661_v11  ;;  %485 = vst [vmem:[#allocation2 + $0xb0] sm:$0xcc] %v474_v57  ;;  %4098 = vmatmul.mubr.msk.bf16.vlgmr.msra.gmra.mxu1 %vm2242_vm10, %v4972_v62 }
 0x105   : > { %v1766_v2 = vsel %vm370_vm0, %v1758_v26, %v1759_v9  ;;  %v1768_v10 = vsel %vm1671_vm1, %v1754_v7, %v1759_v9  ;;  %v844_v20 = vsel %vm370_vm0, %v837_v19, %v838_v5  ;;  %2432 = vmatprep.mubr.bf16.mxu1 %v4485_v28 }
 0x106   : > { %v1767_v27 = vsel %vm1671_vm1, %v4955_v56, %v1766_v2  ;;  %1778 = vst.msk [vmem:[#allocation2 + $0x160] sm:$0x33] %vm5086_vm13, %v1768_v10  ;;  %v845_v37 = vsel %vm746_vm9, %v4886_v40, %v844_v20  ;;  %v1938_v26 = vpop.permute.xlu1 %1937  ;;  %v5109_v23 = vpop.permute.xlu0 %1840  ;;  %v4389_v33 = vld [vmem:[#allocation2 + $0x100] ss:$40 sps:$4 sm:$0xff]   ;;  %v4391_v21 = vld [vmem:[#allocation2 + $0x104] ss:$40 sps:$4 sm:$0xff]  }
 0x107   : > { %1777 = vst [vmem:[#allocation2 + $0x158] sm:$0x33] %v1767_v27  ;;  %856 = vst [vmem:[#allocation2 + $0xd8] sm:$0xcc] %v845_v37  ;;  %v1943_v35 = vrot.slane %v1938_v26, 4  ;;  %v1847_v56 = vrot.slane %v5109_v23, 4  ;;  %2367 = vmatprep.subr.bf16.mxu0 %v4391_v21 }
 0x108   : > { %2368 = vmatpush1.bf16.msra.mxu0 %v4389_v33 }
 0x109   : > { %v1950_v40 = vsel %vm370_vm0, %v1942_v34, %v1943_v35  ;;  %v1952_v1 = vsel %vm1850_vm2, %v1938_v26, %v1943_v35  ;;  %v1854_v48 = vsel %vm370_vm0, %v1846_v55, %v1847_v56 }
 0x10a   : > { %v1951_v60 = vsel %vm1850_vm2, %v4953_v13, %v1950_v40  ;;  %1962 = vst.msk [vmem:[#allocation2 + $0x160] sm:$0xcc] %vm5112_vm12, %v1952_v1  ;;  %v1855_v53 = vsel %vm1850_vm2, %v4896_v47, %v1854_v48  ;;  %v5132_v59 = vpop.permute.xlu1 %1104  ;;  %v1018_v34 = vpop.permute.xlu0 %1017 }
 0x10b   : > { %1961 = vst [vmem:[#allocation2 + $0x158] sm:$0xcc] %v1951_v60  ;;  %1866 = vst [vmem:[#allocation2 + $0xb0] sm:$0x33] %v1855_v53  ;;  %v1111_v25 = vrot.slane %v5132_v59, 4  ;;  %v1023_v38 = vrot.slane %v1018_v34, 4 }
 0x10d   : > { %v1118_v55 = vsel %vm370_vm0, %v1110_v31, %v1111_v25  ;;  %v1030_v13 = vsel %vm370_vm0, %v1022_v15, %v1023_v38  ;;  %v1032_v47 = vsel %vm5758_vm3, %v1018_v34, %v1023_v38 }
 0x10e   : > { %v1119_v24 = vsel %vm1114_vm4, %v4915_v42, %v1118_v55  ;;  %v1031_v22 = vsel %vm5758_vm3, %v5023_v63, %v1030_v13  ;;  %1042 = vst.msk [vmem:[#allocation2 + $0x110] sm:$0x33] %vm5086_vm13, %v1032_v47  ;;  %v5150_v32 = vpop.permute.xlu1 %1293  ;;  %v1202_v11 = vpop.permute.xlu0 %1201 }
 0x10f   : > { %1130 = vst [vmem:[#allocation2 + $0x60] sm:$0x33] %v1119_v24  ;;  %1041 = vst [vmem:[#allocation2 + $0x108] sm:$0x33] %v1031_v22  ;;  %v1300_v31 = vrot.slane %v5150_v32, 4  ;;  %v1207_v57 = vrot.slane %v1202_v11, 4 }
 0x111   : > { %v1307_v42 = vsel %vm370_vm0, %v1299_v44, %v1300_v31  ;;  %v1214_v63 = vsel %vm370_vm0, %v1206_v58, %v1207_v57  ;;  %v1216_v15 = vsel %vm1114_vm4, %v1202_v11, %v1207_v57 }
 0x112   : > { %v1308_v7 = vsel %vm1303_vm5, %v4913_v46, %v1307_v42  ;;  %v1215_v9 = vsel %vm1114_vm4, %v5021_v4, %v1214_v63  ;;  %1226 = vst.msk [vmem:[#allocation2 + $0x110] sm:$0xcc] %vm5112_vm12, %v1216_v15  ;;  %v5168_v2 = vpop.permute.xlu1 %1472  ;;  %v1386_v10 = vpop.permute.xlu0 %1385  ;;  %v4392_v20 = vld [vmem:[#allocation2 + $0xb0] ss:$40 sps:$4 sm:$0xff]   ;;  %v4394_v44 = vld [vmem:[#allocation2 + $0xb4] ss:$40 sps:$4 sm:$0xff]  }
 0x113   : > { %1319 = vst [vmem:[#allocation2 + $0x60] sm:$0xcc] %v1308_v7  ;;  %1225 = vst [vmem:[#allocation2 + $0x108] sm:$0xcc] %v1215_v9  ;;  %v1479_v58 = vrot.slane %v5168_v2, 4  ;;  %v1391_v27 = vrot.slane %v1386_v10, 4  ;;  %2369 = vmatprep.subr.bf16.mxu0 %v4394_v44 }
 0x114   : > { %v2009_v37 = vld [vmem:[#allocation2 + $0x158] sm:$0xff]  ;;  %2370 = vmatpush1.bf16.msra.mxu0 %v4392_v20 }
 0x115   : > { %v4092_v26 = vcombine.high %v2009_v37, %v2009_v37  ;;  %v4091_v46 = vcombine.low %v2009_v37, %v2009_v37  ;;  %v1486_v4 = vsel %vm370_vm0, %v1478_v17, %v1479_v58  ;;  %v1398_v33 = vsel %vm370_vm0, %v1390_v49, %v1391_v27 }
 0x116   : > { %v1400_v21 = vsel %vm1303_vm5, %v1386_v10, %v1391_v27  ;;  %v1487_v35 = vsel %vm1482_vm6, %v4935_v16, %v1486_v4  ;;  %v1399_v40 = vsel %vm1303_vm5, %v5045_v0, %v1398_v33  ;;  %v5187_v1 = vpop.permute.xlu1 %1661  ;;  %v1570_v48 = vpop.permute.xlu0 %1569 }
 0x117   : > { %1410 = vst.msk [vmem:[#allocation2 + $0x138] sm:$0x33] %vm5086_vm13, %v1400_v21  ;;  %4101 = vmatprep.subr.msk.bf16.mxu1 %vm370_vm0, %v4092_v26  ;;  %v2266_v17 = vsel %vm370_vm0, %v4091_v46, 0  ;;  %1498 = vst [vmem:[#allocation2 + $0x88] sm:$0x33] %v1487_v35  ;;  %v1668_v49 = vrot.slane %v5187_v1, 4 }
 0x118   : > { %1409 = vst [vmem:[#allocation2 + $0x130] sm:$0x33] %v1399_v40  ;;  %2407 = vmatpush1.bf16.msra.mxu1 %v2266_v17  ;;  %v1575_v60 = vrot.slane %v1570_v48, 4 }
 0x119   : > { %v1675_v16 = vsel %vm370_vm0, %v1667_v14, %v1668_v49 }
 0x11a   : > { %v1582_v0 = vsel %vm370_vm0, %v1574_v52, %v1575_v60  ;;  %v1584_v53 = vsel %vm1482_vm6, %v1570_v48, %v1575_v60  ;;  %v1676_v34 = vsel %vm1671_vm1, %v4933_v12, %v1675_v16  ;;  %v463_v55 = vpop.permute.xlu1 %462  ;;  %v5206_v13 = vpop.permute.xlu0 %361  ;;  %v1978_v63 = vld [vmem:[#allocation2 + $0x60] sm:$0xff] }
 0x11b   : > { %v1583_v38 = vsel %vm1482_vm6, %v5043_v29, %v1582_v0  ;;  %1594 = vst.msk [vmem:[#allocation2 + $0x138] sm:$0xcc] %vm5112_vm12, %v1584_v53  ;;  %1687 = vst [vmem:[#allocation2 + $0x88] sm:$0xcc] %v1676_v34  ;;  %v468_v14 = vrot.slane %v463_v55, 4  ;;  %v368_v47 = vrot.slane %v5206_v13, 4 }
 0x11c   : > { %1593 = vst [vmem:[#allocation2 + $0x130] sm:$0xcc] %v1583_v38 }
 0x11d   : > { %v475_v52 = vsel %vm370_vm0, %v467_v54, %v468_v14  ;;  %v477_v12 = vsel %vm372_vm7, %v463_v55, %v468_v14  ;;  %v376_v29 = vsel %vm370_vm0, %v367_v6, %v368_v47 }
 0x11e   : > { %v476_v24 = vsel %vm372_vm7, %v5065_v51, %v475_v52  ;;  %490 = vst.msk [vmem:[#allocation2 + $0xc0] sm:$0xcc] %vm5112_vm12, %v477_v12  ;;  %v377_v22 = vsel %vm372_vm7, %v4980_v45, %v376_v29  ;;  %v650_v11 = vpop.permute.xlu1 %649  ;;  %v5224_v57 = vpop.permute.xlu0 %557 }
 0x11f   : > { %486 = vst [vmem:[#allocation2 + $0xb8] sm:$0xcc] %v476_v24  ;;  %388 = vst [vmem:[#allocation2 + $0x10] sm:$0x33] %v377_v22  ;;  %v655_v54 = vrot.slane %v650_v11, 4  ;;  %v564_v42 = vrot.slane %v5224_v57, 4 }
 0x120   : > { %v2010_v24 = vld [vmem:[#allocation2 + $0x160] sm:$0xff] }
 0x121   : > { %v662_v6 = vsel %vm370_vm0, %v654_v36, %v655_v54  ;;  %v664_v51 = vsel %vm567_vm8, %v650_v11, %v655_v54  ;;  %v571_v45 = vsel %vm370_vm0, %v563_v41, %v564_v42 }
 0x122   : > { %v663_v15 = vsel %vm567_vm8, %v5063_v39, %v662_v6  ;;  %674 = vst.msk [vmem:[#allocation2 + $0xe8] sm:$0x33] %vm5086_vm13, %v664_v51  ;;  %v572_v7 = vsel %vm567_vm8, %v4978_v43, %v571_v45  ;;  %v834_v9 = vpop.permute.xlu1 %833  ;;  %v5242_v36 = vpop.permute.xlu0 %736  ;;  %v1983_v10 = vld [vmem:[#allocation2 + $0x88] sm:$0xff] }
 0x123   : > { %v4397_v20 = vld [vmem:[#allocation2 + $0x64] ss:$40 sps:$4 sm:$0xff]   ;;  %673 = vst [vmem:[#allocation2 + $0xe0] sm:$0x33] %v663_v15  ;;  %583 = vst [vmem:[#allocation2 + $0x10] sm:$0xcc] %v572_v7  ;;  %v4059_v26 = vcombine.low %v1978_v63, %v1983_v10  ;;  %v4094_v7 = vcombine.high %v2010_v24, %v2010_v24 }
 0x124   : > { %v839_v44 = vrot.slane %v834_v9, 4  ;;  %v743_v41 = vrot.slane %v5242_v36, 4  ;;  %v4399_v27 = vld [vmem:[#allocation2 + $0x108] ss:$40 sps:$4 sm:$0xff]   ;;  %v4401_v37 = vld [vmem:[#allocation2 + $0x10c] ss:$40 sps:$4 sm:$0xff]   ;;  %2371 = vmatprep.subr.bf16.mxu0 %v4397_v20 }
 0x125   : > { %2408 = vmatprep.subr.bf16.mxu1 %v4401_v37  ;;  %2372 = vmatpush1.bf16.msra.mxu0 %v4059_v26 }
 0x126   : > { %v846_v39 = vsel %vm370_vm0, %v838_v5, %v839_v44  ;;  %v848_v43 = vsel %vm746_vm9, %v834_v9, %v839_v44  ;;  %v750_v46 = vsel %vm370_vm0, %v742_v3, %v743_v41  ;;  %v1843_v5 = vpop.permute.xlu1 %1842  ;;  %2409 = vmatpush1.bf16.msra.mxu1 %v4399_v27  ;;  %v5260_v21 = vpop.permute.xlu0 %925  ;;  %v4093_v9 = vcombine.low %v2010_v24, %v2010_v24 }
 0x127   : > { %v847_v4 = vsel %vm746_vm9, %v5083_v8, %v846_v39  ;;  %858 = vst.msk [vmem:[#allocation2 + $0xe8] sm:$0xcc] %vm5112_vm12, %v848_v43  ;;  %v751_v33 = vsel %vm746_vm9, %v5003_v61, %v750_v46  ;;  %v1848_v35 = vrot.slane %v1843_v5, 4  ;;  %v932_v3 = vrot.slane %v5260_v21, 4 }
 0x128   : > { %857 = vst [vmem:[#allocation2 + $0xe0] sm:$0xcc] %v847_v4  ;;  %762 = vst [vmem:[#allocation2 + $0x38] sm:$0x33] %v751_v33  ;;  %v4411_v33 = vld [vmem:[#allocation2 + $0x114] ss:$40 sps:$4 sm:$0xff]  }
 0x129   : > { %v1856_v40 = vsel %vm370_vm0, %v1847_v56, %v1848_v35  ;;  %v1858_v8 = vsel %vm1850_vm2, %v1843_v5, %v1848_v35  ;;  %v939_v61 = vsel %vm370_vm0, %v931_v50, %v932_v3 }
 0x12a   : > { %v1857_v17 = vsel %vm1850_vm2, %v5109_v23, %v1856_v40  ;;  %1868 = vst.msk [vmem:[#allocation2 + $0xc0] sm:$0x33] %vm5086_vm13, %v1858_v8  ;;  %v940_v48 = vsel %vm5758_vm3, %v5001_v30, %v939_v61  ;;  %v1296_v60 = vpop.permute.xlu1 %1295  ;;  %v1107_v16 = vpop.permute.xlu0 %1106  ;;  %v1968_v29 = vld [vmem:[#allocation2 + $0x10] sm:$0xff] }
 0x12b   : > { %1867 = vst [vmem:[#allocation2 + $0xb8] sm:$0x33] %v1857_v17  ;;  %951 = vst [vmem:[#allocation2 + $0x38] sm:$0xcc] %v940_v48  ;;  %v1301_v56 = vrot.slane %v1296_v60, 4  ;;  %v1112_v0 = vrot.slane %v1107_v16, 4 }
 0x12c   : > { %v4409_v40 = vld [vmem:[#allocation2 + $0x110] ss:$40 sps:$4 sm:$0xff]  }
 0x12d   : > { %v1309_v53 = vsel %vm370_vm0, %v1300_v31, %v1301_v56  ;;  %v1311_v50 = vsel %vm1303_vm5, %v1296_v60, %v1301_v56  ;;  %v1120_v23 = vsel %vm370_vm0, %v1111_v25, %v1112_v0  ;;  %v1122_v34 = vsel %vm1114_vm4, %v1107_v16, %v1112_v0 }
 0x12e   : > { %v1310_v30 = vsel %vm1303_vm5, %v5150_v32, %v1309_v53  ;;  %1321 = vst.msk [vmem:[#allocation2 + $0x70] sm:$0xcc] %vm5112_vm12, %v1311_v50  ;;  %v1121_v38 = vsel %vm1114_vm4, %v5132_v59, %v1120_v23  ;;  %v1664_v31 = vpop.permute.xlu1 %1663  ;;  %v1475_v55 = vpop.permute.xlu0 %1474  ;;  %v4486_v56 = vmov 0.0   ;;  %v2494_v0 = vlaneseq }
 0x12f   : > { %1132 = vst.msk [vmem:[#allocation2 + $0x70] sm:$0x33] %vm5086_vm13, %v1122_v34  ;;  %1320 = vst [vmem:[#allocation2 + $0x68] sm:$0xcc] %v1310_v30  ;;  %v1669_v14 = vrot.slane %v1664_v31, 4  ;;  %v1480_v25 = vrot.slane %v1475_v55, 4 }
 0x130   : > { %1131 = vst [vmem:[#allocation2 + $0x68] sm:$0x33] %v1121_v38  ;;  %2554 = vst [vmem:[#allocation3] sm:$0xff] %v4486_v56  ;;  %v5353_v53 = vshrl.u32 %v2494_v0, 7  ;;  %v1963_v34 = vld [vmem:[%s5752_s2] sm:$0xff] }
 0x131   : > { %v1677_v52 = vsel %vm370_vm0, %v1668_v49, %v1669_v14  ;;  %v1679_v32 = vsel %vm1671_vm1, %v1664_v31, %v1669_v14  ;;  %v1488_v12 = vsel %vm370_vm0, %v1479_v58, %v1480_v25  ;;  %v1490_v59 = vsel %vm1482_vm6, %v1475_v55, %v1480_v25  ;;  %v4415_v8 = vld [vmem:[#allocation2 + $0xc0] ss:$40 sps:$4 sm:$0xff]   ;;  %2558 = vst [vmem:[#allocation3 + $0x20] sm:$0xff] %v4486_v56 }
 0x132   : > { %v1678_v22 = vsel %vm1671_vm1, %v5187_v1, %v1677_v52  ;;  %1689 = vst.msk [vmem:[#allocation2 + $0x98] sm:$0xcc] %vm5112_vm12, %v1679_v32  ;;  %v1489_v11 = vsel %vm1482_vm6, %v5168_v2, %v1488_v12  ;;  %v560_v49 = vpop.permute.xlu1 %559  ;;  %v364_v54 = vpop.permute.xlu0 %363  ;;  %v1973_v6 = vld [vmem:[#allocation2 + $0x38] sm:$0xff]  ;;  %v2496_v50 = vsub.s32 0, %v5353_v53  ;;  %v2500_v30 = vsub.s32 1, %v5353_v53 }
 0x133   : > { %1500 = vst.msk [vmem:[#allocation2 + $0x98] sm:$0x33] %vm5086_vm13, %v1490_v59  ;;  %v4402_v58 = vld [vmem:[#allocation2 + $0x14] ss:$40 sps:$4 sm:$0xff]   ;;  %1688 = vst [vmem:[#allocation2 + $0x90] sm:$0xcc] %v1678_v22  ;;  %v4049_v1 = vcombine.low %v1968_v29, %v1973_v6 }
 0x134   : > { %1499 = vst [vmem:[#allocation2 + $0x90] sm:$0x33] %v1489_v11  ;;  %v565_v51 = vrot.slane %v560_v49, 4  ;;  %v369_v45 = vrot.slane %v364_v54, 4  ;;  %v4404_v63 = vld [vmem:[#allocation2 + $0xb8] ss:$40 sps:$4 sm:$0xff]   ;;  %2373 = vmatprep.subr.bf16.mxu0 %v4402_v58  ;;  %v5365_v31 = vrot.slane %v1963_v34, %v2496_v50  ;;  %v5370_v52 = vrot.slane %v1963_v34, %v2500_v30 }
 0x135   : > { %v4406_v15 = vld [vmem:[#allocation2 + $0xbc] ss:$40 sps:$4 sm:$0xff]   ;;  %2374 = vmatpush1.bf16.msra.mxu0 %v4049_v1  ;;  %v2504_v11 = vsub.s32 2, %v5353_v53  ;;  %v1964_v56 = vld [vmem:[%s5752_s2 + $0x8] sm:$0x3] }
 0x136   : > { %v573_v2 = vsel %vm370_vm0, %v564_v42, %v565_v51  ;;  %v575_v10 = vsel %vm567_vm8, %v560_v49, %v565_v51  ;;  %v378_v20 = vsel %vm370_vm0, %v368_v47, %v369_v45  ;;  %v380_v44 = vsel %vm372_vm7, %v364_v54, %v369_v45  ;;  %2410 = vmatprep.subr.bf16.mxu1 %v4406_v15  ;;  %v928_v42 = vpop.permute.xlu1 %927  ;;  %v739_v26 = vpop.permute.xlu0 %738 }
 0x137   : > { %v574_v27 = vsel %vm567_vm8, %v5224_v57, %v573_v2  ;;  %585 = vst.msk [vmem:[#allocation2 + $0x20] sm:$0xcc] %vm5112_vm12, %v575_v10  ;;  %v379_v37 = vsel %vm372_vm7, %v5206_v13, %v378_v20  ;;  %2411 = vmatpush1.bf16.msra.mxu1 %v4404_v63  ;;  %v933_v47 = vrot.slane %v928_v42, 4  ;;  %v744_v39 = vrot.slane %v739_v26, 4  ;;  %4103 = vmatprep.subr.msk.bf16.mxu0 %vm370_vm0, %v4094_v7 }
 0x138   : > { %393 = vst.msk [vmem:[#allocation2 + $0x20] sm:$0x33] %vm5086_vm13, %v380_v44  ;;  %584 = vst [vmem:[#allocation2 + $0x18] sm:$0xcc] %v574_v27  ;;  %v2272_v57 = vsel %vm370_vm0, %v4093_v9, 0  ;;  %4100 = vmatmul.mubr.msk.bf16.vlgmr.msra.gmra.mxu0 %vm2242_vm10, %v4972_v62  ;;  %v2508_v49 = vsub.s32 3, %v5353_v53  ;;  %v5378_v58 = vrot.slane %v1963_v34, %v2504_v11 }
 0x139   : > { %389 = vst [vmem:[#allocation2 + $0x18] sm:$0x33] %v379_v37  ;;  %v941_v43 = vsel %vm370_vm0, %v932_v3, %v933_v47  ;;  %v943_v13 = vsel %vm5758_vm3, %v928_v42, %v933_v47  ;;  %v752_v46 = vsel %vm370_vm0, %v743_v41, %v744_v39  ;;  %v754_v4 = vsel %vm746_vm9, %v739_v26, %v744_v39 }
 0x13a   : > { %v942_v5 = vsel %vm5758_vm3, %v5260_v21, %v941_v43  ;;  %953 = vst.msk [vmem:[#allocation2 + $0x48] sm:$0xcc] %vm5112_vm12, %v943_v13  ;;  %v753_v35 = vsel %vm746_vm9, %v5242_v36, %v752_v46  ;;  %2448 = vmatpush1.bf16.msra.mxu0 %v2272_v57  ;;  %2473 = vmatprep.mubr.bf16.mxu0 %v4485_v28  ;;  %v4417_v21 = vld [vmem:[#allocation2 + $0xc4] ss:$40 sps:$4 sm:$0xff]   ;;  %v4418_v61 = vld [vmem:[#allocation2 + $0x74] ss:$40 sps:$4 sm:$0xff]  }
 0x13b   : > { %764 = vst.msk [vmem:[#allocation2 + $0x48] sm:$0x33] %vm5086_vm13, %v754_v4  ;;  %v4412_v41 = vld [vmem:[#allocation2 + $0x6c] ss:$40 sps:$4 sm:$0xff]   ;;  %v4414_v3 = vld [vmem:[#allocation2 + $0x68] ss:$40 sps:$4 sm:$0xff]   ;;  %2449 = vmatprep.subr.bf16.mxu0 %v4411_v33  ;;  %v5381_v15 = vrot.slane %v1963_v34, %v2508_v49 }
 0x13c   : > { %952 = vst [vmem:[#allocation2 + $0x40] sm:$0xcc] %v942_v5  ;;  %763 = vst [vmem:[#allocation2 + $0x40] sm:$0x33] %v753_v35  ;;  %2412 = vmatprep.subr.bf16.mxu1 %v4412_v41  ;;  %v4423_v48 = vld [vmem:[#allocation2 + $0x70] ss:$40 sps:$4 sm:$0xff]  }
 0x13d   : > { %2413 = vmatpush1.bf16.msra.mxu1 %v4414_v3  ;;  %v2512_v44 = vsub.s32 4, %v5353_v53  ;;  %v2516_v27 = vsub.s32 5, %v5353_v53  ;;  %v2520_v41 = vsub.s32 6, %v5353_v53  ;;  %v2524_v3 = vsub.s32 7, %v5353_v53 }
 0x13e   : > { %2450 = vmatpush1.bf16.msra.mxu0 %v4409_v40 }
 0x13f   : > { %2451 = vmatprep.subr.bf16.mxu0 %v4417_v21  ;;  %v5389_v39 = vrot.slane %v1963_v34, %v2512_v44  ;;  %v5392_v43 = vrot.slane %v1963_v34, %v2516_v27 }
 0x142   : > { %2452 = vmatpush1.bf16.msra.mxu0 %v4415_v8  ;;  %v4424_v60 = vld [vmem:[#allocation2 + $0x24] ss:$40 sps:$4 sm:$0xff]   ;;  %v4426_v16 = vld [vmem:[#allocation2 + $0x20] ss:$40 sps:$4 sm:$0xff]  }
 0x143   : > { %v4420_v36 = vld [vmem:[#allocation2 + $0x1c] ss:$40 sps:$4 sm:$0xff]   ;;  %v4422_v17 = vld [vmem:[#allocation2 + $0x18] ss:$40 sps:$4 sm:$0xff]   ;;  %2453 = vmatprep.subr.bf16.mxu0 %v4418_v61  ;;  %v5356_v23 = vpop.permute.xlu0 %2014 }
 0x144   : > { %2414 = vmatprep.subr.bf16.mxu1 %v4420_v36  ;;  %v5400_v36 = vrot.slane %v1963_v34, %v2520_v41 }
 0x145   : > { %2415 = vmatpush1.bf16.msra.mxu1 %v4422_v17 }
 0x146   : > { %2454 = vmatpush1.bf16.msra.mxu0 %v4423_v48  ;;  %v5403_v48 = vrot.slane %v1963_v34, %v2524_v3  ;;  %v5413_v34 = vrot.slane %v1964_v56, %v2496_v50 }
 0x147   : > { %2455 = vmatprep.subr.bf16.mxu0 %v4424_v60 }
 0x148   : > { %4102 = vmatmul.mubr.msk.bf16.vlgmr.msra.gmra.mxu1 %vm2242_vm10, %v4972_v62 }
 0x149   : > { %3660 = vmatprep.mubr.bf16.mxu1 %v4485_v28 }
 0x14a   : > { %2456 = vmatpush1.bf16.msra.mxu0 %v4426_v16 }
 0x14d   : > { %4104 = vmatmul.mubr.msk.bf16.vlgmr.msra.gmra.mxu0 %vm2242_vm10, %v4972_v62  ;;  %vm2606_vm10 = vcmask 1044000  }
 0x14e   : > { %3742 = vmatprep.mubr.bf16.mxu0 %v4485_v28  ;;  %vm2608_vm3 = vmor %vm2607_vm14, %vm2606_vm10  ;;  %vm5763_vm14 = vcmask 498688  }
 0x1af   : > { %v2311_v38 = vpop.f32.mrf.mxu0 }
 0x1b0   : > { %v2312_v62 = vadd.f32 %v2311_v38, %v5356_v23 }
 0x1b1   : > { %v2313_v55 = vpop.f32.mrf.mxu0 }
 0x1b2   : > { %v2314_v14 = vadd.f32 %v2313_v55, %v5356_v23  ;;  %v2482_v25 = vmax.f32 %v2312_v62, 0.0 }
 0x1b3   : > { %v2315_v32 = vpop.f32.mrf.mxu0 }
 0x1b4   : > { %v2483_v12 = vmax.f32 %v2314_v14, 0.0  ;;  %v2544_v59 = vmul.f32 %v5365_v31, %v2482_v25 }
 0x1b5   : > { %v2316_v29 = vpop.f32.mrf.mxu0 }
 0x1b6   : > { %v2545_v24 = vmul.f32 %v5370_v52, %v2483_v12 }
 0x1b8   : > { %v2571_v22 = vcombine.low %v2544_v59, %v2545_v24  ;;  %v5418_v59 = vrot.slane %v1964_v56, %v2500_v30 }
 0x1ba   : > { %2576 = vrot.lane.b32.xlu1 %v2571_v22, %s4487_s27 }
 0x1c4   : > { %v2352_v54 = vpop.f32.mrf.mxu1 }
 0x1c5   : > { %v2353_v6 = vadd.f32 %v2352_v54, %v5356_v23 }
 0x1c6   : > { %v2354_v51 = vpop.f32.mrf.mxu1 }
 0x1c7   : > { %v2484_v45 = vmax.f32 %v2353_v6, 0.0  ;;  %v2355_v63 = vadd.f32 %v2354_v51, %v5356_v23 }
 0x1c8   : > { %v2356_v1 = vpop.f32.mrf.mxu1 }
 0x1c9   : > { %v2546_v7 = vmul.f32 %v5378_v58, %v2484_v45  ;;  %v2485_v9 = vmax.f32 %v2355_v63, 0.0 }
 0x1ca   : > { %v2357_v2 = vpop.f32.mrf.mxu1 }
 0x1cb   : > { %v2547_v10 = vmul.f32 %v5381_v15, %v2485_v9 }
 0x1cd   : > { %v2572_v20 = vcombine.low %v2546_v7, %v2547_v10 }
 0x1cf   : > { %2578 = vrot.lane.b32.xlu1 %v2572_v20, %s4487_s27 }
 0x1f8   : > { %v2393_v37 = vpop.f32.mrf.mxu0 }
 0x1f9   : > { %v2394_v42 = vadd.f32 %v2393_v37, %v5356_v23 }
 0x1fa   : > { %v2395_v26 = vpop.f32.mrf.mxu0 }
 0x1fb   : > { %v2486_v47 = vmax.f32 %v2394_v42, 0.0  ;;  %v2396_v57 = vadd.f32 %v2395_v26, %v5356_v23 }
 0x1fc   : > { %v2397_v13 = vpop.f32.mrf.mxu0 }
 0x1fd   : > { %v2487_v46 = vmax.f32 %v2396_v57, 0.0  ;;  %v2548_v33 = vmul.f32 %v5389_v39, %v2486_v47 }
 0x1fe   : > { %v2398_v4 = vpop.f32.mrf.mxu0 }
 0x1ff   : > { %v2549_v5 = vmul.f32 %v5392_v43, %v2487_v46 }
 0x201   : > { %v2573_v35 = vcombine.low %v2548_v33, %v2549_v5 }
 0x203   : > { %2580 = vrot.lane.b32.xlu0 %v2573_v35, %s4487_s27 }
 0x208   : > { %v2434_v40 = vpop.f32.mrf.mxu1 }
 0x209   : > { %v2435_v21 = vadd.f32 %v2434_v40, %v5356_v23 }
 0x20a   : > { %v2436_v8 = vpop.f32.mrf.mxu1 }
 0x20b   : > { %v2488_v61 = vmax.f32 %v2435_v21, 0.0  ;;  %v2437_v17 = vadd.f32 %v2436_v8, %v5356_v23 }
 0x20c   : > { %v2438_v60 = vpop.f32.mrf.mxu1 }
 0x20d   : > { %v2489_v16 = vmax.f32 %v2437_v17, 0.0  ;;  %v2475_v0 = vpop.f32.mrf.mxu0  ;;  %v2550_v55 = vmul.f32 %v5400_v36, %v2488_v61 }
 0x20e   : > { %v2476_v38 = vadd.f32 %v2475_v0, %v5356_v23  ;;  %v2439_v62 = vpop.f32.mrf.mxu1 }
 0x20f   : > { %v2551_v14 = vmul.f32 %v5403_v48, %v2489_v16  ;;  %v2477_v25 = vpop.f32.mrf.mxu0 }
 0x210   : > { %v2490_v32 = vmax.f32 %v2476_v38, 0.0  ;;  %v2478_v12 = vadd.f32 %v2477_v25, %v5356_v23 }
 0x211   : > { %v2574_v29 = vcombine.low %v2550_v55, %v2551_v14  ;;  %v2479_v24 = vpop.f32.mrf.mxu0 }
 0x212   : > { %v2491_v22 = vmax.f32 %v2478_v12, 0.0  ;;  %v2552_v49 = vmul.f32 %v5413_v34, %v2490_v32  ;;  %v3463_v24 = vld [vmem:[%s5756_s6] sm:$0xf] }
 0x213   : > { %2582 = vrot.lane.b32.xlu1 %v2574_v29, %s4487_s27  ;;  %v2480_v11 = vpop.f32.mrf.mxu0 }
 0x214   : > { %v2553_v54 = vmul.f32 %v5418_v59, %v2491_v22 }
 0x216   : > { %v2575_v6 = vcombine.low %v2552_v49, %v2553_v54 }
 0x218   : > { %2584 = vrot.lane.b32.xlu0 %v2575_v6, %s4487_s27 }
 0x22c   : > { %v2577_v50 = vpop.permute.xlu1 %2576 }
 0x22d   : > { %v2586_v53 = vrot.slane %v2577_v50, 4 }
 0x22f   : > { %v2592_v23 = vsel %vm2591_vm15, %v2586_v53, %v2577_v50 }
 0x230   : > { %2609 = vst.msk [vmem:[#allocation3] sm:$0xff] %vm2608_vm3, %v2592_v23  ;;  %vm2613_vm3 = vcmask 588804  }
 0x231   : > { %vm2614_vm10 = vmor %vm2613_vm3, %vm370_vm0 }
 0x232   : > { %vm5764_vm3 = vmmov %vm5763_vm14 }
 0x237   : > { %v3348_v30 = vld [vmem:[#allocation3] sm:$0xff] }
 0x238   : > { %v3358_v51 = vcombine.high %v3348_v30, %v3348_v30 }
 0x23a   : > { %v4322_v45 = vpack.c.bf16 %v3358_v51, %v3348_v30 }
 0x23c   : > { %3403 = vrot.lane.b32.xlu1 %v4322_v45, %s4478_s9  ;;  %v3126_v20 = vrot.slane %v4322_v45, 6 }
 0x240   : > { %3037 = vrot.lane.b32.xlu1 %v4322_v45, %s4479_s10 }
 0x241   : > { %v2579_v63 = vpop.permute.xlu1 %2578 }
 0x242   : > { %v2587_v1 = vrot.slane %v2579_v63, 4 }
 0x244   : > { %v2593_v7 = vsel %vm370_vm0, %v2586_v53, %v2587_v1  ;;  %3220 = vrot.lane.b32.xlu1 %v4322_v45, %s4481_s12 }
 0x245   : > { %v2594_v9 = vsel %vm2591_vm15, %v2593_v7, %v2579_v63 }
 0x246   : > { %v3359_v2 = vcombine.high %v2594_v9, %v2594_v9 }
 0x248   : > { %v4323_v10 = vpack.c.bf16 %v3359_v2, %v2594_v9  ;;  %2671 = vrot.lane.b32.xlu1 %v4322_v45, %s4482_s16 }
 0x24a   : > { %3405 = vrot.lane.b32.xlu0 %v4323_v10, %s4478_s9  ;;  %v3127_v44 = vrot.slane %v4323_v10, 6 }
 0x24c   : > { %2854 = vrot.lane.b32.xlu1 %v4322_v45, %s4484_s18 }
 0x24e   : > { %3039 = vrot.lane.b32.xlu0 %v4323_v10, %s4479_s10 }
 0x250   : > { %3131 = vrot.lane.b32.xlu1 %v3126_v20, %s4480_s11 }
 0x252   : > { %3222 = vrot.lane.b32.xlu0 %v4323_v10, %s4481_s12 }
 0x254   : > { %3314 = vrot.lane.b32.xlu1 %v3126_v20, %s4476_s30 }
 0x256   : > { %2673 = vrot.lane.b32.xlu0 %v4323_v10, %s4482_s16 }
 0x258   : > { %2765 = vrot.lane.b32.xlu1 %v3126_v20, %s4483_s17 }
 0x25a   : > { %2856 = vrot.lane.b32.xlu0 %v4323_v10, %s4484_s18 }
 0x25c   : > { %2948 = vrot.lane.b32.xlu1 %v3126_v20, %s4477_s8 }
 0x25e   : > { %3133 = vrot.lane.b32.xlu0 %v3127_v44, %s4480_s11 }
 0x262   : > { %3316 = vrot.lane.b32.xlu0 %v3127_v44, %s4476_s30 }
 0x266   : > { %2767 = vrot.lane.b32.xlu0 %v3127_v44, %s4483_s17 }
 0x26a   : > { %2950 = vrot.lane.b32.xlu0 %v3127_v44, %s4477_s8 }
 0x275   : > { %v2581_v27 = vpop.permute.xlu0 %2580 }
 0x276   : > { %v2588_v37 = vrot.slane %v2581_v27, 4 }
 0x278   : > { %v2595_v42 = vsel %vm370_vm0, %v2587_v1, %v2588_v37 }
 0x279   : > { %v2596_v26 = vsel %vm2591_vm15, %v2595_v42, %v2581_v27 }
 0x27a   : > { %v3360_v47 = vcombine.high %v2596_v26, %v2596_v26 }
 0x27c   : > { %v4324_v57 = vpack.c.bf16 %v3360_v47, %v2596_v26 }
 0x27e   : > { %3407 = vrot.lane.b32.xlu1 %v4324_v57, %s4478_s9  ;;  %v3128_v8 = vrot.slane %v4324_v57, 6 }
 0x282   : > { %3041 = vrot.lane.b32.xlu1 %v4324_v57, %s4479_s10 }
 0x285   : > { %v2583_v13 = vpop.permute.xlu1 %2582 }
 0x286   : > { %v2589_v46 = vrot.slane %v2583_v13, 4  ;;  %3224 = vrot.lane.b32.xlu1 %v4324_v57, %s4481_s12 }
 0x288   : > { %v2597_v4 = vsel %vm370_vm0, %v2588_v37, %v2589_v46 }
 0x289   : > { %v2598_v33 = vsel %vm2591_vm15, %v2597_v4, %v2583_v13 }
 0x28a   : > { %v2585_v5 = vpop.permute.xlu0 %2584  ;;  %v3361_v35 = vcombine.high %v2598_v33, %v2598_v33  ;;  %2675 = vrot.lane.b32.xlu1 %v4324_v57, %s4482_s16 }
 0x28b   : > { %v2590_v41 = vrot.slane %v2585_v5, 4 }
 0x28c   : > { %v4325_v3 = vpack.c.bf16 %v3361_v35, %v2598_v33 }
 0x28d   : > { %v2599_v40 = vsel %vm370_vm0, %v2589_v46, %v2590_v41 }
 0x28e   : > { %v2600_v21 = vsel %vm2591_vm15, %v2599_v40, %v2585_v5  ;;  %3409 = vrot.lane.b32.xlu0 %v4325_v3, %s4478_s9  ;;  %2858 = vrot.lane.b32.xlu1 %v4324_v57, %s4484_s18  ;;  %v3129_v60 = vrot.slane %v4325_v3, 6  ;;  %vm3594_vm15 = vcmask 293888  }
 0x28f   : > { %2615 = vst.msk [vmem:[#allocation3 + $0x20] sm:$0xff] %vm2614_vm10, %v2600_v21 }
 0x292   : > { %3043 = vrot.lane.b32.xlu0 %v4325_v3, %s4479_s10  ;;  %3135 = vrot.lane.b32.xlu1 %v3128_v8, %s4480_s11 }
 0x296   : > { %3226 = vrot.lane.b32.xlu0 %v4325_v3, %s4481_s12  ;;  %3318 = vrot.lane.b32.xlu1 %v3128_v8, %s4476_s30  ;;  %v3352_v61 = vld [vmem:[#allocation3 + $0x20] sm:$0xff] }
 0x297   : > { %v3362_v17 = vcombine.high %v3352_v61, %v3352_v61 }
 0x299   : > { %v4326_v16 = vpack.c.bf16 %v3362_v17, %v3352_v61 }
 0x29a   : > { %2677 = vrot.lane.b32.xlu0 %v4325_v3, %s4482_s16  ;;  %2769 = vrot.lane.b32.xlu1 %v3128_v8, %s4483_s17 }
 0x29b   : > { %v3130_v56 = vrot.slane %v4326_v16, 6 }
 0x29e   : > { %2860 = vrot.lane.b32.xlu0 %v4325_v3, %s4484_s18  ;;  %2952 = vrot.lane.b32.xlu1 %v3128_v8, %s4477_s8 }
 0x2a2   : > { %3137 = vrot.lane.b32.xlu0 %v3129_v60, %s4480_s11  ;;  %3411 = vrot.lane.b32.xlu1 %v4326_v16, %s4478_s9 }
 0x2a6   : > { %3320 = vrot.lane.b32.xlu0 %v3129_v60, %s4476_s30  ;;  %3139 = vrot.lane.b32.xlu1 %v3130_v56, %s4480_s11  ;;  %s4328_s11 = smul.u32 40, %s5769_s25 }
 0x2a8   : > { %s5731_s14 = scalar_lea.vmem %s5757_s7, %s4328_s11 }
 0x2aa   : > { %2771 = vrot.lane.b32.xlu0 %v3129_v60, %s4483_s17  ;;  %3322 = vrot.lane.b32.xlu1 %v3130_v56, %s4476_s30 }
 0x2ae   : > { %2954 = vrot.lane.b32.xlu0 %v3129_v60, %s4477_s8  ;;  %2773 = vrot.lane.b32.xlu1 %v3130_v56, %s4483_s17  ;;  %v3404_v0 = vpop.permute.xlu1 %3403 }
 0x2af   : > { %v3413_v55 = vrot.slane %v3404_v0, 4 }
 0x2b2   : > { %3045 = vrot.lane.b32.xlu0 %v4326_v16, %s4479_s10  ;;  %2956 = vrot.lane.b32.xlu1 %v3130_v56, %s4477_s8  ;;  %v3038_v38 = vpop.permute.xlu1 %3037 }
 0x2b3   : > { %v3047_v12 = vrot.slane %v3038_v38, 4 }
 0x2b6   : > { %3228 = vrot.lane.b32.xlu0 %v4326_v16, %s4481_s12  ;;  %v3221_v62 = vpop.permute.xlu1 %3220 }
 0x2b7   : > { %v3230_v6 = vrot.slane %v3221_v62, 4 }
 0x2ba   : > { %2679 = vrot.lane.b32.xlu0 %v4326_v16, %s4482_s16  ;;  %v2672_v25 = vpop.permute.xlu1 %2671 }
 0x2bb   : > { %v2681_v51 = vrot.slane %v2672_v25, 4 }
 0x2bc   : > { %v5478_v14 = vpop.permute.xlu0 %3405 }
 0x2bd   : > { %v3414_v32 = vrot.slane %v5478_v14, 4 }
 0x2be   : > { %2862 = vrot.lane.b32.xlu0 %v4326_v16, %s4484_s18  ;;  %v2855_v54 = vpop.permute.xlu1 %2854 }
 0x2bf   : > { %v3418_v29 = vsel %vm370_vm0, %v3413_v55, %v3414_v32  ;;  %v2864_v44 = vrot.slane %v2855_v54, 4 }
 0x2c0   : > { %v3419_v22 = vsel %vm1850_vm2, %v3404_v0, %v3418_v29  ;;  %v5489_v11 = vpop.permute.xlu0 %3039 }
 0x2c1   : > { %3432 = vst [vmem:[#allocation2 + $0xa0] sm:$0x33] %v3419_v22  ;;  %v3048_v49 = vrot.slane %v5489_v11, 4 }
 0x2c2   : > { %3466 = vperm.xlu0 %4349, %v3463_v24   ;;  %v3132_v1 = vpop.permute.xlu1 %3131 }
 0x2c3   : > { %v3052_v50 = vsel %vm370_vm0, %v3047_v12, %v3048_v49  ;;  %v3141_v13 = vrot.slane %v3132_v1, 4 }
 0x2c4   : > { %v3053_v53 = vsel %vm1114_vm4, %v3038_v38, %v3052_v50  ;;  %v5496_v23 = vpop.permute.xlu0 %3222 }
 0x2c5   : > { %3066 = vst [vmem:[#allocation2 + $0x50] sm:$0x33] %v3053_v53  ;;  %v3231_v30 = vrot.slane %v5496_v23, 4  ;;  %v5550_v53 = vld [vmem:[%s5755_s5] sm:$0x3] }
 0x2c6   : > { %v3315_v57 = vpop.permute.xlu1 %3314 }
 0x2c7   : > { %v3235_v45 = vsel %vm370_vm0, %v3230_v6, %v3231_v30  ;;  %v3324_v35 = vrot.slane %v3315_v57, 4 }
 0x2c8   : > { %v3236_v63 = vsel %vm1482_vm6, %v3221_v62, %v3235_v45  ;;  %v5503_v7 = vpop.permute.xlu0 %2673  ;;  %v3458_v9 = vld [vmem:[#allocation2 + $0xa0] sm:$0x33] }
 0x2c9   : > { %3249 = vst [vmem:[#allocation2 + $0x78] sm:$0x33] %v3236_v63  ;;  %v2682_v2 = vrot.slane %v5503_v7, 4  ;;  %v4171_v10 = vcombine.high %v3458_v9, %v3458_v9  ;;  %v4170_v20 = vcombine.low %v3458_v9, %v3458_v9 }
 0x2ca   : > { %v2766_v3 = vpop.permute.xlu1 %2765 }
 0x2cb   : > { %v2686_v27 = vsel %vm370_vm0, %v2681_v51, %v2682_v2  ;;  %4180 = vmatprep.subr.msk.bf16.mxu1 %vm390_vm11, %v4171_v10  ;;  %v3599_v37 = vsel %vm390_vm11, %v4170_v20, 0  ;;  %v2775_v16 = vrot.slane %v2766_v3, 4 }
 0x2cc   : > { %v2687_v42 = vsel %vm372_vm7, %v2672_v25, %v2686_v27  ;;  %v5512_v26 = vpop.permute.xlu0 %2856  ;;  %3639 = vmatpush1.bf16.msra.mxu1 %v3599_v37 }
 0x2cd   : > { %2700 = vst [vmem:[#allocation2] sm:$0x33] %v2687_v42  ;;  %v2865_v47 = vrot.slane %v5512_v26, 4 }
 0x2ce   : > { %v2949_v0 = vpop.permute.xlu1 %2948 }
 0x2cf   : > { %v2869_v46 = vsel %vm370_vm0, %v2864_v44, %v2865_v47  ;;  %v2958_v25 = vrot.slane %v2949_v0, 4 }
 0x2d0   : > { %v2870_v4 = vsel %vm746_vm9, %v2855_v54, %v2869_v46  ;;  %v5519_v33 = vpop.permute.xlu0 %3133 }
 0x2d1   : > { %2883 = vst [vmem:[#allocation2 + $0x28] sm:$0x33] %v2870_v4  ;;  %v3142_v5 = vrot.slane %v5519_v33, 4 }
 0x2d3   : > { %v3146_v41 = vsel %vm370_vm0, %v3141_v13, %v3142_v5 }
 0x2d4   : > { %v3147_v40 = vsel %vm1303_vm5, %v3132_v1, %v3146_v41  ;;  %v5526_v21 = vpop.permute.xlu0 %3316 }
 0x2d5   : > { %3160 = vst [vmem:[#allocation2 + $0x50] sm:$0xcc] %v3147_v40  ;;  %v3325_v8 = vrot.slane %v5526_v21, 4 }
 0x2d7   : > { %v3329_v61 = vsel %vm370_vm0, %v3324_v35, %v3325_v8 }
 0x2d8   : > { %v3330_v17 = vsel %vm1671_vm1, %v3315_v57, %v3329_v61  ;;  %v5533_v60 = vpop.permute.xlu0 %2767 }
 0x2d9   : > { %3343 = vst [vmem:[#allocation2 + $0x78] sm:$0xcc] %v3330_v17  ;;  %v2776_v56 = vrot.slane %v5533_v60, 4 }
 0x2db   : > { %v2780_v38 = vsel %vm370_vm0, %v2775_v16, %v2776_v56 }
 0x2dc   : > { %v2781_v62 = vsel %vm567_vm8, %v2766_v3, %v2780_v38  ;;  %v5540_v55 = vpop.permute.xlu0 %2950 }
 0x2dd   : > { %2794 = vst [vmem:[#allocation2] sm:$0xcc] %v2781_v62  ;;  %v2959_v12 = vrot.slane %v5540_v55, 4 }
 0x2df   : > { %v2963_v29 = vsel %vm370_vm0, %v2958_v25, %v2959_v12 }
 0x2e0   : > { %v2964_v24 = vsel %vm5763_vm14, %v2949_v0, %v2963_v29  ;;  %v4431_v22 = vld [vmem:[#allocation2 + $0x50] ss:$40 sps:$4 sm:$0xff]   ;;  %v4433_v54 = vld [vmem:[#allocation2 + $0x54] ss:$40 sps:$4 sm:$0xff]  }
 0x2e1   : > { %2977 = vst [vmem:[#allocation2 + $0x28] sm:$0xcc] %v2964_v24  ;;  %3640 = vmatprep.subr.bf16.mxu1 %v4433_v54 }
 0x2e2   : > { %3641 = vmatpush1.bf16.msra.mxu1 %v4431_v22 }
 0x2e8   : > { %v4434_v6 = vld [vmem:[#allocation2] ss:$40 sps:$4 sm:$0xff]   ;;  %v4436_v50 = vld [vmem:[#allocation2 + $0x4] ss:$40 sps:$4 sm:$0xff]  }
 0x2e9   : > { %3642 = vmatprep.subr.bf16.mxu1 %v4436_v50 }
 0x2ea   : > { %3643 = vmatpush1.bf16.msra.mxu1 %v4434_v6 }
 0x2ed   : > { %4181 = vmatmul.mubr.msk.bf16.vlgmr.msra.gmra.mxu1 %vm3594_vm15, %v5550_v53 }
 0x2ee   : > { %3701 = vmatprep.mubr.bf16.mxu1 %v4485_v28 }
 0x2f0   : > { %v3408_v51 = vpop.permute.xlu1 %3407 }
 0x2f1   : > { %v3415_v45 = vrot.slane %v3408_v51, 4 }
 0x2f3   : > { %v3420_v63 = vsel %vm370_vm0, %v3414_v32, %v3415_v45 }
 0x2f4   : > { %v3421_v1 = vsel %vm1850_vm2, %v5478_v14, %v3420_v63  ;;  %v3042_v9 = vpop.permute.xlu1 %3041 }
 0x2f5   : > { %3433 = vst [vmem:[#allocation2 + $0xa8] sm:$0x33] %v3421_v1  ;;  %v3049_v10 = vrot.slane %v3042_v9, 4 }
 0x2f7   : > { %v3054_v20 = vsel %vm370_vm0, %v3048_v49, %v3049_v10 }
 0x2f8   : > { %v3055_v44 = vsel %vm1114_vm4, %v5489_v11, %v3054_v20  ;;  %v3225_v27 = vpop.permute.xlu1 %3224 }
 0x2f9   : > { %3067 = vst [vmem:[#allocation2 + $0x58] sm:$0x33] %v3055_v44  ;;  %v3232_v37 = vrot.slane %v3225_v27, 4 }
 0x2fb   : > { %v3237_v32 = vsel %vm370_vm0, %v3231_v30, %v3232_v37 }
 0x2fc   : > { %v3238_v14 = vsel %vm1482_vm6, %v5496_v23, %v3237_v32  ;;  %v2676_v42 = vpop.permute.xlu1 %2675  ;;  %v3459_v57 = vld [vmem:[#allocation2 + $0xa8] sm:$0x33] }
 0x2fd   : > { %3250 = vst [vmem:[#allocation2 + $0x80] sm:$0x33] %v3238_v14  ;;  %v2683_v13 = vrot.slane %v2676_v42, 4  ;;  %v4173_v46 = vcombine.high %v3459_v57, %v3459_v57  ;;  %v4172_v4 = vcombine.low %v3459_v57, %v3459_v57 }
 0x2ff   : > { %v2688_v11 = vsel %vm370_vm0, %v2682_v2, %v2683_v13  ;;  %4182 = vmatprep.subr.msk.bf16.mxu1 %vm390_vm11, %v4173_v46  ;;  %v3605_v35 = vsel %vm390_vm11, %v4172_v4, 0 }
 0x300   : > { %v5574_v49 = vpop.permute.xlu0 %3409  ;;  %v2689_v30 = vsel %vm372_vm7, %v5503_v7, %v2688_v11  ;;  %3680 = vmatpush1.bf16.msra.mxu1 %v3605_v35  ;;  %v2859_v41 = vpop.permute.xlu1 %2858 }
 0x301   : > { %v3416_v23 = vrot.slane %v5574_v49, 4  ;;  %2701 = vst [vmem:[#allocation2 + $0x8] sm:$0x33] %v2689_v30  ;;  %v2866_v3 = vrot.slane %v2859_v41, 4 }
 0x303   : > { %v3422_v40 = vsel %vm370_vm0, %v3415_v45, %v3416_v23  ;;  %v2871_v61 = vsel %vm370_vm0, %v2865_v47, %v2866_v3 }
 0x304   : > { %v3423_v2 = vsel %vm1850_vm2, %v3408_v51, %v3422_v40  ;;  %v5587_v17 = vpop.permute.xlu0 %3043  ;;  %v2872_v7 = vsel %vm746_vm9, %v5512_v26, %v2871_v61  ;;  %v3136_v0 = vpop.permute.xlu1 %3135 }
 0x305   : > { %3434 = vst [vmem:[#allocation2 + $0xb0] sm:$0x33] %v3423_v2  ;;  %v3050_v16 = vrot.slane %v5587_v17, 4  ;;  %2884 = vst [vmem:[#allocation2 + $0x30] sm:$0x33] %v2872_v7  ;;  %v3143_v38 = vrot.slane %v3136_v0, 4 }
 0x307   : > { %v3056_v62 = vsel %vm370_vm0, %v3049_v10, %v3050_v16  ;;  %v3148_v47 = vsel %vm370_vm0, %v3142_v5, %v3143_v38 }
 0x308   : > { %v3057_v25 = vsel %vm1114_vm4, %v3042_v9, %v3056_v62  ;;  %v5599_v29 = vpop.permute.xlu0 %3226  ;;  %v3149_v26 = vsel %vm1303_vm5, %v5519_v33, %v3148_v47  ;;  %v3319_v22 = vpop.permute.xlu1 %3318 }
 0x309   : > { %3068 = vst [vmem:[#allocation2 + $0x60] sm:$0x33] %v3057_v25  ;;  %v3233_v24 = vrot.slane %v5599_v29, 4  ;;  %3161 = vst [vmem:[#allocation2 + $0x58] sm:$0xcc] %v3149_v26  ;;  %v3326_v54 = vrot.slane %v3319_v22, 4 }
 0x30b   : > { %v3239_v6 = vsel %vm370_vm0, %v3232_v37, %v3233_v24  ;;  %v3331_v5 = vsel %vm370_vm0, %v3325_v8, %v3326_v54 }
 0x30c   : > { %v3240_v50 = vsel %vm1482_vm6, %v3225_v27, %v3239_v6  ;;  %v5611_v51 = vpop.permute.xlu0 %2677  ;;  %v3460_v45 = vld [vmem:[#allocation2 + $0xb0] sm:$0x33]  ;;  %v3332_v33 = vsel %vm1671_vm1, %v5526_v21, %v3331_v5  ;;  %v2770_v1 = vpop.permute.xlu1 %2769 }
 0x30d   : > { %3251 = vst [vmem:[#allocation2 + $0x88] sm:$0x33] %v3240_v50  ;;  %v2684_v63 = vrot.slane %v5611_v51, 4  ;;  %v4175_v9 = vcombine.high %v3460_v45, %v3460_v45  ;;  %v4174_v10 = vcombine.low %v3460_v45, %v3460_v45  ;;  %3344 = vst [vmem:[#allocation2 + $0x80] sm:$0xcc] %v3332_v33  ;;  %v2777_v20 = vrot.slane %v2770_v1, 4 }
 0x30f   : > { %v2690_v44 = vsel %vm370_vm0, %v2683_v13, %v2684_v63  ;;  %4184 = vmatprep.subr.msk.bf16.mxu0 %vm390_vm11, %v4175_v9  ;;  %v3611_v8 = vsel %vm390_vm11, %v4174_v10, 0  ;;  %v2782_v21 = vsel %vm370_vm0, %v2776_v56, %v2777_v20 }
 0x310   : > { %v2691_v27 = vsel %vm372_vm7, %v2676_v42, %v2690_v44  ;;  %v5625_v37 = vpop.permute.xlu0 %2860  ;;  %3721 = vmatpush1.bf16.msra.mxu0 %v3611_v8  ;;  %v2783_v32 = vsel %vm567_vm8, %v5533_v60, %v2782_v21  ;;  %v5630_v57 = vpop.permute.xlu1 %2952 }
 0x311   : > { %2702 = vst [vmem:[#allocation2 + $0x10] sm:$0x33] %v2691_v27  ;;  %v2867_v14 = vrot.slane %v5625_v37, 4  ;;  %2795 = vst [vmem:[#allocation2 + $0x8] sm:$0xcc] %v2783_v32  ;;  %v2960_v13 = vrot.slane %v5630_v57, 4 }
 0x313   : > { %v2873_v42 = vsel %vm370_vm0, %v2866_v3, %v2867_v14  ;;  %v2965_v46 = vsel %vm370_vm0, %v2959_v12, %v2960_v13 }
 0x314   : > { %v2874_v56 = vsel %vm746_vm9, %v2859_v41, %v2873_v42  ;;  %v3138_v4 = vpop.permute.xlu0 %3137  ;;  %v2966_v60 = vsel %vm5764_vm3, %v5540_v55, %v2965_v46  ;;  %v3412_v35 = vpop.permute.xlu1 %3411  ;;  %v4441_v30 = vld [vmem:[#allocation2 + $0x58] ss:$40 sps:$4 sm:$0xff]   ;;  %v4443_v40 = vld [vmem:[#allocation2 + $0x5c] ss:$40 sps:$4 sm:$0xff]  }
 0x315   : > { %2885 = vst [vmem:[#allocation2 + $0x38] sm:$0x33] %v2874_v56  ;;  %v3144_v11 = vrot.slane %v3138_v4, 4  ;;  %2978 = vst [vmem:[#allocation2 + $0x30] sm:$0xcc] %v2966_v60  ;;  %v3417_v2 = vrot.slane %v3412_v35, 4  ;;  %3681 = vmatprep.subr.bf16.mxu1 %v4443_v40 }
 0x316   : > { %3682 = vmatpush1.bf16.msra.mxu1 %v4441_v30 }
 0x317   : > { %v3150_v61 = vsel %vm370_vm0, %v3143_v38, %v3144_v11  ;;  %v3424_v12 = vsel %vm370_vm0, %v3416_v23, %v3417_v2  ;;  %v3426_v3 = vsel %vm1850_vm2, %v3412_v35, %v3417_v2 }
 0x318   : > { %v3151_v41 = vsel %vm1303_vm5, %v3136_v0, %v3150_v61  ;;  %v3321_v7 = vpop.permute.xlu0 %3320  ;;  %v3425_v55 = vsel %vm1850_vm2, %v5574_v49, %v3424_v12  ;;  %3436 = vst.msk [vmem:[#allocation2 + $0xc0] sm:$0x33] %vm5086_vm13, %v3426_v3  ;;  %v3140_v38 = vpop.permute.xlu1 %3139  ;;  %vm5765_vm2 = vmmov %vm5764_vm3 }
 0x319   : > { %3162 = vst [vmem:[#allocation2 + $0x60] sm:$0xcc] %v3151_v41  ;;  %v3327_v62 = vrot.slane %v3321_v7, 4  ;;  %3435 = vst [vmem:[#allocation2 + $0xb8] sm:$0x33] %v3425_v55  ;;  %v3145_v25 = vrot.slane %v3140_v38, 4 }
 0x31b   : > { %v3333_v0 = vsel %vm370_vm0, %v3326_v54, %v3327_v62  ;;  %v3152_v23 = vsel %vm370_vm0, %v3144_v11, %v3145_v25  ;;  %v3154_v26 = vsel %vm1303_vm5, %v3140_v38, %v3145_v25 }
 0x31c   : > { %v3334_v47 = vsel %vm1671_vm1, %v3319_v22, %v3333_v0  ;;  %v2772_v6 = vpop.permute.xlu0 %2771  ;;  %v3153_v50 = vsel %vm1303_vm5, %v3138_v4, %v3152_v23  ;;  %3164 = vst.msk [vmem:[#allocation2 + $0x70] sm:$0xcc] %vm5112_vm12, %v3154_v26  ;;  %v3323_v5 = vpop.permute.xlu1 %3322  ;;  %v4444_v45 = vld [vmem:[#allocation2 + $0x8] ss:$40 sps:$4 sm:$0xff]   ;;  %v4446_v33 = vld [vmem:[#allocation2 + $0xc] ss:$40 sps:$4 sm:$0xff]  }
 0x31d   : > { %3345 = vst [vmem:[#allocation2 + $0x88] sm:$0xcc] %v3334_v47  ;;  %v2778_v49 = vrot.slane %v2772_v6, 4  ;;  %3163 = vst [vmem:[#allocation2 + $0x68] sm:$0xcc] %v3153_v50  ;;  %v3328_v9 = vrot.slane %v3323_v5, 4  ;;  %3683 = vmatprep.subr.bf16.mxu1 %v4446_v33 }
 0x31e   : > { %3684 = vmatpush1.bf16.msra.mxu1 %v4444_v45 }
 0x31f   : > { %v2784_v54 = vsel %vm370_vm0, %v2777_v20, %v2778_v49  ;;  %v3335_v10 = vsel %vm370_vm0, %v3327_v62, %v3328_v9  ;;  %v3337_v44 = vsel %vm1671_vm1, %v3323_v5, %v3328_v9  ;;  %v3462_v47 = vld [vmem:[#allocation2 + $0xc0] sm:$0x33] }
 0x320   : > { %v2785_v22 = vsel %vm567_vm8, %v2770_v1, %v2784_v54  ;;  %v2955_v8 = vpop.permute.xlu0 %2954  ;;  %v3336_v27 = vsel %vm1671_vm1, %v3321_v7, %v3335_v10  ;;  %3347 = vst.msk [vmem:[#allocation2 + $0x98] sm:$0xcc] %vm5112_vm12, %v3337_v44  ;;  %v2774_v32 = vpop.permute.xlu1 %2773  ;;  %v3461_v42 = vld [vmem:[#allocation2 + $0xb8] sm:$0x33]  ;;  %vm5766_vm1 = vmmov %vm5765_vm2  ;;  %v4178_v5 = vcombine.low %v3462_v47, %v3462_v47 }
 0x321   : > { %2796 = vst [vmem:[#allocation2 + $0x10] sm:$0xcc] %v2785_v22  ;;  %v2961_v21 = vrot.slane %v2955_v8, 4  ;;  %3346 = vst [vmem:[#allocation2 + $0x90] sm:$0xcc] %v3336_v27  ;;  %v2779_v20 = vrot.slane %v2774_v32, 4  ;;  %v4177_v56 = vcombine.high %v3461_v42, %v3461_v42  ;;  %v4176_v46 = vcombine.low %v3461_v42, %v3461_v42  ;;  %4183 = vmatmul.mubr.msk.bf16.vlgmr.msra.gmra.mxu1 %vm3594_vm15, %v5550_v53 }
 0x322   : > { %3783 = vmatprep.mubr.bf16.mxu1 %v4485_v28  ;;  %vm5767_vm5 = vmmov %vm5766_vm1  ;;  %v3623_v54 = vsel %vm390_vm11, %v4178_v5, 0 }
 0x323   : > { %v2967_v1 = vsel %vm370_vm0, %v2960_v13, %v2961_v21  ;;  %v2786_v60 = vsel %vm370_vm0, %v2778_v49, %v2779_v20  ;;  %v2788_v11 = vsel %vm567_vm8, %v2774_v32, %v2779_v20  ;;  %4186 = vmatprep.subr.msk.bf16.mxu1 %vm390_vm11, %v4177_v56  ;;  %v3617_v30 = vsel %vm390_vm11, %v4176_v46, 0 }
 0x324   : > { %v2968_v4 = vsel %vm5765_vm2, %v5630_v57, %v2967_v1  ;;  %v3046_v35 = vpop.permute.xlu0 %3045  ;;  %v4448_v40 = vld [vmem:[#allocation2 + $0x60] ss:$40 sps:$4 sm:$0xff]   ;;  %v4450_v2 = vld [vmem:[#allocation2 + $0x64] ss:$40 sps:$4 sm:$0xff]   ;;  %v2787_v13 = vsel %vm567_vm8, %v2772_v6, %v2786_v60  ;;  %2798 = vst.msk [vmem:[#allocation2 + $0x20] sm:$0xcc] %vm5112_vm12, %v2788_v11  ;;  %3762 = vmatpush1.bf16.msra.mxu1 %v3617_v30  ;;  %v2957_v61 = vpop.permute.xlu1 %2956  ;;  %v4179_v49 = vcombine.high %v3462_v47, %v3462_v47 }
 0x325   : > { %2979 = vst [vmem:[#allocation2 + $0x38] sm:$0xcc] %v2968_v4  ;;  %v3051_v57 = vrot.slane %v3046_v35, 4  ;;  %2797 = vst [vmem:[#allocation2 + $0x18] sm:$0xcc] %v2787_v13  ;;  %v2962_v41 = vrot.slane %v2957_v61, 4  ;;  %3722 = vmatprep.subr.bf16.mxu0 %v4450_v2 }
 0x326   : > { %3723 = vmatpush1.bf16.msra.mxu0 %v4448_v40 }
 0x327   : > { %v3058_v12 = vsel %vm370_vm0, %v3050_v16, %v3051_v57  ;;  %v3060_v3 = vsel %vm1114_vm4, %v3046_v35, %v3051_v57  ;;  %v2969_v55 = vsel %vm370_vm0, %v2961_v21, %v2962_v41  ;;  %v2971_v62 = vsel %vm5766_vm1, %v2957_v61, %v2962_v41 }
 0x328   : > { %v3059_v7 = vsel %vm1114_vm4, %v5587_v17, %v3058_v12  ;;  %3070 = vst.msk [vmem:[#allocation2 + $0x70] sm:$0x33] %vm5086_vm13, %v3060_v3  ;;  %v3229_v38 = vpop.permute.xlu0 %3228  ;;  %v2970_v25 = vsel %vm5767_vm5, %v2955_v8, %v2969_v55  ;;  %vm3877_vm4 = vcmask 31748  }
 0x329   : > { %3069 = vst [vmem:[#allocation2 + $0x68] sm:$0x33] %v3059_v7  ;;  %2981 = vst.msk [vmem:[#allocation2 + $0x48] sm:$0xcc] %vm5112_vm12, %v2971_v62  ;;  %v3234_v16 = vrot.slane %v3229_v38, 4 }
 0x32a   : > { %2980 = vst [vmem:[#allocation2 + $0x40] sm:$0xcc] %v2970_v25 }
 0x32b   : > { %v3241_v17 = vsel %vm370_vm0, %v3233_v24, %v3234_v16  ;;  %v3243_v0 = vsel %vm1482_vm6, %v3229_v38, %v3234_v16 }
 0x32c   : > { %v3242_v23 = vsel %vm1482_vm6, %v5599_v29, %v3241_v17  ;;  %3253 = vst.msk [vmem:[#allocation2 + $0x98] sm:$0x33] %vm5086_vm13, %v3243_v0  ;;  %v2680_v26 = vpop.permute.xlu0 %2679  ;;  %v4451_v6 = vld [vmem:[#allocation2 + $0x10] ss:$40 sps:$4 sm:$0xff]   ;;  %v4453_v50 = vld [vmem:[#allocation2 + $0x14] ss:$40 sps:$4 sm:$0xff]   ;;  %vm3878_vm6 = vmor %vm3877_vm4, %vm370_vm0 }
 0x32d   : > { %3252 = vst [vmem:[#allocation2 + $0x90] sm:$0x33] %v3242_v23  ;;  %v2685_v19 = vrot.slane %v2680_v26, 4  ;;  %3724 = vmatprep.subr.bf16.mxu0 %v4453_v50 }
 0x32e   : > { %3725 = vmatpush1.bf16.msra.mxu0 %v4451_v6 }
 0x32f   : > { %v2692_v24 = vsel %vm370_vm0, %v2684_v63, %v2685_v19  ;;  %v2694_v45 = vsel %vm372_vm7, %v2680_v26, %v2685_v19  ;;  %4188 = vmatprep.subr.msk.bf16.mxu0 %vm390_vm11, %v4179_v49 }
 0x330   : > { %v2693_v29 = vsel %vm372_vm7, %v5611_v51, %v2692_v24  ;;  %2704 = vst.msk [vmem:[#allocation2 + $0x20] sm:$0x33] %vm5086_vm13, %v2694_v45  ;;  %v2863_v33 = vpop.permute.xlu0 %2862 }
 0x331   : > { %2703 = vst [vmem:[#allocation2 + $0x18] sm:$0x33] %v2693_v29  ;;  %v2868_v9 = vrot.slane %v2863_v33, 4  ;;  %4185 = vmatmul.mubr.msk.bf16.vlgmr.msra.gmra.mxu0 %vm3594_vm15, %v5550_v53 }
 0x332   : > { %3803 = vmatpush1.bf16.msra.mxu0 %v3623_v54  ;;  %3824 = vmatprep.mubr.bf16.mxu0 %v4485_v28 }
 0x333   : > { %v2875_v63 = vsel %vm370_vm0, %v2867_v14, %v2868_v9  ;;  %v2877_v22 = vsel %vm746_vm9, %v2863_v33, %v2868_v9  ;;  %v4458_v51 = vld [vmem:[#allocation2 + $0x74] ss:$40 sps:$4 sm:$0xff]   ;;  %v4456_v27 = vld [vmem:[#allocation2 + $0x70] ss:$40 sps:$4 sm:$0xff]  }
 0x334   : > { %v2876_v10 = vsel %vm746_vm9, %v5625_v37, %v2875_v63  ;;  %2887 = vst.msk [vmem:[#allocation2 + $0x48] sm:$0x33] %vm5086_vm13, %v2877_v22  ;;  %v4459_v44 = vld [vmem:[#allocation2 + $0x68] ss:$40 sps:$4 sm:$0xff]   ;;  %v4461_v8 = vld [vmem:[#allocation2 + $0x6c] ss:$40 sps:$4 sm:$0xff]   ;;  %3804 = vmatprep.subr.bf16.mxu0 %v4458_v51 }
 0x335   : > { %2886 = vst [vmem:[#allocation2 + $0x40] sm:$0x33] %v2876_v10  ;;  %3763 = vmatprep.subr.bf16.mxu1 %v4461_v8 }
 0x336   : > { %3764 = vmatpush1.bf16.msra.mxu1 %v4459_v44  ;;  %3805 = vmatpush1.bf16.msra.mxu0 %v4456_v27 }
 0x33b   : > { %v4462_v14 = vld [vmem:[#allocation2 + $0x20] ss:$40 sps:$4 sm:$0xff]   ;;  %v4464_v21 = vld [vmem:[#allocation2 + $0x24] ss:$40 sps:$4 sm:$0xff]  }
 0x33c   : > { %v4465_v32 = vld [vmem:[#allocation2 + $0x18] ss:$40 sps:$4 sm:$0xff]   ;;  %v4467_v42 = vld [vmem:[#allocation2 + $0x1c] ss:$40 sps:$4 sm:$0xff]   ;;  %3806 = vmatprep.subr.bf16.mxu0 %v4464_v21 }
 0x33d   : > { %3765 = vmatprep.subr.bf16.mxu1 %v4467_v42  ;;  %3807 = vmatpush1.bf16.msra.mxu0 %v4462_v14  ;;  %v3467_v28 = vpop.permute.xlu0 %3466 }
 0x33e   : > { %3766 = vmatpush1.bf16.msra.mxu1 %v4465_v32 }
 0x340   : > { %4189 = vmatmul.mubr.msk.bf16.vlgmr.msra.gmra.mxu0 %vm3594_vm15, %v5550_v53 }
 0x341   : > { %4187 = vmatmul.mubr.msk.bf16.vlgmr.msra.gmra.mxu1 %vm3594_vm15, %v5550_v53 }
 0x3ad   : > { %v3662_v18 = vpop.f32.mrf.mxu1 }
 0x3ae   : > { %v3663_v37 = vadd.f32 %v3662_v18, %v3467_v28 }
 0x3af   : > { %v3664_v20 = vpop.f32.mrf.mxu1 }
 0x3b0   : > { %v3833_v56 = vmax.f32 %v3663_v37, 0.0  ;;  %v3665_v46 = vadd.f32 %v3664_v20, %v3467_v28 }
 0x3b1   : > { %v3666_v1 = vpop.f32.mrf.mxu1 }
 0x3b2   : > { %v3834_v4 = vmax.f32 %v3665_v46, 0.0  ;;  %v3843_v11 = vmul.f32 %v3833_v56, %v5365_v31 }
 0x3b3   : > { %v3667_v60 = vpop.f32.mrf.mxu1 }
 0x3b4   : > { %v3844_v35 = vmul.f32 %v3834_v4, %v5370_v52 }
 0x3b6   : > { %v3863_v53 = vcombine.low %v3843_v11, %v3844_v35 }
 0x3b8   : > { %3873 = vst [vmem:[%s5731_s14] sm:$0xff] %v3863_v53 }
 0x3e1   : > { %v3703_v30 = vpop.f32.mrf.mxu1 }
 0x3e2   : > { %v3704_v40 = vadd.f32 %v3703_v30, %v3467_v28 }
 0x3e3   : > { %v3705_v2 = vpop.f32.mrf.mxu1 }
 0x3e4   : > { %v3835_v13 = vmax.f32 %v3704_v40, 0.0  ;;  %v3706_v57 = vadd.f32 %v3705_v2, %v3467_v28 }
 0x3e5   : > { %v3707_v61 = vpop.f32.mrf.mxu1 }
 0x3e6   : > { %v3836_v41 = vmax.f32 %v3706_v57, 0.0  ;;  %v3845_v31 = vmul.f32 %v3835_v13, %v5378_v58 }
 0x3e7   : > { %v3708_v12 = vpop.f32.mrf.mxu1 }
 0x3e8   : > { %v3846_v52 = vmul.f32 %v3836_v41, %v5381_v15 }
 0x3ea   : > { %v3864_v3 = vcombine.low %v3845_v31, %v3846_v52 }
 0x3ec   : > { %3874 = vst [vmem:[%s5731_s14 + $0x8] sm:$0xff] %v3864_v3 }
 0x3f1   : > { %v3744_v7 = vpop.f32.mrf.mxu0 }
 0x3f2   : > { %v3745_v55 = vadd.f32 %v3744_v7, %v3467_v28 }
 0x3f3   : > { %v3746_v62 = vpop.f32.mrf.mxu0 }
 0x3f4   : > { %v3837_v38 = vmax.f32 %v3745_v55, 0.0  ;;  %v3747_v25 = vadd.f32 %v3746_v62, %v3467_v28 }
 0x3f5   : > { %v3748_v16 = vpop.f32.mrf.mxu0 }
 0x3f6   : > { %v3838_v17 = vmax.f32 %v3747_v25, 0.0  ;;  %v3847_v47 = vmul.f32 %v3837_v38, %v5389_v39 }
 0x3f7   : > { %v3749_v0 = vpop.f32.mrf.mxu0 }
 0x3f8   : > { %v3848_v23 = vmul.f32 %v3838_v17, %v5392_v43 }
 0x3fa   : > { %v3865_v26 = vcombine.low %v3847_v47, %v3848_v23 }
 0x3fc   : > { %3875 = vst [vmem:[%s5731_s14 + $0x10] sm:$0xff] %v3865_v26 }
 0x400   : > { %v3826_v6 = vpop.f32.mrf.mxu0 }
 0x401   : > { %v3827_v58 = vadd.f32 %v3826_v6, %v3467_v28  ;;  %v3785_v50 = vpop.f32.mrf.mxu1 }
 0x402   : > { %v3786_v15 = vadd.f32 %v3785_v50, %v3467_v28  ;;  %v3828_v19 = vpop.f32.mrf.mxu0 }
 0x403   : > { %v3841_v49 = vmax.f32 %v3827_v58, 0.0  ;;  %v3829_v5 = vadd.f32 %v3828_v19, %v3467_v28  ;;  %v3787_v24 = vpop.f32.mrf.mxu1 }
 0x404   : > { %v3839_v45 = vmax.f32 %v3786_v15, 0.0  ;;  %v3788_v29 = vadd.f32 %v3787_v24, %v3467_v28  ;;  %v3830_v33 = vpop.f32.mrf.mxu0 }
 0x405   : > { %v3842_v9 = vmax.f32 %v3829_v5, 0.0  ;;  %v3789_v39 = vpop.f32.mrf.mxu1  ;;  %v3851_v63 = vmul.f32 %v3841_v49, %v5413_v34 }
 0x406   : > { %v3840_v54 = vmax.f32 %v3788_v29, 0.0  ;;  %v3831_v43 = vpop.f32.mrf.mxu0  ;;  %v3849_v10 = vmul.f32 %v3839_v45, %v5400_v36 }
 0x407   : > { %v3852_v22 = vmul.f32 %v3842_v9, %v5418_v59  ;;  %v3790_v51 = vpop.f32.mrf.mxu1 }
 0x408   : > { %v3850_v44 = vmul.f32 %v3840_v54, %v5403_v48 }
 0x409   : > { %v3867_v8 = vcombine.low %v3851_v63, %v3852_v22 }
 0x40a   : > { %v3866_v27 = vcombine.low %v3849_v10, %v3850_v44 }
 0x40b   : > { %3879 = vst.msk [vmem:[%s5731_s14 + $0x20] sm:$0xff] %vm3878_vm6, %v3867_v8 }
 0x40c   : > { %3876 = vst [vmem:[%s5731_s14 + $0x18] sm:$0xff] %v3866_v27 }
 0x40d PF: > { %s17_s24 = sadd.s32 1, %s4474_s24  }
 0x40e   : > { %p14_p4 = scmp.ge.s32.totalorder %s17_s24, 4  }
 0x410   :  { %16 = sbr.rel (!%p14_p4) target bundleno = 1 (0x1), region = 81 }

</bundles_post_ra>
